<compile_context>
chip_gen: v6e
topology: v6e:2x2x1
jax: 0.10.0
libtpu: 0.0.40
codegen_flags: <defaults>
</compile_context>

<pallas_src>
import functools

import jax
import jax.numpy as jnp
from jax.experimental import pallas as pl
from jax.experimental.pallas import tpu as pltpu


VMEM_LIMIT_BYTES = 32 * 1024 * 1024  # explicit; fits v5e/v6e (128 MiB) and v7x (64 MiB)


def _round_up(x, m):
    return (x + m - 1) // m * m


# ----------------------------------------------------------------------------
# Pallas kernel 1: M-tiled (X @ W + b) + ReLU (used for the conv-as-matmul path)
#   x: (block_m, K) bf16   w: (K, N) bf16 (VMEM-resident across grid)   b: (1, N) f32
# ----------------------------------------------------------------------------
def _mm_bias_relu_kernel(x_ref, w_ref, b_ref, o_ref):
    acc = jnp.dot(x_ref[...], w_ref[...], preferred_element_type=jnp.float32)
    acc = acc + b_ref[...]                      # f32 epilogue, (1,N) broadcast
    o_ref[...] = jnp.maximum(acc, 0.0).astype(o_ref.dtype)


def _mm_bias_relu(x_bf16, w_bf16, b_f32, out_dtype=jnp.bfloat16):
    """relu(x @ w + b). x:(M,K) bf16, w:(K,N) bf16, b:(1,N) f32."""
    M, K = x_bf16.shape
    N = w_bf16.shape[1]
    block_m = min(256, _round_up(M, 16))        # 16-row multiple (bf16 sublane pack)
    M_pad = _round_up(M, block_m)
    if M_pad > M:
        x_bf16 = jnp.pad(x_bf16, ((0, M_pad - M), (0, 0)))
    out = pl.pallas_call(
        _mm_bias_relu_kernel,
        out_shape=jax.ShapeDtypeStruct((M_pad, N), out_dtype),
        grid=(M_pad // block_m,),
        in_specs=[
            pl.BlockSpec((block_m, K), lambda i: (i, 0)),
            pl.BlockSpec((K, N), lambda i: (0, 0)),     # same block -> stays in VMEM
            pl.BlockSpec((1, N), lambda i: (0, 0)),     # bias hoisted, no re-broadcast
        ],
        out_specs=pl.BlockSpec((block_m, N), lambda i: (i, 0)),
        compiler_params=pltpu.CompilerParams(
            dimension_semantics=("parallel",),
            vmem_limit_bytes=VMEM_LIMIT_BYTES,
        ),
    )(x_bf16, w_bf16, b_f32)
    return out[:M] if M_pad > M else out


# ----------------------------------------------------------------------------
# Pallas kernel 2: fused classifier head — fc -> (Linear+ReLU) -> Linear
# All three matmuls in one launch; intermediates live in VMEM/vregs only.
# ----------------------------------------------------------------------------
def _head_kernel(feat_ref, fcw_ref, fcb_ref, w1_ref, b1_ref, w2_ref, b2_ref, o_ref):
    # Encoder.fc (no activation in Encoder.forward)
    enc = jnp.dot(feat_ref[...], fcw_ref[...],
                  preferred_element_type=jnp.float32) + fcb_ref[...]
    # classifier[0:2]: Linear(512,256) + ReLU
    h = jnp.dot(enc.astype(jnp.bfloat16), w1_ref[...],
                preferred_element_type=jnp.float32) + b1_ref[...]
    h = jnp.maximum(h, 0.0)
    # TODO(synk): Dropout(0.5) is identity at inference; training mask not implemented.
    # classifier[3]: Linear(256, num_classes) — N padded to 128 (lane-dense store)
    logits = jnp.dot(h.astype(jnp.bfloat16), w2_ref[...],
                     preferred_element_type=jnp.float32) + b2_ref[...]
    o_ref[...] = logits.astype(o_ref.dtype)


def classifier_head_pallas(feat_bf16, prep):
    B = feat_bf16.shape[0]
    fc, c1, c2 = prep["fc"], prep["cls1"], prep["cls2"]
    n_pad = c2["w"].shape[1]
    full = lambda shape: pl.BlockSpec(shape, lambda i: (0,) * len(shape))
    out = pl.pallas_call(
        _head_kernel,
        out_shape=jax.ShapeDtypeStruct((B, n_pad), jnp.float32),
        grid=(1,),
        in_specs=[
            full(feat_bf16.shape),
            full(fc["w"].shape), full(fc["b"].shape),
            full(c1["w"].shape), full(c1["b"].shape),
            full(c2["w"].shape), full(c2["b"].shape),
        ],
        out_specs=full((B, n_pad)),
        compiler_params=pltpu.CompilerParams(
            dimension_semantics=("arbitrary",),
            vmem_limit_bytes=VMEM_LIMIT_BYTES,
        ),
    )(feat_bf16, fc["w"], fc["b"], c1["w"], c1["b"], c2["w"], c2["b"])
    return out[:, : prep["num_classes"]]


# ----------------------------------------------------------------------------
# Conv2d = im2col (XLA glue, bf16) + Pallas matmul kernel (hot path).
# ----------------------------------------------------------------------------
def _im2col(x_nhwc, k, stride, pad):
    """x: (B,H,W,C) -> patches (B*Ho*Wo, k*k*C) with column order (kh,kw,c)."""
    B, H, W, C = x_nhwc.shape
    xp = jnp.pad(x_nhwc, ((0, 0), (pad, pad), (pad, pad), (0, 0)))
    Hp, Wp = H + 2 * pad, W + 2 * pad
    Ho = (Hp - k) // stride + 1
    Wo = (Wp - k) // stride + 1
    cols = []
    for kh in range(k):
        for kw in range(k):
            cols.append(
                xp[:, kh:kh + stride * Ho:stride, kw:kw + stride * Wo:stride, :]
            )
    p = jnp.stack(cols, axis=3)                       # (B, Ho, Wo, k*k, C)
    return p.reshape(B * Ho * Wo, k * k * C), Ho, Wo


def conv2d_relu_pallas(x_nhwc, layer, *, stride, pad):
    """PyTorch-semantics Conv2d + ReLU on NHWC bf16 activations."""
    w, b, k, k_pad = layer["w"], layer["b"], layer["k"], layer["k_pad"]
    Cout = w.shape[1]
    B = x_nhwc.shape[0]
    patches, Ho, Wo = _im2col(x_nhwc, k, stride, pad)   # bf16
    K = patches.shape[1]
    if k_pad > K:                                       # e.g. conv1: 27 -> 32
        patches = jnp.pad(patches, ((0, 0), (0, k_pad - K)))
    y = _mm_bias_relu(patches, w, b, out_dtype=jnp.bfloat16)
    return y.reshape(B, Ho, Wo, Cout)


# ----------------------------------------------------------------------------
# Parameters: init in PyTorch layouts, then a ONE-TIME prepare step that
# transposes / permutes / pads / casts everything for the kernels.
# ----------------------------------------------------------------------------
def init_params(key, num_classes=10):
    def nrm(key, shape, scale=0.05):
        return scale * jax.random.normal(key, shape, dtype=jnp.float32)

    ks = jax.random.split(key, 12)
    return {
        "conv1_w": nrm(ks[0], (32, 3, 3, 3)),      "conv1_b": nrm(ks[1], (32,)),
        "conv2_w": nrm(ks[2], (64, 32, 3, 3)),     "conv2_b": nrm(ks[3], (64,)),
        "conv3_w": nrm(ks[4], (128, 64, 3, 3)),    "conv3_b": nrm(ks[5], (128,)),
        "fc_w":    nrm(ks[6], (512, 128 * 4 * 4)), "fc_b":    nrm(ks[7], (512,)),
        "cls1_w":  nrm(ks[8], (256, 512)),         "cls1_b":  nrm(ks[9], (256,)),
        "cls2_w":  nrm(ks[10], (num_classes, 256)),
        "cls2_b":  nrm(ks[11], (num_classes,)),
    }


def prepare_params(p, num_classes=10):
    """One-time conversion to kernel-ready layouts (no per-forward transposes)."""
    def conv_prep(w_oihw, b):
        Cout, Cin, k, _ = w_oihw.shape
        # (Cout,Cin,kh,kw) -> (kh,kw,Cin,Cout) -> (k*k*Cin, Cout), matches im2col
        w = jnp.transpose(w_oihw, (2, 3, 1, 0)).reshape(k * k * Cin, Cout)
        K = w.shape[0]
        Kp = _round_up(K, 32)                       # conv1: 27 -> 32 (MXU/sublane align)
        if Kp > K:
            w = jnp.pad(w, ((0, Kp - K), (0, 0)))
        return {"w": w.astype(jnp.bfloat16),
                "b": b.reshape(1, -1).astype(jnp.float32),
                "k": k, "k_pad": Kp}

    # fc: PyTorch rows are ordered (c,h,w) (NCHW flatten). Permute once to (h,w,c)
    # so the NHWC flatten of the pooled feature map matches PyTorch exactly.
    fcw = p["fc_w"].reshape(512, 128, 4, 4)         # (out, c, h, w)
    fcw = jnp.transpose(fcw, (2, 3, 1, 0)).reshape(4 * 4 * 128, 512)   # (h,w,c) x out

    c2w = p["cls2_w"].T                             # (256, num_classes)
    n_pad = _round_up(max(num_classes, 128), 128)   # lane-dense logits tile
    c2w = jnp.pad(c2w, ((0, 0), (0, n_pad - num_classes)))
    c2b = jnp.pad(p["cls2_b"], (0, n_pad - num_classes))

    return {
        "num_classes": num_classes,
        "conv1": conv_prep(p["conv1_w"], p["conv1_b"]),
        "conv2": conv_prep(p["conv2_w"], p["conv2_b"]),
        "conv3": conv_prep(p["conv3_w"], p["conv3_b"]),
        "fc":   {"w": fcw.astype(jnp.bfloat16),
                 "b": p["fc_b"].reshape(1, -1).astype(jnp.float32)},
        "cls1": {"w": p["cls1_w"].T.astype(jnp.bfloat16),
                 "b": p["cls1_b"].reshape(1, -1).astype(jnp.float32)},
        "cls2": {"w": c2w.astype(jnp.bfloat16),
                 "b": c2b.reshape(1, -1).astype(jnp.float32)},
    }


# ----------------------------------------------------------------------------
# Autoencoder.forward = classifier(encoder(x))
# ----------------------------------------------------------------------------
def autoencoder_forward(prep, x_nchw):
    B = x_nchw.shape[0]
    x = jnp.transpose(x_nchw, (0, 2, 3, 1)).astype(jnp.bfloat16)   # NCHW -> NHWC bf16

    # Encoder convs (Conv2d + ReLU), each an M-tiled Pallas matmul kernel
    x = conv2d_relu_pallas(x, prep["conv1"], stride=1, pad=1)      # (B,16,16,32)
    x = conv2d_relu_pallas(x, prep["conv2"], stride=2, pad=1)      # (B, 8, 8,64)
    x = conv2d_relu_pallas(x, prep["conv3"], stride=2, pad=1)      # (B, 4, 4,128)

    # AdaptiveAvgPool2d((4,4)) — uniform average pooling (exact when H,W are
    # multiples of 4; identity for the 16x16 input path here).
    Bh, H, W, C = x.shape
    pooled = x.astype(jnp.float32).reshape(Bh, 4, H // 4, 4, W // 4, C).mean(axis=(2, 4))

    # NHWC flatten; fc weight rows were pre-permuted so this equals PyTorch's
    # NCHW Flatten + Linear.
    feat = pooled.reshape(B, -1).astype(jnp.bfloat16)              # (B, 2048)

    # Fused head: Encoder.fc -> classifier (Linear+ReLU+Dropout[id]+Linear)
    return classifier_head_pallas(feat, prep)                      # (B, num_classes) f32


if __name__ == "__main__":
    key = jax.random.PRNGKey(0)
    pkey, xkey = jax.random.split(key)
    params = init_params(pkey, num_classes=10)
    prep = prepare_params(params, num_classes=10)

    # Small NCHW input: batch=2, channels=3, spatial=16x16
    x = jax.random.normal(xkey, (2, 3, 16, 16), dtype=jnp.float32)

    fwd = jax.jit(functools.partial(autoencoder_forward, prep))
    logits = fwd(x)
    jax.block_until_ready(logits)
    assert logits.shape == (2, 10), logits.shape
    print("KERNEL_OK")
</pallas_src>

<mosaic_0001>
module attributes {stable_mosaic.version = 11 : i64} {
  func.func @_mm_bias_relu_kernel(%arg0: i32, %arg1: memref<256x32xbf16, #tpu.memory_space<vmem>>, %arg2: memref<32x32xbf16, #tpu.memory_space<vmem>>, %arg3: memref<1x32xf32, #tpu.memory_space<vmem>>, %arg4: memref<256x32xbf16, #tpu.memory_space<vmem>>) attributes {dimension_semantics = [#tpu.dimension_semantics<parallel>], iteration_bounds = array<i64: 2>, scalar_prefetch = 0 : i64, scratch_operands = 0 : i64, tpu.core_type = #tpu.core_type<tc>, window_params = [{transform_indices = @transform_0, window_bounds = array<i64: 256, 32>}, {pipeline_mode = #tpu.pipeline_mode<synchronous>, transform_indices = @transform_1, window_bounds = array<i64: 32, 32>}, {pipeline_mode = #tpu.pipeline_mode<synchronous>, transform_indices = @transform_2, window_bounds = array<i64: 1, 32>}, {transform_indices = @transform_3, window_bounds = array<i64: 256, 32>}]} {
    %c0 = arith.constant 0 : index
    %c0_0 = arith.constant 0 : index
    %0 = vector.load %arg1[%c0, %c0_0] : memref<256x32xbf16, #tpu.memory_space<vmem>>, vector<256x32xbf16>
    %c0_1 = arith.constant 0 : index
    %c0_2 = arith.constant 0 : index
    %1 = vector.load %arg2[%c0_1, %c0_2] : memref<32x32xbf16, #tpu.memory_space<vmem>>, vector<32x32xbf16>
    %cst = arith.constant dense<0.000000e+00> : vector<256x32xf32>
    %2 = tpu.matmul %0, %1, %cst {dimension_numbers = #tpu.dot_dimension_numbers<[1], [0], [0], [1], [0, 0, 1, 1], [], []>} : vector<256x32xbf16>, vector<32x32xbf16>, vector<256x32xf32> -> vector<256x32xf32>
    %c0_3 = arith.constant 0 : index
    %c0_4 = arith.constant 0 : index
    %3 = vector.load %arg3[%c0_3, %c0_4] : memref<1x32xf32, #tpu.memory_space<vmem>>, vector<1x32xf32>
    %4 = vector.broadcast %3 : vector<1x32xf32> to vector<256x32xf32>
    %5 = arith.addf %2, %4 : vector<256x32xf32>
    %cst_5 = arith.constant 0.000000e+00 : f32
    %6 = vector.broadcast %cst_5 : f32 to vector<256x32xf32>
    %7 = arith.maximumf %5, %6 : vector<256x32xf32>
    %8 = arith.truncf %7 : vector<256x32xf32> to vector<256x32xbf16>
    %c0_6 = arith.constant 0 : index
    %c0_7 = arith.constant 0 : index
    %9 = vector.load %arg4[%c0_6, %c0_7] : memref<256x32xbf16, #tpu.memory_space<vmem>>, vector<256x32xbf16>
    tpu.vector_store %arg4[%c0_6, %c0_7], %8 {strides = array<i32>} : memref<256x32xbf16, #tpu.memory_space<vmem>>, vector<256x32xbf16>,
    return
  }
  func.func @transform_0(%arg0: i32) -> (i32, i32) {
    %c0_i32 = arith.constant 0 : i32
    %c0_i32_0 = arith.constant 0 : i32
    return %arg0, %c0_i32 : i32, i32
  }
  func.func @transform_1(%arg0: i32) -> (i32, i32) {
    %c0_i32 = arith.constant 0 : i32
    %c0_i32_0 = arith.constant 0 : i32
    %c0_i32_1 = arith.constant 0 : i32
    return %c0_i32, %c0_i32_0 : i32, i32
  }
  func.func @transform_2(%arg0: i32) -> (i32, i32) {
    %c0_i32 = arith.constant 0 : i32
    %c0_i32_0 = arith.constant 0 : i32
    %c0_i32_1 = arith.constant 0 : i32
    return %c0_i32, %c0_i32_0 : i32, i32
  }
  func.func @transform_3(%arg0: i32) -> (i32, i32) {
    %c0_i32 = arith.constant 0 : i32
    %c0_i32_0 = arith.constant 0 : i32
    return %arg0, %c0_i32 : i32, i32
  }
}

module attributes {stable_mosaic.version = 11 : i64} {
  func.func @_mm_bias_relu_kernel(%arg0: i32, %arg1: memref<128x288xbf16, #tpu.memory_space<vmem>>, %arg2: memref<288x64xbf16, #tpu.memory_space<vmem>>, %arg3: memref<1x64xf32, #tpu.memory_space<vmem>>, %arg4: memref<128x64xbf16, #tpu.memory_space<vmem>>) attributes {dimension_semantics = [#tpu.dimension_semantics<parallel>], iteration_bounds = array<i64: 1>, scalar_prefetch = 0 : i64, scratch_operands = 0 : i64, tpu.core_type = #tpu.core_type<tc>, window_params = [{transform_indices = @transform_0, window_bounds = array<i64: 128, 288>}, {pipeline_mode = #tpu.pipeline_mode<synchronous>, transform_indices = @transform_1, window_bounds = array<i64: 288, 64>}, {pipeline_mode = #tpu.pipeline_mode<synchronous>, transform_indices = @transform_2, window_bounds = array<i64: 1, 64>}, {transform_indices = @transform_3, window_bounds = array<i64: 128, 64>}]} {
    %c0 = arith.constant 0 : index
    %c0_0 = arith.constant 0 : index
    %0 = vector.load %arg1[%c0, %c0_0] : memref<128x288xbf16, #tpu.memory_space<vmem>>, vector<128x288xbf16>
    %c0_1 = arith.constant 0 : index
    %c0_2 = arith.constant 0 : index
    %1 = vector.load %arg2[%c0_1, %c0_2] : memref<288x64xbf16, #tpu.memory_space<vmem>>, vector<288x64xbf16>
    %cst = arith.constant dense<0.000000e+00> : vector<128x64xf32>
    %2 = tpu.matmul %0, %1, %cst {dimension_numbers = #tpu.dot_dimension_numbers<[1], [0], [0], [1], [0, 0, 1, 1], [], []>} : vector<128x288xbf16>, vector<288x64xbf16>, vector<128x64xf32> -> vector<128x64xf32>
    %c0_3 = arith.constant 0 : index
    %c0_4 = arith.constant 0 : index
    %3 = vector.load %arg3[%c0_3, %c0_4] : memref<1x64xf32, #tpu.memory_space<vmem>>, vector<1x64xf32>
    %4 = vector.broadcast %3 : vector<1x64xf32> to vector<128x64xf32>
    %5 = arith.addf %2, %4 : vector<128x64xf32>
    %cst_5 = arith.constant 0.000000e+00 : f32
    %6 = vector.broadcast %cst_5 : f32 to vector<128x64xf32>
    %7 = arith.maximumf %5, %6 : vector<128x64xf32>
    %8 = arith.truncf %7 : vector<128x64xf32> to vector<128x64xbf16>
    %c0_6 = arith.constant 0 : index
    %c0_7 = arith.constant 0 : index
    %9 = vector.load %arg4[%c0_6, %c0_7] : memref<128x64xbf16, #tpu.memory_space<vmem>>, vector<128x64xbf16>
    tpu.vector_store %arg4[%c0_6, %c0_7], %8 {strides = array<i32>} : memref<128x64xbf16, #tpu.memory_space<vmem>>, vector<128x64xbf16>,
    return
  }
  func.func @transform_0(%arg0: i32) -> (i32, i32) {
    %c0_i32 = arith.constant 0 : i32
    %c0_i32_0 = arith.constant 0 : i32
    return %arg0, %c0_i32 : i32, i32
  }
  func.func @transform_1(%arg0: i32) -> (i32, i32) {
    %c0_i32 = arith.constant 0 : i32
    %c0_i32_0 = arith.constant 0 : i32
    %c0_i32_1 = arith.constant 0 : i32
    return %c0_i32, %c0_i32_0 : i32, i32
  }
  func.func @transform_2(%arg0: i32) -> (i32, i32) {
    %c0_i32 = arith.constant 0 : i32
    %c0_i32_0 = arith.constant 0 : i32
    %c0_i32_1 = arith.constant 0 : i32
    return %c0_i32, %c0_i32_0 : i32, i32
  }
  func.func @transform_3(%arg0: i32) -> (i32, i32) {
    %c0_i32 = arith.constant 0 : i32
    %c0_i32_0 = arith.constant 0 : i32
    return %arg0, %c0_i32 : i32, i32
  }
}

module attributes {stable_mosaic.version = 11 : i64} {
  func.func @_mm_bias_relu_kernel(%arg0: i32, %arg1: memref<32x576xbf16, #tpu.memory_space<vmem>>, %arg2: memref<576x128xbf16, #tpu.memory_space<vmem>>, %arg3: memref<1x128xf32, #tpu.memory_space<vmem>>, %arg4: memref<32x128xbf16, #tpu.memory_space<vmem>>) attributes {dimension_semantics = [#tpu.dimension_semantics<parallel>], iteration_bounds = array<i64: 1>, scalar_prefetch = 0 : i64, scratch_operands = 0 : i64, tpu.core_type = #tpu.core_type<tc>, window_params = [{transform_indices = @transform_0, window_bounds = array<i64: 32, 576>}, {pipeline_mode = #tpu.pipeline_mode<synchronous>, transform_indices = @transform_1, window_bounds = array<i64: 576, 128>}, {pipeline_mode = #tpu.pipeline_mode<synchronous>, transform_indices = @transform_2, window_bounds = array<i64: 1, 128>}, {transform_indices = @transform_3, window_bounds = array<i64: 32, 128>}]} {
    %c0 = arith.constant 0 : index
    %c0_0 = arith.constant 0 : index
    %0 = vector.load %arg1[%c0, %c0_0] : memref<32x576xbf16, #tpu.memory_space<vmem>>, vector<32x576xbf16>
    %c0_1 = arith.constant 0 : index
    %c0_2 = arith.constant 0 : index
    %1 = vector.load %arg2[%c0_1, %c0_2] : memref<576x128xbf16, #tpu.memory_space<vmem>>, vector<576x128xbf16>
    %cst = arith.constant dense<0.000000e+00> : vector<32x128xf32>
    %2 = tpu.matmul %0, %1, %cst {dimension_numbers = #tpu.dot_dimension_numbers<[1], [0], [0], [1], [0, 0, 1, 1], [], []>} : vector<32x576xbf16>, vector<576x128xbf16>, vector<32x128xf32> -> vector<32x128xf32>
    %c0_3 = arith.constant 0 : index
    %c0_4 = arith.constant 0 : index
    %3 = vector.load %arg3[%c0_3, %c0_4] : memref<1x128xf32, #tpu.memory_space<vmem>>, vector<1x128xf32>
    %4 = vector.broadcast %3 : vector<1x128xf32> to vector<32x128xf32>
    %5 = arith.addf %2, %4 : vector<32x128xf32>
    %cst_5 = arith.constant 0.000000e+00 : f32
    %6 = vector.broadcast %cst_5 : f32 to vector<32x128xf32>
    %7 = arith.maximumf %5, %6 : vector<32x128xf32>
    %8 = arith.truncf %7 : vector<32x128xf32> to vector<32x128xbf16>
    %c0_6 = arith.constant 0 : index
    %c0_7 = arith.constant 0 : index
    %9 = vector.load %arg4[%c0_6, %c0_7] : memref<32x128xbf16, #tpu.memory_space<vmem>>, vector<32x128xbf16>
    tpu.vector_store %arg4[%c0_6, %c0_7], %8 {strides = array<i32>} : memref<32x128xbf16, #tpu.memory_space<vmem>>, vector<32x128xbf16>,
    return
  }
  func.func @transform_0(%arg0: i32) -> (i32, i32) {
    %c0_i32 = arith.constant 0 : i32
    %c0_i32_0 = arith.constant 0 : i32
    return %arg0, %c0_i32 : i32, i32
  }
  func.func @transform_1(%arg0: i32) -> (i32, i32) {
    %c0_i32 = arith.constant 0 : i32
    %c0_i32_0 = arith.constant 0 : i32
    %c0_i32_1 = arith.constant 0 : i32
    return %c0_i32, %c0_i32_0 : i32, i32
  }
  func.func @transform_2(%arg0: i32) -> (i32, i32) {
    %c0_i32 = arith.constant 0 : i32
    %c0_i32_0 = arith.constant 0 : i32
    %c0_i32_1 = arith.constant 0 : i32
    return %c0_i32, %c0_i32_0 : i32, i32
  }
  func.func @transform_3(%arg0: i32) -> (i32, i32) {
    %c0_i32 = arith.constant 0 : i32
    %c0_i32_0 = arith.constant 0 : i32
    return %arg0, %c0_i32 : i32, i32
  }
}

module attributes {stable_mosaic.version = 11 : i64} {
  func.func @_head_kernel(%arg0: i32, %arg1: memref<2x2048xbf16, #tpu.memory_space<vmem>>, %arg2: memref<2048x512xbf16, #tpu.memory_space<vmem>>, %arg3: memref<1x512xf32, #tpu.memory_space<vmem>>, %arg4: memref<512x256xbf16, #tpu.memory_space<vmem>>, %arg5: memref<1x256xf32, #tpu.memory_space<vmem>>, %arg6: memref<256x128xbf16, #tpu.memory_space<vmem>>, %arg7: memref<1x128xf32, #tpu.memory_space<vmem>>, %arg8: memref<2x128xf32, #tpu.memory_space<vmem>>) attributes {dimension_semantics = [#tpu.dimension_semantics<arbitrary>], iteration_bounds = array<i64: 1>, scalar_prefetch = 0 : i64, scratch_operands = 0 : i64, tpu.core_type = #tpu.core_type<tc>, window_params = [{pipeline_mode = #tpu.pipeline_mode<synchronous>, transform_indices = @transform_0, window_bounds = array<i64: 2, 2048>}, {pipeline_mode = #tpu.pipeline_mode<synchronous>, transform_indices = @transform_1, window_bounds = array<i64: 2048, 512>}, {pipeline_mode = #tpu.pipeline_mode<synchronous>, transform_indices = @transform_2, window_bounds = array<i64: 1, 512>}, {pipeline_mode = #tpu.pipeline_mode<synchronous>, transform_indices = @transform_3, window_bounds = array<i64: 512, 256>}, {pipeline_mode = #tpu.pipeline_mode<synchronous>, transform_indices = @transform_4, window_bounds = array<i64: 1, 256>}, {pipeline_mode = #tpu.pipeline_mode<synchronous>, transform_indices = @transform_5, window_bounds = array<i64: 256, 128>}, {pipeline_mode = #tpu.pipeline_mode<synchronous>, transform_indices = @transform_6, window_bounds = array<i64: 1, 128>}, {pipeline_mode = #tpu.pipeline_mode<synchronous>, transform_indices = @transform_7, window_bounds = array<i64: 2, 128>}]} {
    %c0 = arith.constant 0 : index
    %c0_0 = arith.constant 0 : index
    %0 = vector.load %arg1[%c0, %c0_0] : memref<2x2048xbf16, #tpu.memory_space<vmem>>, vector<2x2048xbf16>
    %c0_1 = arith.constant 0 : index
    %c0_2 = arith.constant 0 : index
    %1 = vector.load %arg2[%c0_1, %c0_2] : memref<2048x512xbf16, #tpu.memory_space<vmem>>, vector<2048x512xbf16>
    %cst = arith.constant dense<0.000000e+00> : vector<2x512xf32>
    %2 = tpu.matmul %0, %1, %cst {dimension_numbers = #tpu.dot_dimension_numbers<[1], [0], [0], [1], [0, 0, 1, 1], [], []>} : vector<2x2048xbf16>, vector<2048x512xbf16>, vector<2x512xf32> -> vector<2x512xf32>
    %c0_3 = arith.constant 0 : index
    %c0_4 = arith.constant 0 : index
    %3 = vector.load %arg3[%c0_3, %c0_4] : memref<1x512xf32, #tpu.memory_space<vmem>>, vector<1x512xf32>
    %4 = vector.broadcast %3 : vector<1x512xf32> to vector<2x512xf32>
    %5 = arith.addf %2, %4 : vector<2x512xf32>
    %6 = arith.truncf %5 : vector<2x512xf32> to vector<2x512xbf16>
    %c0_5 = arith.constant 0 : index
    %c0_6 = arith.constant 0 : index
    %7 = vector.load %arg4[%c0_5, %c0_6] : memref<512x256xbf16, #tpu.memory_space<vmem>>, vector<512x256xbf16>
    %cst_7 = arith.constant dense<0.000000e+00> : vector<2x256xf32>
    %8 = tpu.matmul %6, %7, %cst_7 {dimension_numbers = #tpu.dot_dimension_numbers<[1], [0], [0], [1], [0, 0, 1, 1], [], []>} : vector<2x512xbf16>, vector<512x256xbf16>, vector<2x256xf32> -> vector<2x256xf32>
    %c0_8 = arith.constant 0 : index
    %c0_9 = arith.constant 0 : index
    %9 = vector.load %arg5[%c0_8, %c0_9] : memref<1x256xf32, #tpu.memory_space<vmem>>, vector<1x256xf32>
    %10 = vector.broadcast %9 : vector<1x256xf32> to vector<2x256xf32>
    %11 = arith.addf %8, %10 : vector<2x256xf32>
    %cst_10 = arith.constant 0.000000e+00 : f32
    %12 = vector.broadcast %cst_10 : f32 to vector<2x256xf32>
    %13 = arith.maximumf %11, %12 : vector<2x256xf32>
    %14 = arith.truncf %13 : vector<2x256xf32> to vector<2x256xbf16>
    %c0_11 = arith.constant 0 : index
    %c0_12 = arith.constant 0 : index
    %15 = vector.load %arg6[%c0_11, %c0_12] : memref<256x128xbf16, #tpu.memory_space<vmem>>, vector<256x128xbf16>
    %cst_13 = arith.constant dense<0.000000e+00> : vector<2x128xf32>
    %16 = tpu.matmul %14, %15, %cst_13 {dimension_numbers = #tpu.dot_dimension_numbers<[1], [0], [0], [1], [0, 0, 1, 1], [], []>} : vector<2x256xbf16>, vector<256x128xbf16>, vector<2x128xf32> -> vector<2x128xf32>
    %c0_14 = arith.constant 0 : index
    %c0_15 = arith.constant 0 : index
    %17 = vector.load %arg7[%c0_14, %c0_15] : memref<1x128xf32, #tpu.memory_space<vmem>>, vector<1x128xf32>
    %18 = vector.broadcast %17 : vector<1x128xf32> to vector<2x128xf32>
    %19 = arith.addf %16, %18 : vector<2x128xf32>
    %c0_16 = arith.constant 0 : index
    %c0_17 = arith.constant 0 : index
    %20 = vector.load %arg8[%c0_16, %c0_17] : memref<2x128xf32, #tpu.memory_space<vmem>>, vector<2x128xf32>
    tpu.vector_store %arg8[%c0_16, %c0_17], %19 {strides = array<i32>} : memref<2x128xf32, #tpu.memory_space<vmem>>, vector<2x128xf32>,
    return
  }
  func.func @transform_0(%arg0: i32) -> (i32, i32) {
    %c0_i32 = arith.constant 0 : i32
    %c0_i32_0 = arith.constant 0 : i32
    %c0_i32_1 = arith.constant 0 : i32
    return %c0_i32, %c0_i32_0 : i32, i32
  }
  func.func @transform_1(%arg0: i32) -> (i32, i32) {
    %c0_i32 = arith.constant 0 : i32
    %c0_i32_0 = arith.constant 0 : i32
    %c0_i32_1 = arith.constant 0 : i32
    return %c0_i32, %c0_i32_0 : i32, i32
  }
  func.func @transform_2(%arg0: i32) -> (i32, i32) {
    %c0_i32 = arith.constant 0 : i32
    %c0_i32_0 = arith.constant 0 : i32
    %c0_i32_1 = arith.constant 0 : i32
    return %c0_i32, %c0_i32_0 : i32, i32
  }
  func.func @transform_3(%arg0: i32) -> (i32, i32) {
    %c0_i32 = arith.constant 0 : i32
    %c0_i32_0 = arith.constant 0 : i32
    %c0_i32_1 = arith.constant 0 : i32
    return %c0_i32, %c0_i32_0 : i32, i32
  }
  func.func @transform_4(%arg0: i32) -> (i32, i32) {
    %c0_i32 = arith.constant 0 : i32
    %c0_i32_0 = arith.constant 0 : i32
    %c0_i32_1 = arith.constant 0 : i32
    return %c0_i32, %c0_i32_0 : i32, i32
  }
  func.func @transform_5(%arg0: i32) -> (i32, i32) {
    %c0_i32 = arith.constant 0 : i32
    %c0_i32_0 = arith.constant 0 : i32
    %c0_i32_1 = arith.constant 0 : i32
    return %c0_i32, %c0_i32_0 : i32, i32
  }
  func.func @transform_6(%arg0: i32) -> (i32, i32) {
    %c0_i32 = arith.constant 0 : i32
    %c0_i32_0 = arith.constant 0 : i32
    %c0_i32_1 = arith.constant 0 : i32
    return %c0_i32, %c0_i32_0 : i32, i32
  }
  func.func @transform_7(%arg0: i32) -> (i32, i32) {
    %c0_i32 = arith.constant 0 : i32
    %c0_i32_0 = arith.constant 0 : i32
    %c0_i32_1 = arith.constant 0 : i32
    return %c0_i32, %c0_i32_0 : i32, i32
  }
}

</mosaic_0001>

<bundles_post_ra>
// kernel: autoencoder_forward.4
= control target key start
LH: loop header
LB: loop body
LE: loop exit
PB: predicated region body
PF: predicated region fallthrough
CT: control target
= control target key end

     0   :  { %8 = vsyncpa [#allocation3], 0  ;;  %s1338_s0 = inlined_call_operand.vmem [shape: bf16[512,32], index: 0, kind: input, shape index: {}]   ;;  %s1339_s1 = inlined_call_operand.hbm [shape: bf16[32,32], index: 1, kind: input, shape index: {}]   ;;  %s1340_s2 = inlined_call_operand.hbm [shape: f32[1,32], index: 2, kind: input, shape index: {}]   ;;  %s1341_s3 = inlined_call_operand.vmem [shape: bf16[512,32], index: 3, kind: output, shape index: {}]  }
   0x1   :  { %9 = vsyncpa [#allocation5], 0  ;;  %s1132_s12 = smov 0  }
   0x2 LB: > { %s819_s13 = sadd.s32 4294967295, %s1106_s12   ;;  %p821_p0 = scmp.ge.s32.totalorder %s1106_s12, 1  ;;  %s1106_s12 = sphi %s1132_s12, %s15_s12  }
   0x3   : > { %p114_p1 = scmp.lt.s32.totalorder %s1106_s12, 3  ;;  %s1108_s14 = smov [#allocation2]  }
   0x4   : > { %s126_s15 = sshll.u32 %s1108_s14, 4  ;;  %p1146_p3 = scmp.eq.s32.totalorder %s819_s13, 0  ;;  %s127_s15 = int_to_ptr.vmem [resolvable:$true] %s126_s15 }
   0x5   : > { %p1140_p2 = pnand %p821_p0, %p114_p1  ;;  %s1109_s18 = smov [#allocation4]  }
   0x6   : > { %s140_s19 = sshll.u32 %s1109_s18, 4  ;;  %s1051_s21 = scalar_lea.vmem %s127_s15, 256  ;;  %s141_s19 = int_to_ptr.vmem [resolvable:$true] %s140_s19 }
   0x7   : > { %p999_p4 = pneg %p1140_p2  ;;  %p1052_p7 = scmp.ne.s32.totalorder %s127_s15, %s1051_s21 }
   0x8   : > { %p1059_p10 = scmp.lt.s32.totalorder %s127_s15, %s127_s15  ;;  %p1060_p11 = scmp.lt.s32.totalorder %s1051_s21, %s1051_s21 }
   0x9   : > { %p1154_p5 = pnand %p1146_p3, %p999_p4 }
   0xa   : > { %p1061_p12 = por %p1060_p11, %p1059_p10 }
   0xb   : > { %p1042_p6 = pneg %p1154_p5 }
   0xd   : > { %p1054_p8 = pnand %p1052_p7, %p1042_p6 }
   0xf   : > { %p1055_p9 = pneg %p1054_p8 }
  0x11   : > { %p1062_p13 = pnand %p1061_p12, %p1055_p9 }
  0x13   : > { %1065 = shalt.err (!%p1062_p13)
}
  0x14   : > { %s1110_s22 = smov 64   ;;  %s1111_s23 = smov 4  }
  0x15   : > { %1002 = dma.hbm_to_vmem [thread:$0]  (!%p1154_p5), %s1339_s1, 256, %s127_s15, [#allocation3], %s1110_s22, %s1110_s22, %s1111_s23  }
  0x16   : > { %s1077_s26 = scalar_lea.vmem %s141_s19, 16  ;;  %s1084_s27 = scalar_lea.vmem %s141_s19, 32 }
  0x17   : > { %p1078_p0 = scmp.ne.s32.totalorder %s141_s19, %s1077_s26  ;;  %p1085_p7 = scmp.lt.s32.totalorder %s141_s19, %s141_s19 }
  0x18   : > { %p1086_p8 = scmp.lt.s32.totalorder %s1084_s27, %s1077_s26 }
  0x19   : > { %p1080_p1 = pnand %p1078_p0, %p1042_p6 }
  0x1a   : > { %p1087_p9 = por %p1086_p8, %p1085_p7 }
  0x1b   : > { %p1081_p4 = pneg %p1080_p1 }
  0x1d   : > { %p1088_p10 = pnand %p1087_p9, %p1081_p4 }
  0x1f   : > { %1091 = shalt.err (!%p1088_p10)
}
  0x20   : > { %1005 = dma.hbm_to_vmem [thread:$0]  (!%p1154_p5), %s1340_s2, 16, %s141_s19, [#allocation5]  }
  0x21   : > { %162 = sbr.rel (%p1140_p2) target bundleno = 281 (0x119), region = 32 }
  0x26   : > { %1097 = dma.done.wait (%p1146_p3), [#allocation3], 256  }
  0x27   : > { %1099 = vsyncadd (%p1146_p3), [#allocation3], 4294967040 }
  0x28   : > { %1101 = dma.done.wait (%p1146_p3), [#allocation5], 16  }
  0x29   : > { %1103 = vsyncadd (%p1146_p3), [#allocation5], 4294967280  ;;  %s828_s30 = sshll.u32 %s819_s13, 5  ;;  %v1022_v0 = vld [vmem:[#allocation2 + $0x8] sm:$0xff]   ;;  %v1023_v1 = vld [vmem:[#allocation2] sm:$0xff]   ;;  %vm338_vm0 = vcmask 261120  }
  0x2a   : > { %p191_p6 = scmp.lt.s32.totalorder %s828_s30, 63  ;;  %951 = vmatprep.subr.bf16.mxu0 %v1022_v0  ;;  %987 = vmatprep.subr.bf16.mxu1 %v1022_v0  ;;  %v1230_v18 = vld [vmem:[#allocation4] ss:$0 sm:$0xff]  ;;  %vm708_vm1 = vcmask 257024  }
  0x2b   : > { %952 = vmatpush3.bf16.msra.mxu0 %v1022_v0  ;;  %989 = vmatpush3.bf16.msra.mxu1 %v1022_v0 }
  0x2c   : > { %s1346_s30 = smov (!%p191_p6, %s828_s30), 63  ;;  %953 = vmatprep.subr.bf16.mxu0 %v1023_v1  ;;  %988 = vmatprep.subr.bf16.mxu1 %v1023_v1 }
  0x2d   : > { %s829_s4 = sshll.u32 %s1346_s30, 2 }
  0x2e   : > { %s1196_s7 = scalar_lea.vmem %s1338_s0, %s829_s4  ;;  %s1241_s10 = scalar_lea.vmem %s1341_s3, %s829_s4 }
  0x2f   : > { %v1024_v2 = vld [vmem:[%s1196_s7] sm:$0xff]   ;;  %v1026_v4 = vld [vmem:[%s1196_s7 + $0x8] sm:$0xff]   ;;  %v1028_v6 = vld [vmem:[%s1196_s7 + $0x10] sm:$0xff]   ;;  %954 = vmatpush3.bf16.msra.mxu0 %v1023_v1  ;;  %990 = vmatpush3.bf16.msra.mxu1 %v1023_v1 }
  0x30   : > { %v1025_v3 = vld [vmem:[%s1196_s7 + $0x40] sm:$0xff]   ;;  %955 = vmatprep.mubr.msk.bf16.mxu0 %vm338_vm0, %v1024_v2  ;;  %v1027_v5 = vld [vmem:[%s1196_s7 + $0x48] sm:$0xff]   ;;  %v1029_v7 = vld [vmem:[%s1196_s7 + $0x50] sm:$0xff]  }
  0x31   : > { %971 = vmatprep.mubr.msk.bf16.mxu1 %vm338_vm0, %v1025_v3  ;;  %v1030_v8 = vld [vmem:[%s1196_s7 + $0x18] sm:$0xff]   ;;  %v1032_v10 = vld [vmem:[%s1196_s7 + $0x20] sm:$0xff]   ;;  %v1034_v12 = vld [vmem:[%s1196_s7 + $0x28] sm:$0xff]  }
  0x32   : > { %956 = vmatmul.mubr.msk.bf16.vlgmr.msra.gmra.mxu0 %vm338_vm0, %v1026_v4  ;;  %972 = vmatmul.mubr.msk.bf16.vlgmr.msra.gmra.mxu1 %vm338_vm0, %v1027_v5  ;;  %v1031_v9 = vld [vmem:[%s1196_s7 + $0x58] sm:$0xff]   ;;  %v1033_v11 = vld [vmem:[%s1196_s7 + $0x60] sm:$0xff]   ;;  %v1035_v13 = vld [vmem:[%s1196_s7 + $0x68] sm:$0xff]  }
  0x33   : > { %959 = vmatprep.mubr.msk.bf16.mxu0 %vm338_vm0, %v1028_v6  ;;  %975 = vmatprep.mubr.msk.bf16.mxu1 %vm338_vm0, %v1029_v7  ;;  %v1036_v14 = vld [vmem:[%s1196_s7 + $0x30] sm:$0xff]   ;;  %v1038_v16 = vld [vmem:[%s1196_s7 + $0x38] sm:$0xff]  }
  0x34   : > { %v1037_v15 = vld [vmem:[%s1196_s7 + $0x70] sm:$0xff]   ;;  %v1039_v17 = vld [vmem:[%s1196_s7 + $0x78] sm:$0xff]  }
  0x3a   : > { %960 = vmatmul.mubr.msk.bf16.gmra.mxu0 %vm338_vm0, %v1030_v8  ;;  %976 = vmatmul.mubr.msk.bf16.gmra.mxu1 %vm338_vm0, %v1031_v9 }
  0x3b   : > { %963 = vmatprep.mubr.msk.bf16.mxu0 %vm338_vm0, %v1032_v10  ;;  %979 = vmatprep.mubr.msk.bf16.mxu1 %vm338_vm0, %v1033_v11 }
  0x42   : > { %964 = vmatmul.mubr.msk.bf16.gmra.mxu0 %vm338_vm0, %v1034_v12  ;;  %980 = vmatmul.mubr.msk.bf16.gmra.mxu1 %vm338_vm0, %v1035_v13 }
  0x43   : > { %967 = vmatprep.mubr.msk.bf16.mxu0 %vm338_vm0, %v1036_v14  ;;  %983 = vmatprep.mubr.msk.bf16.mxu1 %vm338_vm0, %v1037_v15 }
  0x4a   : > { %968 = vmatmul.mubr.msk.bf16.gmra.mxu0 %vm338_vm0, %v1038_v16  ;;  %984 = vmatmul.mubr.msk.bf16.gmra.mxu1 %vm338_vm0, %v1039_v17 }
  0xf2   : > { %v957_v19 = vpop.f32.mrf.mxu0  ;;  %v973_v20 = vpop.f32.mrf.mxu1 }
  0xf3   : > { %v430_v21 = vadd.f32 %v957_v19, %v1230_v18  ;;  %v494_v22 = vadd.f32 %v973_v20, %v1230_v18 }
  0xf4   : > { %v421_v23 = vpop.f32.mrf.mxu0  ;;  %v485_v24 = vpop.f32.mrf.mxu1 }
  0xf5   : > { %v550_v25 = vmax.f32 %v430_v21, 0.0  ;;  %v566_v26 = vmax.f32 %v494_v22, 0.0  ;;  %v422_v27 = vadd.f32 %v1230_v18, %v421_v23  ;;  %v486_v28 = vadd.f32 %v1230_v18, %v485_v24 }
  0xf6   : > { %v958_v29 = vpop.f32.mrf.mxu0  ;;  %v974_v30 = vpop.f32.mrf.mxu1 }
  0xf7   : > { %v903_v31 = vpack.c.bf16 %v550_v25, %v550_v25  ;;  %v919_v32 = vpack.c.bf16 %v566_v26, %v566_v26  ;;  %v548_v33 = vmax.f32 %v422_v27, 0.0  ;;  %v564_v34 = vmax.f32 %v486_v28, 0.0 }
  0xf8   : > { %v433_v35 = vadd.f32 %v958_v29, %v1230_v18  ;;  %v497_v36 = vadd.f32 %v974_v30, %v1230_v18  ;;  %v424_v37 = vpop.f32.mrf.mxu0  ;;  %v488_v38 = vpop.f32.mrf.mxu1 }
  0xf9   : > { %711 = vst.msk [vmem:[%s1241_s10 + $0x8] sm:$0xf] %vm708_vm1, %v903_v31  ;;  %727 = vst.msk [vmem:[%s1241_s10 + $0x48] sm:$0xf] %vm708_vm1, %v919_v32  ;;  %v901_v39 = vpack.c.bf16 %v548_v33, %v548_v33  ;;  %v917_v40 = vpack.c.bf16 %v564_v34, %v564_v34  ;;  %v425_v41 = vadd.f32 %v1230_v18, %v424_v37 }
  0xfa   : > { %v489_v42 = vadd.f32 %v1230_v18, %v488_v38  ;;  %v551_v43 = vmax.f32 %v433_v35, 0.0  ;;  %v567_v44 = vmax.f32 %v497_v36, 0.0  ;;  %v961_v45 = vpop.f32.mrf.mxu0  ;;  %v977_v46 = vpop.f32.mrf.mxu1 }
  0xfb   : > { %709 = vst.msk [vmem:[%s1241_s10] sm:$0xf] %vm708_vm1, %v901_v39  ;;  %725 = vst.msk [vmem:[%s1241_s10 + $0x40] sm:$0xf] %vm708_vm1, %v917_v40  ;;  %v549_v47 = vmax.f32 %v425_v41, 0.0  ;;  %v446_v49 = vadd.f32 %v961_v45, %v1230_v18  ;;  %v510_v50 = vadd.f32 %v977_v46, %v1230_v18 }
  0xfc   : > { %v565_v48 = vmax.f32 %v489_v42, 0.0  ;;  %v904_v51 = vpack.c.bf16 %v551_v43, %v551_v43  ;;  %v920_v52 = vpack.c.bf16 %v567_v44, %v567_v44  ;;  %v437_v53 = vpop.f32.mrf.mxu0  ;;  %v501_v54 = vpop.f32.mrf.mxu1 }
  0xfd   : > { %v902_v55 = vpack.c.bf16 %v549_v47, %v549_v47  ;;  %v554_v57 = vmax.f32 %v446_v49, 0.0  ;;  %v570_v58 = vmax.f32 %v510_v50, 0.0  ;;  %v438_v59 = vadd.f32 %v1230_v18, %v437_v53 }
  0xfe   : > { %v918_v56 = vpack.c.bf16 %v565_v48, %v565_v48  ;;  %712 = vst.msk [vmem:[%s1241_s10 + $0xc] sm:$0xf] %vm708_vm1, %v904_v51  ;;  %728 = vst.msk [vmem:[%s1241_s10 + $0x4c] sm:$0xf] %vm708_vm1, %v920_v52  ;;  %v502_v60 = vadd.f32 %v1230_v18, %v501_v54  ;;  %v962_v61 = vpop.f32.mrf.mxu0  ;;  %v978_v62 = vpop.f32.mrf.mxu1 }
  0xff   : > { %710 = vst.msk [vmem:[%s1241_s10 + $0x4] sm:$0xf] %vm708_vm1, %v902_v55  ;;  %v907_v63 = vpack.c.bf16 %v554_v57, %v554_v57  ;;  %v923_v0 = vpack.c.bf16 %v570_v58, %v570_v58  ;;  %v449_v1 = vadd.f32 %v962_v61, %v1230_v18  ;;  %v513_v2 = vadd.f32 %v978_v62, %v1230_v18 }
 0x100   : > { %726 = vst.msk [vmem:[%s1241_s10 + $0x44] sm:$0xf] %vm708_vm1, %v918_v56  ;;  %v552_v3 = vmax.f32 %v438_v59, 0.0  ;;  %v568_v4 = vmax.f32 %v502_v60, 0.0  ;;  %v440_v5 = vpop.f32.mrf.mxu0  ;;  %v504_v6 = vpop.f32.mrf.mxu1 }
 0x101   : > { %715 = vst.msk [vmem:[%s1241_s10 + $0x18] sm:$0xf] %vm708_vm1, %v907_v63  ;;  %731 = vst.msk [vmem:[%s1241_s10 + $0x58] sm:$0xf] %vm708_vm1, %v923_v0  ;;  %v555_v7 = vmax.f32 %v449_v1, 0.0  ;;  %v571_v8 = vmax.f32 %v513_v2, 0.0  ;;  %v441_v9 = vadd.f32 %v1230_v18, %v440_v5  ;;  %v505_v10 = vadd.f32 %v1230_v18, %v504_v6 }
 0x102   : > { %v905_v11 = vpack.c.bf16 %v552_v3, %v552_v3  ;;  %v921_v12 = vpack.c.bf16 %v568_v4, %v568_v4  ;;  %v965_v13 = vpop.f32.mrf.mxu0  ;;  %v981_v14 = vpop.f32.mrf.mxu1 }
 0x103   : > { %v908_v15 = vpack.c.bf16 %v555_v7, %v555_v7  ;;  %v924_v16 = vpack.c.bf16 %v571_v8, %v571_v8  ;;  %v553_v17 = vmax.f32 %v441_v9, 0.0  ;;  %v569_v19 = vmax.f32 %v505_v10, 0.0 }
 0x104   : > { %713 = vst.msk [vmem:[%s1241_s10 + $0x10] sm:$0xf] %vm708_vm1, %v905_v11  ;;  %729 = vst.msk [vmem:[%s1241_s10 + $0x50] sm:$0xf] %vm708_vm1, %v921_v12  ;;  %v462_v20 = vadd.f32 %v965_v13, %v1230_v18  ;;  %v526_v21 = vadd.f32 %v981_v14, %v1230_v18  ;;  %v453_v22 = vpop.f32.mrf.mxu0  ;;  %v517_v23 = vpop.f32.mrf.mxu1 }
 0x105   : > { %716 = vst.msk [vmem:[%s1241_s10 + $0x1c] sm:$0xf] %vm708_vm1, %v908_v15  ;;  %732 = vst.msk [vmem:[%s1241_s10 + $0x5c] sm:$0xf] %vm708_vm1, %v924_v16  ;;  %v906_v24 = vpack.c.bf16 %v553_v17, %v553_v17  ;;  %v922_v25 = vpack.c.bf16 %v569_v19, %v569_v19  ;;  %v454_v26 = vadd.f32 %v1230_v18, %v453_v22 }
 0x106   : > { %v518_v27 = vadd.f32 %v1230_v18, %v517_v23  ;;  %v558_v28 = vmax.f32 %v462_v20, 0.0  ;;  %v574_v29 = vmax.f32 %v526_v21, 0.0  ;;  %v966_v30 = vpop.f32.mrf.mxu0  ;;  %v982_v31 = vpop.f32.mrf.mxu1 }
 0x107   : > { %714 = vst.msk [vmem:[%s1241_s10 + $0x14] sm:$0xf] %vm708_vm1, %v906_v24  ;;  %730 = vst.msk [vmem:[%s1241_s10 + $0x54] sm:$0xf] %vm708_vm1, %v922_v25  ;;  %v556_v32 = vmax.f32 %v454_v26, 0.0  ;;  %v465_v34 = vadd.f32 %v966_v30, %v1230_v18  ;;  %v529_v35 = vadd.f32 %v982_v31, %v1230_v18 }
 0x108   : > { %v572_v33 = vmax.f32 %v518_v27, 0.0  ;;  %v911_v36 = vpack.c.bf16 %v558_v28, %v558_v28  ;;  %v927_v37 = vpack.c.bf16 %v574_v29, %v574_v29  ;;  %v456_v38 = vpop.f32.mrf.mxu0  ;;  %v520_v39 = vpop.f32.mrf.mxu1 }
 0x109   : > { %v909_v40 = vpack.c.bf16 %v556_v32, %v556_v32  ;;  %v559_v42 = vmax.f32 %v465_v34, 0.0  ;;  %v575_v43 = vmax.f32 %v529_v35, 0.0  ;;  %v457_v44 = vadd.f32 %v1230_v18, %v456_v38 }
 0x10a   : > { %v925_v41 = vpack.c.bf16 %v572_v33, %v572_v33  ;;  %719 = vst.msk [vmem:[%s1241_s10 + $0x28] sm:$0xf] %vm708_vm1, %v911_v36  ;;  %735 = vst.msk [vmem:[%s1241_s10 + $0x68] sm:$0xf] %vm708_vm1, %v927_v37  ;;  %v521_v45 = vadd.f32 %v1230_v18, %v520_v39  ;;  %v969_v46 = vpop.f32.mrf.mxu0  ;;  %v985_v47 = vpop.f32.mrf.mxu1 }
 0x10b   : > { %717 = vst.msk [vmem:[%s1241_s10 + $0x20] sm:$0xf] %vm708_vm1, %v909_v40  ;;  %v912_v48 = vpack.c.bf16 %v559_v42, %v559_v42  ;;  %v928_v49 = vpack.c.bf16 %v575_v43, %v575_v43  ;;  %v478_v50 = vadd.f32 %v969_v46, %v1230_v18  ;;  %v542_v51 = vadd.f32 %v985_v47, %v1230_v18 }
 0x10c   : > { %733 = vst.msk [vmem:[%s1241_s10 + $0x60] sm:$0xf] %vm708_vm1, %v925_v41  ;;  %v557_v52 = vmax.f32 %v457_v44, 0.0  ;;  %v573_v53 = vmax.f32 %v521_v45, 0.0  ;;  %v469_v54 = vpop.f32.mrf.mxu0  ;;  %v533_v55 = vpop.f32.mrf.mxu1 }
 0x10d   : > { %720 = vst.msk [vmem:[%s1241_s10 + $0x2c] sm:$0xf] %vm708_vm1, %v912_v48  ;;  %736 = vst.msk [vmem:[%s1241_s10 + $0x6c] sm:$0xf] %vm708_vm1, %v928_v49  ;;  %v562_v56 = vmax.f32 %v478_v50, 0.0  ;;  %v578_v57 = vmax.f32 %v542_v51, 0.0  ;;  %v470_v58 = vadd.f32 %v1230_v18, %v469_v54  ;;  %v534_v59 = vadd.f32 %v1230_v18, %v533_v55 }
 0x10e   : > { %v910_v60 = vpack.c.bf16 %v557_v52, %v557_v52  ;;  %v926_v61 = vpack.c.bf16 %v573_v53, %v573_v53  ;;  %v970_v62 = vpop.f32.mrf.mxu0  ;;  %v986_v63 = vpop.f32.mrf.mxu1 }
 0x10f   : > { %v915_v0 = vpack.c.bf16 %v562_v56, %v562_v56  ;;  %v931_v1 = vpack.c.bf16 %v578_v57, %v578_v57  ;;  %v560_v2 = vmax.f32 %v470_v58, 0.0  ;;  %v576_v3 = vmax.f32 %v534_v59, 0.0 }
 0x110   : > { %718 = vst.msk [vmem:[%s1241_s10 + $0x24] sm:$0xf] %vm708_vm1, %v910_v60  ;;  %734 = vst.msk [vmem:[%s1241_s10 + $0x64] sm:$0xf] %vm708_vm1, %v926_v61  ;;  %v481_v4 = vadd.f32 %v970_v62, %v1230_v18  ;;  %v545_v5 = vadd.f32 %v986_v63, %v1230_v18  ;;  %v472_v6 = vpop.f32.mrf.mxu0  ;;  %v536_v7 = vpop.f32.mrf.mxu1 }
 0x111   : > { %723 = vst.msk [vmem:[%s1241_s10 + $0x38] sm:$0xf] %vm708_vm1, %v915_v0  ;;  %739 = vst.msk [vmem:[%s1241_s10 + $0x78] sm:$0xf] %vm708_vm1, %v931_v1  ;;  %v913_v8 = vpack.c.bf16 %v560_v2, %v560_v2  ;;  %v929_v9 = vpack.c.bf16 %v576_v3, %v576_v3  ;;  %v473_v10 = vadd.f32 %v1230_v18, %v472_v6 }
 0x112   : > { %v537_v11 = vadd.f32 %v1230_v18, %v536_v7  ;;  %v563_v12 = vmax.f32 %v481_v4, 0.0  ;;  %v579_v13 = vmax.f32 %v545_v5, 0.0 }
 0x113   : > { %721 = vst.msk [vmem:[%s1241_s10 + $0x30] sm:$0xf] %vm708_vm1, %v913_v8  ;;  %737 = vst.msk [vmem:[%s1241_s10 + $0x70] sm:$0xf] %vm708_vm1, %v929_v9  ;;  %v561_v14 = vmax.f32 %v473_v10, 0.0 }
 0x114   : > { %v577_v15 = vmax.f32 %v537_v11, 0.0  ;;  %v916_v16 = vpack.c.bf16 %v563_v12, %v563_v12  ;;  %v932_v17 = vpack.c.bf16 %v579_v13, %v579_v13 }
 0x115   : > { %v914_v19 = vpack.c.bf16 %v561_v14, %v561_v14 }
 0x116   : > { %v930_v20 = vpack.c.bf16 %v577_v15, %v577_v15  ;;  %724 = vst.msk [vmem:[%s1241_s10 + $0x3c] sm:$0xf] %vm708_vm1, %v916_v16  ;;  %740 = vst.msk [vmem:[%s1241_s10 + $0x7c] sm:$0xf] %vm708_vm1, %v932_v17 }
 0x117   : > { %722 = vst.msk [vmem:[%s1241_s10 + $0x34] sm:$0xf] %vm708_vm1, %v914_v19 }
 0x118   : > { %738 = vst.msk [vmem:[%s1241_s10 + $0x74] sm:$0xf] %vm708_vm1, %v930_v20 }
 0x119 PF: > { %s15_s12 = sadd.s32 1, %s1106_s12  }
 0x11a   : > { %p12_p2 = scmp.ge.s32.totalorder %s15_s12, 4  }
 0x11c   :  { %14 = sbr.rel (!%p12_p2) target bundleno = 2 (0x2), region = 71 }
 0x121   :  { %763 = vsyncpa [#allocation3], 1 }
 0x122   :  { %765 = vsyncpa [#allocation3 + $0x1], 1 }
 0x123   :  { %766 = vsyncpa [#allocation5], 1 }

// kernel: autoencoder_forward.5
= control target key start
LH: loop header
LB: loop body
LE: loop exit
PB: predicated region body
PF: predicated region fallthrough
CT: control target
= control target key end

     0   :  { %vm318_vm0 = vcmask 261120   ;;  %vm617_vm1 = vcmask 519168   ;;  %s1144_s1 = inlined_call_operand.vmem [shape: bf16[288,64], index: 1, kind: input, shape index: {}]   ;;  %s1145_s0 = inlined_call_operand.vmem [shape: bf16[128,288], index: 0, kind: input, shape index: {}]   ;;  %s1146_s2 = inlined_call_operand.vmem [shape: f32[1,64], index: 2, kind: input, shape index: {}]   ;;  %s1147_s3 = inlined_call_operand.vmem [shape: bf16[128,64], index: 3, kind: output, shape index: {}]  }
   0x1   :  { %v831_v0 = vld [vmem:[%s1144_s1 + $0x78] sm:$0xff]   ;;  %v833_v2 = vld [vmem:[%s1144_s1 + $0x70] sm:$0xff]   ;;  %v835_v4 = vld [vmem:[%s1144_s1 + $0x68] sm:$0xff]  }
   0x2   :  { %v832_v1 = vld [vmem:[%s1144_s1 + $0x38] sm:$0xff]   ;;  %721 = vmatprep.subr.bf16.mxu0 %v831_v0  ;;  %815 = vmatprep.subr.bf16.mxu1 %v831_v0  ;;  %v834_v3 = vld [vmem:[%s1144_s1 + $0x30] sm:$0xff]   ;;  %v836_v5 = vld [vmem:[%s1144_s1 + $0x28] sm:$0xff]  }
   0x3   :  { %722 = vmatpush3.bf16.msra.mxu0 %v832_v1  ;;  %823 = vmatpush3.bf16.msra.mxu1 %v832_v1  ;;  %v837_v6 = vld [vmem:[%s1144_s1 + $0x60] sm:$0xff]   ;;  %v839_v8 = vld [vmem:[%s1144_s1 + $0x58] sm:$0xff]   ;;  %v841_v10 = vld [vmem:[%s1144_s1 + $0x50] sm:$0xff]  }
   0x4   :  { %723 = vmatprep.subr.bf16.mxu0 %v833_v2  ;;  %816 = vmatprep.subr.bf16.mxu1 %v833_v2  ;;  %v838_v7 = vld [vmem:[%s1144_s1 + $0x20] sm:$0xff]   ;;  %v840_v9 = vld [vmem:[%s1144_s1 + $0x18] sm:$0xff]   ;;  %v842_v13 = vld [vmem:[%s1144_s1 + $0x10] sm:$0xff]  }
   0x5   :  { %v849_v11 = vld [vmem:[%s1145_s0 + $0x4] ss:$12 sps:$4 sm:$0xff]   ;;  %v852_v12 = vld [vmem:[%s1145_s0 + $0x94] ss:$12 sps:$4 sm:$0xff]   ;;  %v843_v14 = vld [vmem:[%s1144_s1 + $0x48] sm:$0xff]  }
   0x6   :  { %375 = vmatprep.mubr.bf16.mxu0 %v849_v11  ;;  %423 = vmatprep.mubr.bf16.mxu1 %v852_v12  ;;  %v844_v15 = vld [vmem:[%s1144_s1 + $0x8] sm:$0xff]   ;;  %v845_v16 = vld [vmem:[%s1144_s1 + $0x40] sm:$0xff]   ;;  %v850_v20 = vld [vmem:[%s1145_s0 + $0x90] ss:$12 sps:$4 sm:$0xff]  }
   0x7   :  { %724 = vmatpush3.bf16.msra.mxu0 %v834_v3  ;;  %824 = vmatpush3.bf16.msra.mxu1 %v834_v3  ;;  %v846_v17 = vld [vmem:[%s1144_s1] sm:$0xff]   ;;  %v853_v19 = vld [vmem:[%s1144_s1 + $0x88] sm:$0xff]   ;;  %v864_v28 = vld [vmem:[%s1145_s0 + $0x30] ss:$12 sps:$4 sm:$0xff]  }
   0x8   :  { %725 = vmatprep.subr.bf16.mxu0 %v835_v4  ;;  %817 = vmatprep.subr.bf16.mxu1 %v835_v4  ;;  %v847_v18 = vld [vmem:[%s1145_s0] ss:$12 sps:$4 sm:$0xff]   ;;  %v854_v21 = vld [vmem:[%s1145_s0 + $0x1c] ss:$12 sps:$4 sm:$0xff]   ;;  %v858_v24 = vld [vmem:[%s1145_s0 + $0x18] ss:$12 sps:$4 sm:$0xff]  }
   0x9   :  { %v856_v22 = vld [vmem:[%s1145_s0 + $0xac] ss:$12 sps:$4 sm:$0xff]   ;;  %v860_v23 = vld [vmem:[%s1144_s1 + $0x80] sm:$0xff]   ;;  %v859_v25 = vld [vmem:[%s1145_s0 + $0xa8] ss:$12 sps:$4 sm:$0xff]  }
   0xa   :  { %v861_v26 = vld [vmem:[%s1145_s0 + $0x34] ss:$12 sps:$4 sm:$0xff]   ;;  %v866_v30 = vld [vmem:[%s1145_s0 + $0x4c] ss:$12 sps:$4 sm:$0xff]   ;;  %v870_v33 = vld [vmem:[%s1145_s0 + $0x50] ss:$12 sps:$4 sm:$0xff]  }
   0xb   :  { %726 = vmatpush3.bf16.msra.mxu0 %v836_v5  ;;  %825 = vmatpush3.bf16.msra.mxu1 %v836_v5  ;;  %v863_v27 = vld [vmem:[%s1145_s0 + $0x8] ss:$12 sps:$4 sm:$0xff]   ;;  %v865_v29 = vld [vmem:[%s1145_s0 + $0x20] ss:$12 sps:$4 sm:$0xff]   ;;  %v868_v31 = vld [vmem:[%s1145_s0 + $0x38] ss:$12 sps:$4 sm:$0xff]  }
   0xc   :  { %727 = vmatprep.subr.bf16.mxu0 %v837_v6  ;;  %818 = vmatprep.subr.bf16.mxu1 %v837_v6  ;;  %v869_v32 = vld [vmem:[%s1145_s0 + $0x48] ss:$12 sps:$4 sm:$0xff]   ;;  %v871_v34 = vld [vmem:[%s1145_s0 + $0x64] ss:$12 sps:$4 sm:$0xff]   ;;  %v874_v36 = vld [vmem:[%s1145_s0 + $0x60] ss:$12 sps:$4 sm:$0xff]  }
   0xd   :  { %v873_v35 = vld [vmem:[%s1145_s0 + $0x68] ss:$12 sps:$4 sm:$0xff]   ;;  %v875_v37 = vld [vmem:[%s1145_s0 + $0x80] ss:$12 sps:$4 sm:$0xff]   ;;  %v878_v39 = vld [vmem:[%s1145_s0 + $0x98] ss:$12 sps:$4 sm:$0xff]  }
   0xe   :  { %v876_v38 = vld [vmem:[%s1145_s0 + $0x7c] ss:$12 sps:$4 sm:$0xff]   ;;  %v879_v40 = vld [vmem:[%s1145_s0 + $0x78] ss:$12 sps:$4 sm:$0xff]   ;;  %v1054_v60 = vld [vmem:[%s1146_s2] ss:$0 sm:$0xff] }
   0xf   :  { %728 = vmatpush3.bf16.msra.mxu0 %v838_v7  ;;  %826 = vmatpush3.bf16.msra.mxu1 %v838_v7  ;;  %v880_v41 = vld [vmem:[%s1145_s0 + $0xb0] ss:$12 sps:$4 sm:$0xff]  }
  0x10   :  { %729 = vmatprep.subr.bf16.mxu0 %v839_v8  ;;  %819 = vmatprep.subr.bf16.mxu1 %v839_v8 }
  0x13   :  { %730 = vmatpush3.bf16.msra.mxu0 %v840_v9  ;;  %827 = vmatpush3.bf16.msra.mxu1 %v840_v9 }
  0x14   :  { %731 = vmatprep.subr.bf16.mxu0 %v841_v10  ;;  %820 = vmatprep.subr.bf16.mxu1 %v841_v10 }
  0x17   :  { %732 = vmatpush3.bf16.msra.mxu0 %v842_v13  ;;  %828 = vmatpush3.bf16.msra.mxu1 %v842_v13 }
  0x18   :  { %733 = vmatprep.subr.bf16.mxu0 %v843_v14  ;;  %821 = vmatprep.subr.bf16.mxu1 %v843_v14 }
  0x1b   :  { %734 = vmatpush3.bf16.msra.mxu0 %v844_v15  ;;  %829 = vmatpush3.bf16.msra.mxu1 %v844_v15 }
  0x1c   :  { %735 = vmatprep.subr.bf16.mxu0 %v845_v16  ;;  %822 = vmatprep.subr.bf16.mxu1 %v845_v16 }
  0x1f   :  { %736 = vmatpush3.bf16.msra.mxu0 %v846_v17  ;;  %830 = vmatpush3.bf16.msra.mxu1 %v846_v17 }
  0x20   :  { %795 = vmatprep.subr.bf16.mxu1 %v853_v19 }
  0x22   :  { %376 = vmatmul.mubr.bf16.vlgmr.msra.gmra.mxu0 %v847_v18  ;;  %424 = vmatmul.mubr.bf16.vlgmr.msra.gmra.mxu1 %v850_v20 }
  0x23   :  { %796 = vmatpush3.bf16.msra.mxu1 %v853_v19  ;;  %383 = vmatprep.mubr.bf16.mxu0 %v854_v21 }
  0x24   :  { %431 = vmatprep.mubr.bf16.mxu1 %v856_v22  ;;  %797 = vmatprep.subr.bf16.mxu1 %v860_v23 }
  0x27   :  { %798 = vmatpush3.bf16.msra.mxu1 %v860_v23 }
  0x2a   :  { %384 = vmatmul.mubr.bf16.gmra.mxu0 %v858_v24  ;;  %432 = vmatmul.mubr.bf16.gmra.mxu1 %v859_v25 }
  0x2b   :  { %391 = vmatprep.mubr.bf16.mxu0 %v861_v26  ;;  %799 = vmatprep.mubr.msk.bf16.mxu1 %vm318_vm0, %v863_v27 }
  0x32   :  { %392 = vmatmul.mubr.bf16.gmra.mxu0 %v864_v28  ;;  %800 = vmatmul.mubr.msk.bf16.vlgmr.msra.gmra.mxu1 %vm318_vm0, %v865_v29 }
  0x33   :  { %399 = vmatprep.mubr.bf16.mxu0 %v866_v30  ;;  %803 = vmatprep.mubr.msk.bf16.mxu1 %vm318_vm0, %v868_v31 }
  0x3a   :  { %400 = vmatmul.mubr.bf16.gmra.mxu0 %v869_v32  ;;  %804 = vmatmul.mubr.msk.bf16.gmra.mxu1 %vm318_vm0, %v870_v33 }
  0x3b   :  { %407 = vmatprep.mubr.bf16.mxu0 %v871_v34  ;;  %807 = vmatprep.mubr.msk.bf16.mxu1 %vm318_vm0, %v873_v35 }
  0x42   :  { %408 = vmatmul.mubr.bf16.gmra.mxu0 %v874_v36  ;;  %808 = vmatmul.mubr.msk.bf16.gmra.mxu1 %vm318_vm0, %v875_v37 }
  0x43   :  { %415 = vmatprep.mubr.bf16.mxu0 %v876_v38  ;;  %811 = vmatprep.mubr.msk.bf16.mxu1 %vm318_vm0, %v878_v39 }
  0x4a   :  { %416 = vmatmul.mubr.bf16.gmra.mxu0 %v879_v40  ;;  %812 = vmatmul.mubr.msk.bf16.gmra.mxu1 %vm318_vm0, %v880_v41 }
  0xe2   :  { %v737_v42 = vpop.f32.mrf.mxu0  ;;  %v1035_v43 = vpop.f32.mrf.mxu1 }
  0xe4   :  { %v738_v44 = vpop.f32.mrf.mxu0  ;;  %v1037_v45 = vpop.f32.mrf.mxu1 }
  0xe5   :  { %v739_v57 = vadd.f32 %v738_v44, %v737_v42 }
  0xe6   :  { %v740_v46 = vpop.f32.mrf.mxu0  ;;  %v1039_v47 = vpop.f32.mrf.mxu1 }
  0xe7   :  { %v378_v3 = vadd.f32 %v739_v57, %v1054_v60 }
  0xe8   :  { %v741_v48 = vpop.f32.mrf.mxu0  ;;  %v1041_v49 = vpop.f32.mrf.mxu1 }
  0xe9   :  { %v742_v63 = vadd.f32 %v741_v48, %v740_v46 }
  0xea   :  { %v743_v50 = vpop.f32.mrf.mxu0  ;;  %v1043_v51 = vpop.f32.mrf.mxu1 }
  0xeb   :  { %v381_v11 = vadd.f32 %v742_v63, %v1054_v60 }
  0xec   :  { %v744_v52 = vpop.f32.mrf.mxu0  ;;  %v1045_v53 = vpop.f32.mrf.mxu1 }
  0xed   :  { %v745_v54 = vadd.f32 %v744_v52, %v743_v50 }
  0xee   :  { %v746_v55 = vpop.f32.mrf.mxu0  ;;  %v1047_v56 = vpop.f32.mrf.mxu1 }
  0xef   :  { %v386_v62 = vadd.f32 %v745_v54, %v1054_v60  ;;  %v781_v54 = vadd.f32 %v1045_v53, %v1043_v51  ;;  %v775_v53 = vadd.f32 %v1037_v45, %v1035_v43 }
  0xf0   :  { %v747_v58 = vpop.f32.mrf.mxu0  ;;  %v1049_v59 = vpop.f32.mrf.mxu1 }
  0xf1   :  { %v748_v61 = vadd.f32 %v747_v58, %v746_v55 }
  0xf2   :  { %v749_v0 = vpop.f32.mrf.mxu0  ;;  %v801_v1 = vpop.f32.mrf.mxu1 }
  0xf3   :  { %v483_v2 = vadd.f32 %v801_v1, %v386_v62  ;;  %v389_v8 = vadd.f32 %v748_v61, %v1054_v60 }
  0xf4   :  { %v750_v4 = vpop.f32.mrf.mxu0  ;;  %v474_v5 = vpop.f32.mrf.mxu1 }
  0xf5   :  { %v539_v6 = vmax.f32 %v483_v2, 0.0  ;;  %v475_v7 = vadd.f32 %v474_v5, %v378_v3  ;;  %v751_v13 = vadd.f32 %v750_v4, %v749_v0  ;;  %v784_v3 = vadd.f32 %v1049_v59, %v1047_v56 }
  0xf6   :  { %v752_v9 = vpop.f32.mrf.mxu0  ;;  %v802_v10 = vpop.f32.mrf.mxu1  ;;  %v778_v56 = vadd.f32 %v1041_v49, %v1039_v47 }
  0xf7   :  { %v707_v12 = vpack.c.bf16 %v539_v6, %v539_v6  ;;  %v537_v14 = vmax.f32 %v475_v7, 0.0  ;;  %v486_v15 = vadd.f32 %v802_v10, %v389_v8  ;;  %v394_v26 = vadd.f32 %v751_v13, %v1054_v60 }
  0xf8   :  { %v753_v16 = vpop.f32.mrf.mxu0  ;;  %v477_v17 = vpop.f32.mrf.mxu1  ;;  %v426_v13 = vadd.f32 %v775_v53, %v1054_v60 }
  0xf9   :  { %620 = vst.msk [vmem:[%s1147_s3 + $0x8] sm:$0xf] %vm617_vm1, %v707_v12  ;;  %v705_v18 = vpack.c.bf16 %v537_v14, %v537_v14  ;;  %v540_v19 = vmax.f32 %v486_v15, 0.0  ;;  %v478_v20 = vadd.f32 %v477_v17, %v381_v11  ;;  %v754_v24 = vadd.f32 %v753_v16, %v752_v9 }
  0xfa   :  { %v755_v21 = vpop.f32.mrf.mxu0  ;;  %v805_v22 = vpop.f32.mrf.mxu1  ;;  %v434_v9 = vadd.f32 %v781_v54, %v1054_v60  ;;  %v437_v15 = vadd.f32 %v784_v3, %v1054_v60 }
  0xfb   :  { %618 = vst.msk [vmem:[%s1147_s3] sm:$0xf] %vm617_vm1, %v705_v18  ;;  %v708_v23 = vpack.c.bf16 %v540_v19, %v540_v19  ;;  %v538_v25 = vmax.f32 %v478_v20, 0.0  ;;  %v397_v36 = vadd.f32 %v754_v24, %v1054_v60 }
  0xfc   :  { %v756_v27 = vpop.f32.mrf.mxu0  ;;  %v490_v28 = vpop.f32.mrf.mxu1 }
  0xfd   :  { %621 = vst.msk [vmem:[%s1147_s3 + $0xc] sm:$0xf] %vm617_vm1, %v708_v23  ;;  %v706_v29 = vpack.c.bf16 %v538_v25, %v538_v25  ;;  %v757_v30 = vadd.f32 %v756_v27, %v755_v21  ;;  %v491_v31 = vadd.f32 %v490_v28, %v394_v26  ;;  %v429_v27 = vadd.f32 %v778_v56, %v1054_v60 }
  0xfe   :  { %v758_v32 = vpop.f32.mrf.mxu0  ;;  %v806_v33 = vpop.f32.mrf.mxu1 }
  0xff   :  { %619 = vst.msk [vmem:[%s1147_s3 + $0x4] sm:$0xf] %vm617_vm1, %v706_v29  ;;  %v402_v34 = vadd.f32 %v757_v30, %v1054_v60  ;;  %v541_v35 = vmax.f32 %v491_v31, 0.0 }
 0x100   :  { %v759_v37 = vpop.f32.mrf.mxu0  ;;  %v493_v38 = vpop.f32.mrf.mxu1 }
 0x101   :  { %v499_v39 = vadd.f32 %v805_v22, %v402_v34  ;;  %v709_v40 = vpack.c.bf16 %v541_v35, %v541_v35  ;;  %v760_v41 = vadd.f32 %v759_v37, %v758_v32  ;;  %v494_v42 = vadd.f32 %v493_v38, %v397_v36 }
 0x102   :  { %v761_v44 = vpop.f32.mrf.mxu0  ;;  %v809_v46 = vpop.f32.mrf.mxu1 }
 0x103   :  { %v543_v48 = vmax.f32 %v499_v39, 0.0  ;;  %622 = vst.msk [vmem:[%s1147_s3 + $0x10] sm:$0xf] %vm617_vm1, %v709_v40  ;;  %v405_v50 = vadd.f32 %v760_v41, %v1054_v60  ;;  %v542_v52 = vmax.f32 %v494_v42, 0.0 }
 0x104   :  { %v762_v55 = vpop.f32.mrf.mxu0  ;;  %v506_v57 = vpop.f32.mrf.mxu1 }
 0x105   :  { %v711_v58 = vpack.c.bf16 %v543_v48, %v543_v48  ;;  %v502_v61 = vadd.f32 %v806_v33, %v405_v50  ;;  %v710_v62 = vpack.c.bf16 %v542_v52, %v542_v52  ;;  %v763_v63 = vadd.f32 %v762_v55, %v761_v44 }
 0x106   :  { %v764_v0 = vpop.f32.mrf.mxu0  ;;  %v810_v1 = vpop.f32.mrf.mxu1 }
 0x107   :  { %624 = vst.msk [vmem:[%s1147_s3 + $0x18] sm:$0xf] %vm617_vm1, %v711_v58  ;;  %v544_v2 = vmax.f32 %v502_v61, 0.0  ;;  %623 = vst.msk [vmem:[%s1147_s3 + $0x14] sm:$0xf] %vm617_vm1, %v710_v62  ;;  %v410_v51 = vadd.f32 %v763_v63, %v1054_v60 }
 0x108   :  { %v765_v4 = vpop.f32.mrf.mxu0  ;;  %v509_v5 = vpop.f32.mrf.mxu1 }
 0x109   :  { %v712_v6 = vpack.c.bf16 %v544_v2, %v544_v2  ;;  %v507_v7 = vadd.f32 %v506_v57, %v410_v51  ;;  %v766_v8 = vadd.f32 %v765_v4, %v764_v0 }
 0x10a   :  { %v767_v10 = vpop.f32.mrf.mxu0  ;;  %v813_v11 = vpop.f32.mrf.mxu1 }
 0x10b   :  { %625 = vst.msk [vmem:[%s1147_s3 + $0x1c] sm:$0xf] %vm617_vm1, %v712_v6  ;;  %v545_v12 = vmax.f32 %v507_v7, 0.0  ;;  %v413_v43 = vadd.f32 %v766_v8, %v1054_v60  ;;  %v531_v45 = vadd.f32 %v813_v11, %v434_v9 }
 0x10c   :  { %v768_v59 = vpop.f32.mrf.mxu0  ;;  %v522_v14 = vpop.f32.mrf.mxu1 }
 0x10d   :  { %v713_v16 = vpack.c.bf16 %v545_v12, %v545_v12  ;;  %v510_v17 = vadd.f32 %v509_v5, %v413_v43  ;;  %v551_v18 = vmax.f32 %v531_v45, 0.0  ;;  %v769_v19 = vadd.f32 %v768_v59, %v767_v10 }
 0x10e   :  { %v523_v20 = vadd.f32 %v522_v14, %v426_v13  ;;  %v770_v21 = vpop.f32.mrf.mxu0  ;;  %v814_v22 = vpop.f32.mrf.mxu1 }
 0x10f   :  { %626 = vst.msk [vmem:[%s1147_s3 + $0x20] sm:$0xf] %vm617_vm1, %v713_v16  ;;  %v546_v23 = vmax.f32 %v510_v17, 0.0  ;;  %v719_v47 = vpack.c.bf16 %v551_v18, %v551_v18  ;;  %v418_v49 = vadd.f32 %v769_v19, %v1054_v60  ;;  %v534_v24 = vadd.f32 %v814_v22, %v437_v15 }
 0x110   :  { %v549_v25 = vmax.f32 %v523_v20, 0.0  ;;  %v771_v26 = vpop.f32.mrf.mxu0  ;;  %v525_v28 = vpop.f32.mrf.mxu1 }
 0x111   :  { %v714_v29 = vpack.c.bf16 %v546_v23, %v546_v23  ;;  %632 = vst.msk [vmem:[%s1147_s3 + $0x38] sm:$0xf] %vm617_vm1, %v719_v47  ;;  %v515_v30 = vadd.f32 %v809_v46, %v418_v49  ;;  %v552_v31 = vmax.f32 %v534_v24, 0.0  ;;  %v772_v32 = vadd.f32 %v771_v26, %v770_v21 }
 0x112   :  { %v717_v33 = vpack.c.bf16 %v549_v25, %v549_v25  ;;  %v526_v34 = vadd.f32 %v525_v28, %v429_v27 }
 0x113   :  { %627 = vst.msk [vmem:[%s1147_s3 + $0x24] sm:$0xf] %vm617_vm1, %v714_v29  ;;  %v547_v35 = vmax.f32 %v515_v30, 0.0  ;;  %v720_v36 = vpack.c.bf16 %v552_v31, %v552_v31  ;;  %v421_v37 = vadd.f32 %v772_v32, %v1054_v60 }
 0x114   :  { %630 = vst.msk [vmem:[%s1147_s3 + $0x30] sm:$0xf] %vm617_vm1, %v717_v33  ;;  %v550_v38 = vmax.f32 %v526_v34, 0.0 }
 0x115   :  { %v715_v39 = vpack.c.bf16 %v547_v35, %v547_v35  ;;  %633 = vst.msk [vmem:[%s1147_s3 + $0x3c] sm:$0xf] %vm617_vm1, %v720_v36  ;;  %v518_v40 = vadd.f32 %v810_v1, %v421_v37 }
 0x116   :  { %v718_v41 = vpack.c.bf16 %v550_v38, %v550_v38 }
 0x117   :  { %628 = vst.msk [vmem:[%s1147_s3 + $0x28] sm:$0xf] %vm617_vm1, %v715_v39  ;;  %v548_v60 = vmax.f32 %v518_v40, 0.0 }
 0x118   :  { %631 = vst.msk [vmem:[%s1147_s3 + $0x34] sm:$0xf] %vm617_vm1, %v718_v41 }
 0x119   :  { %v716_v42 = vpack.c.bf16 %v548_v60, %v548_v60 }
 0x11b   :  { %629 = vst.msk [vmem:[%s1147_s3 + $0x2c] sm:$0xf] %vm617_vm1, %v716_v42 }

// kernel: autoencoder_forward.6
= control target key start
LH: loop header
LB: loop body
LE: loop exit
PB: predicated region body
PF: predicated region fallthrough
CT: control target
= control target key end

     0   :  { %vm372_vm0 = vcmask 523264   ;;  %s913_s1 = inlined_call_operand.vmem [shape: bf16[576,128], index: 1, kind: input, shape index: {}]   ;;  %s914_s0 = inlined_call_operand.vmem [shape: bf16[32,576], index: 0, kind: input, shape index: {}]   ;;  %s915_s2 = inlined_call_operand.vmem [shape: f32[1,128], index: 2, kind: input, shape index: {}]   ;;  %s916_s3 = inlined_call_operand.vmem [shape: bf16[32,128], index: 3, kind: output, shape index: {}]  }
   0x1   :  { %v696_v0 = vld [vmem:[%s913_s1 + $0x78] sm:$0xff]   ;;  %v700_v4 = vld [vmem:[%s913_s1 + $0x70] sm:$0xff]   ;;  %v704_v8 = vld [vmem:[%s913_s1 + $0x68] sm:$0xff]  }
   0x2   :  { %v697_v1 = vld [vmem:[%s913_s1 + $0xf8] sm:$0xff]   ;;  %622 = vmatprep.subr.bf16.mxu0 %v696_v0  ;;  %v701_v5 = vld [vmem:[%s913_s1 + $0xf0] sm:$0xff]   ;;  %v705_v9 = vld [vmem:[%s913_s1 + $0xe8] sm:$0xff]  }
   0x3   :  { %v698_v2 = vld [vmem:[%s913_s1 + $0x38] sm:$0xff]   ;;  %650 = vmatprep.subr.bf16.mxu1 %v697_v1  ;;  %v702_v6 = vld [vmem:[%s913_s1 + $0x30] sm:$0xff]   ;;  %v706_v10 = vld [vmem:[%s913_s1 + $0x28] sm:$0xff]  }
   0x4   :  { %v699_v3 = vld [vmem:[%s913_s1 + $0xb8] sm:$0xff]   ;;  %623 = vmatpush3.bf16.msra.mxu0 %v698_v2  ;;  %v703_v7 = vld [vmem:[%s913_s1 + $0xb0] sm:$0xff]   ;;  %v707_v11 = vld [vmem:[%s913_s1 + $0xa8] sm:$0xff]  }
   0x5   :  { %651 = vmatpush3.bf16.msra.mxu1 %v699_v3  ;;  %624 = vmatprep.subr.bf16.mxu0 %v700_v4  ;;  %v708_v12 = vld [vmem:[%s913_s1 + $0x60] sm:$0xff]   ;;  %v712_v16 = vld [vmem:[%s913_s1 + $0x58] sm:$0xff]   ;;  %v716_v20 = vld [vmem:[%s913_s1 + $0x50] sm:$0xff]  }
   0x6   :  { %652 = vmatprep.subr.bf16.mxu1 %v701_v5  ;;  %v709_v13 = vld [vmem:[%s913_s1 + $0xe0] sm:$0xff]   ;;  %v713_v17 = vld [vmem:[%s913_s1 + $0xd8] sm:$0xff]   ;;  %v717_v21 = vld [vmem:[%s913_s1 + $0xd0] sm:$0xff]  }
   0x7   :  { %v710_v14 = vld [vmem:[%s913_s1 + $0x20] sm:$0xff]   ;;  %v714_v18 = vld [vmem:[%s913_s1 + $0x18] sm:$0xff]   ;;  %v718_v22 = vld [vmem:[%s913_s1 + $0x10] sm:$0xff]  }
   0x8   :  { %625 = vmatpush3.bf16.msra.mxu0 %v702_v6  ;;  %v711_v15 = vld [vmem:[%s913_s1 + $0xa0] sm:$0xff]   ;;  %v715_v19 = vld [vmem:[%s913_s1 + $0x98] sm:$0xff]   ;;  %v719_v23 = vld [vmem:[%s913_s1 + $0x90] sm:$0xff]  }
   0x9   :  { %653 = vmatpush3.bf16.msra.mxu1 %v703_v7  ;;  %626 = vmatprep.subr.bf16.mxu0 %v704_v8  ;;  %v720_v24 = vld [vmem:[%s913_s1 + $0x48] sm:$0xff]   ;;  %v724_v28 = vld [vmem:[%s913_s1 + $0x40] sm:$0xff]   ;;  %v734_v36 = vld [vmem:[%s913_s1 + $0x118] sm:$0xff]  }
   0xa   :  { %654 = vmatprep.subr.bf16.mxu1 %v705_v9  ;;  %v721_v25 = vld [vmem:[%s913_s1 + $0xc8] sm:$0xff]   ;;  %v725_v29 = vld [vmem:[%s913_s1 + $0xc0] sm:$0xff]   ;;  %v735_v37 = vld [vmem:[%s913_s1 + $0x110] sm:$0xff]  }
   0xb   :  { %v722_v26 = vld [vmem:[%s913_s1 + $0x8] sm:$0xff]   ;;  %v726_v30 = vld [vmem:[%s913_s1] sm:$0xff]  }
   0xc   :  { %627 = vmatpush3.bf16.msra.mxu0 %v706_v10  ;;  %v723_v27 = vld [vmem:[%s913_s1 + $0x88] sm:$0xff]   ;;  %v727_v31 = vld [vmem:[%s913_s1 + $0x80] sm:$0xff]  }
   0xd   :  { %655 = vmatpush3.bf16.msra.mxu1 %v707_v11  ;;  %628 = vmatprep.subr.bf16.mxu0 %v708_v12  ;;  %v728_v32 = vld [vmem:[%s914_s0] ss:$20 sps:$4 sm:$0xff]   ;;  %v730_v33 = vld [vmem:[%s914_s0 + $0x4] ss:$20 sps:$4 sm:$0xff]   ;;  %v731_v34 = vld [vmem:[%s914_s0 + $0x8] ss:$20 sps:$4 sm:$0xff]  }
   0xe   :  { %656 = vmatprep.subr.bf16.mxu1 %v709_v13  ;;  %v733_v35 = vld [vmem:[%s914_s0 + $0xc] ss:$20 sps:$4 sm:$0xff]   ;;  %411 = vmatprep.mubr.bf16.mxu0 %v730_v33  ;;  %v738_v39 = vld [vmem:[%s914_s0 + $0x34] ss:$20 sps:$4 sm:$0xff]   ;;  %v741_v42 = vld [vmem:[%s914_s0 + $0x30] ss:$20 sps:$4 sm:$0xff]  }
   0xf   :  { %460 = vmatprep.mubr.bf16.mxu1 %v733_v35  ;;  %v736_v38 = vld [vmem:[%s914_s0 + $0x2c] ss:$20 sps:$4 sm:$0xff]   ;;  %v740_v40 = vld [vmem:[%s914_s0 + $0x28] ss:$20 sps:$4 sm:$0xff]   ;;  %v744_v43 = vld [vmem:[%s914_s0 + $0x10] ss:$20 sps:$4 sm:$0xff]  }
  0x10   :  { %629 = vmatpush3.bf16.msra.mxu0 %v710_v14  ;;  %v742_v41 = vld [vmem:[%s913_s1 + $0x108] sm:$0xff]   ;;  %v743_v44 = vld [vmem:[%s913_s1 + $0x100] sm:$0xff]  }
  0x11   :  { %657 = vmatpush3.bf16.msra.mxu1 %v711_v15  ;;  %630 = vmatprep.subr.bf16.mxu0 %v712_v16  ;;  %v745_v45 = vld [vmem:[%s914_s0 + $0x38] ss:$20 sps:$4 sm:$0xff]   ;;  %v554_v59 = vld [vmem:[%s915_s2] ss:$0 sm:$0xff] }
  0x12   :  { %658 = vmatprep.subr.bf16.mxu1 %v713_v17 }
  0x14   :  { %631 = vmatpush3.bf16.msra.mxu0 %v714_v18 }
  0x15   :  { %659 = vmatpush3.bf16.msra.mxu1 %v715_v19  ;;  %632 = vmatprep.subr.bf16.mxu0 %v716_v20 }
  0x16   :  { %660 = vmatprep.subr.bf16.mxu1 %v717_v21 }
  0x18   :  { %633 = vmatpush3.bf16.msra.mxu0 %v718_v22 }
  0x19   :  { %661 = vmatpush3.bf16.msra.mxu1 %v719_v23  ;;  %634 = vmatprep.subr.bf16.mxu0 %v720_v24 }
  0x1a   :  { %662 = vmatprep.subr.bf16.mxu1 %v721_v25 }
  0x1c   :  { %635 = vmatpush3.bf16.msra.mxu0 %v722_v26 }
  0x1d   :  { %663 = vmatpush3.bf16.msra.mxu1 %v723_v27  ;;  %636 = vmatprep.subr.bf16.mxu0 %v724_v28 }
  0x1e   :  { %664 = vmatprep.subr.bf16.mxu1 %v725_v29 }
  0x20   :  { %637 = vmatpush3.bf16.msra.mxu0 %v726_v30 }
  0x21   :  { %665 = vmatpush3.bf16.msra.mxu1 %v727_v31  ;;  %684 = vmatprep.subr.bf16.mxu0 %v734_v36 }
  0x23   :  { %412 = vmatmul.mubr.bf16.vlgmr.msra.gmra.mxu0 %v728_v32 }
  0x24   :  { %461 = vmatmul.mubr.bf16.vlgmr.msra.gmra.mxu1 %v731_v34  ;;  %685 = vmatpush3.bf16.msra.mxu0 %v734_v36 }
  0x25   :  { %686 = vmatprep.subr.bf16.mxu0 %v735_v37  ;;  %419 = vmatprep.mubr.bf16.mxu0 %v736_v38 }
  0x26   :  { %468 = vmatprep.mubr.bf16.mxu1 %v738_v39 }
  0x28   :  { %687 = vmatpush3.bf16.msra.mxu0 %v735_v37 }
  0x29   :  { %688 = vmatprep.subr.bf16.mxu0 %v742_v41 }
  0x2b   :  { %420 = vmatmul.mubr.bf16.gmra.mxu0 %v740_v40 }
  0x2c   :  { %469 = vmatmul.mubr.bf16.gmra.mxu1 %v741_v42  ;;  %692 = vmatprep.mubr.msk.bf16.mxu0 %vm372_vm0, %v744_v43 }
  0x2d   :  { %689 = vmatpush3.bf16.msra.mxu0 %v742_v41 }
  0x2e   :  { %690 = vmatprep.subr.bf16.mxu0 %v743_v44 }
  0x31   :  { %691 = vmatpush3.bf16.msra.mxu0 %v743_v44 }
  0x34   :  { %693 = vmatmul.mubr.msk.bf16.vlgmr.msra.gmra.mxu0 %vm372_vm0, %v745_v45 }
  0xe3   :  { %v638_v46 = vpop.f32.mrf.mxu0 }
  0xe4   :  { %v666_v47 = vpop.f32.mrf.mxu1 }
  0xe5   :  { %v639_v48 = vpop.f32.mrf.mxu0 }
  0xe6   :  { %v667_v49 = vpop.f32.mrf.mxu1  ;;  %v640_v60 = vadd.f32 %v639_v48, %v638_v46 }
  0xe7   :  { %v641_v50 = vpop.f32.mrf.mxu0  ;;  %v668_v6 = vadd.f32 %v667_v49, %v666_v47 }
  0xe8   :  { %v669_v51 = vpop.f32.mrf.mxu1  ;;  %v414_v5 = vadd.f32 %v640_v60, %v554_v59 }
  0xe9   :  { %v642_v52 = vpop.f32.mrf.mxu0 }
  0xea   :  { %v670_v53 = vpop.f32.mrf.mxu1  ;;  %v643_v1 = vadd.f32 %v642_v52, %v641_v50  ;;  %v463_v16 = vadd.f32 %v668_v6, %v414_v5 }
  0xeb   :  { %v644_v54 = vpop.f32.mrf.mxu0  ;;  %v671_v14 = vadd.f32 %v670_v53, %v669_v51 }
  0xec   :  { %v672_v55 = vpop.f32.mrf.mxu1  ;;  %v417_v11 = vadd.f32 %v643_v1, %v554_v59 }
  0xed   :  { %v645_v56 = vpop.f32.mrf.mxu0 }
  0xee   :  { %v646_v57 = vadd.f32 %v645_v56, %v644_v54  ;;  %v673_v58 = vpop.f32.mrf.mxu1  ;;  %v466_v20 = vadd.f32 %v671_v14, %v417_v11 }
  0xef   :  { %v674_v61 = vadd.f32 %v673_v58, %v672_v55  ;;  %v647_v62 = vpop.f32.mrf.mxu0 }
  0xf0   :  { %v422_v63 = vadd.f32 %v646_v57, %v554_v59  ;;  %v675_v0 = vpop.f32.mrf.mxu1 }
  0xf1   :  { %v648_v2 = vpop.f32.mrf.mxu0 }
  0xf2   :  { %v649_v3 = vadd.f32 %v648_v2, %v647_v62  ;;  %v676_v4 = vpop.f32.mrf.mxu1  ;;  %v471_v7 = vadd.f32 %v674_v61, %v422_v63 }
  0xf3   :  { %v677_v9 = vadd.f32 %v676_v4, %v675_v0 }
  0xf4   :  { %v425_v8 = vadd.f32 %v649_v3, %v554_v59  ;;  %v694_v10 = vpop.f32.mrf.mxu0 }
  0xf5   :  { %v520_v15 = vadd.f32 %v694_v10, %v471_v7 }
  0xf6   :  { %v511_v12 = vpop.f32.mrf.mxu0  ;;  %v474_v13 = vadd.f32 %v677_v9, %v425_v8 }
  0xf7   :  { %v512_v18 = vadd.f32 %v511_v12, %v463_v16  ;;  %v528_v22 = vmax.f32 %v520_v15, 0.0 }
  0xf8   :  { %v695_v17 = vpop.f32.mrf.mxu0 }
  0xf9   :  { %v523_v19 = vadd.f32 %v695_v17, %v474_v13  ;;  %v526_v25 = vmax.f32 %v512_v18, 0.0 }
  0xfa   :  { %v514_v21 = vpop.f32.mrf.mxu0 }
  0xfb   :  { %v529_v23 = vmax.f32 %v523_v19, 0.0  ;;  %v515_v24 = vadd.f32 %v514_v21, %v466_v20 }
  0xfd   :  { %v619_v26 = vpack.c.bf16 %v529_v23, %v528_v22  ;;  %v527_v27 = vmax.f32 %v515_v24, 0.0 }
  0xff   :  { %621 = vst [vmem:[%s916_s3 + $0x8] sm:$0xff] %v619_v26   ;;  %v614_v28 = vpack.c.bf16 %v527_v27, %v526_v25 }
 0x101   :  { %615 = vst [vmem:[%s916_s3] sm:$0xff] %v614_v28  }

// kernel: autoencoder_forward.7
= control target key start
LH: loop header
LB: loop body
LE: loop exit
PB: predicated region body
PF: predicated region fallthrough
CT: control target
= control target key end

     0   :  { %v544_v36 = vlaneseq  ;;  %v6094_v37 = vmov 1966171168   ;;  %s8096_s0 = inlined_call_operand.vmem [shape: bf16[2,2048], index: 0, kind: input, shape index: {}]   ;;  %s8097_s1 = inlined_call_operand.vmem [shape: bf16[2048,512], index: 1, kind: input, shape index: {}]   ;;  %s8098_s2 = inlined_call_operand.vmem [shape: f32[1,512], index: 2, kind: input, shape index: {}]   ;;  %s8099_s3 = inlined_call_operand.vmem [shape: bf16[512,256], index: 3, kind: input, shape index: {}]   ;;  %s8100_s4 = inlined_call_operand.vmem [shape: f32[1,256], index: 4, kind: input, shape index: {}]   ;;  %s8101_s5 = inlined_call_operand.vmem [shape: bf16[256,128], index: 5, kind: input, shape index: {}]   ;;  %s8102_s6 = inlined_call_operand.vmem [shape: f32[1,128], index: 6, kind: input, shape index: {}]   ;;  %s8103_s7 = inlined_call_operand.hbm [shape: f32[2,128], index: 7, kind: output, shape index: {}]  }
   0x1   :  { %v5189_v0 = vld [vmem:[%s8097_s1 + $0xe4] ss:$16 sps:$4 sm:$0xff]   ;;  %v5193_v2 = vld [vmem:[%s8097_s1 + $0xe0] ss:$16 sps:$4 sm:$0xff]   ;;  %v568_v38 = vunpack.c.l.s4 %v6094_v37 }
   0x2   :  { %v5191_v1 = vld [vmem:[%s8097_s1 + $0x2e4] ss:$16 sps:$4 sm:$0xff]   ;;  %3240 = vmatprep.subr.bf16.mxu0 %v5189_v0  ;;  %v5194_v3 = vld [vmem:[%s8097_s1 + $0x2e0] ss:$16 sps:$4 sm:$0xff]   ;;  %v6253_v42 = vshrl.u32 %v544_v36, 7 }
   0x3   :  { %3281 = vmatprep.subr.bf16.mxu1 %v5191_v1  ;;  %v5195_v4 = vld [vmem:[%s8097_s1 + $0xc4] ss:$16 sps:$4 sm:$0xff]   ;;  %3241 = vmatpush1.bf16.msra.mxu0 %v5193_v2  ;;  %v5199_v6 = vld [vmem:[%s8097_s1 + $0xc0] ss:$16 sps:$4 sm:$0xff]   ;;  %v569_v43 = vunpack.c.0.s8 %v568_v38 }
   0x4   :  { %3282 = vmatpush1.bf16.msra.mxu1 %v5194_v3  ;;  %v5197_v5 = vld [vmem:[%s8097_s1 + $0x2c4] ss:$16 sps:$4 sm:$0xff]   ;;  %3242 = vmatprep.subr.bf16.mxu0 %v5195_v4  ;;  %v5200_v7 = vld [vmem:[%s8097_s1 + $0x2c0] ss:$16 sps:$4 sm:$0xff]  }
   0x5   :  { %3283 = vmatprep.subr.bf16.mxu1 %v5197_v5  ;;  %v5201_v8 = vld [vmem:[%s8097_s1 + $0xa4] ss:$16 sps:$4 sm:$0xff]   ;;  %v5205_v10 = vld [vmem:[%s8097_s1 + $0xa0] ss:$16 sps:$4 sm:$0xff]   ;;  %v6271_v49 = vsub.s32 %v569_v43, %v6253_v42 }
   0x6   :  { %v5203_v9 = vld [vmem:[%s8097_s1 + $0x2a4] ss:$16 sps:$4 sm:$0xff]   ;;  %v5206_v11 = vld [vmem:[%s8097_s1 + $0x2a0] ss:$16 sps:$4 sm:$0xff]  }
   0x7   :  { %3243 = vmatpush1.bf16.msra.mxu0 %v5199_v6  ;;  %v5207_v12 = vld [vmem:[%s8097_s1 + $0x84] ss:$16 sps:$4 sm:$0xff]   ;;  %v5211_v14 = vld [vmem:[%s8097_s1 + $0x80] ss:$16 sps:$4 sm:$0xff]  }
   0x8   :  { %3284 = vmatpush1.bf16.msra.mxu1 %v5200_v7  ;;  %3244 = vmatprep.subr.bf16.mxu0 %v5201_v8  ;;  %v5209_v13 = vld [vmem:[%s8097_s1 + $0x284] ss:$16 sps:$4 sm:$0xff]   ;;  %v5212_v15 = vld [vmem:[%s8097_s1 + $0x280] ss:$16 sps:$4 sm:$0xff]  }
   0x9   :  { %3285 = vmatprep.subr.bf16.mxu1 %v5203_v9  ;;  %v5213_v16 = vld [vmem:[%s8097_s1 + $0x64] ss:$16 sps:$4 sm:$0xff]   ;;  %v5217_v18 = vld [vmem:[%s8097_s1 + $0x60] ss:$16 sps:$4 sm:$0xff]  }
   0xa   :  { %v5215_v17 = vld [vmem:[%s8097_s1 + $0x264] ss:$16 sps:$4 sm:$0xff]   ;;  %v5218_v19 = vld [vmem:[%s8097_s1 + $0x260] ss:$16 sps:$4 sm:$0xff]  }
   0xb   :  { %3245 = vmatpush1.bf16.msra.mxu0 %v5205_v10  ;;  %v5219_v20 = vld [vmem:[%s8097_s1 + $0x44] ss:$16 sps:$4 sm:$0xff]   ;;  %v5223_v22 = vld [vmem:[%s8097_s1 + $0x40] ss:$16 sps:$4 sm:$0xff]  }
   0xc   :  { %3286 = vmatpush1.bf16.msra.mxu1 %v5206_v11  ;;  %3246 = vmatprep.subr.bf16.mxu0 %v5207_v12  ;;  %v5221_v21 = vld [vmem:[%s8097_s1 + $0x244] ss:$16 sps:$4 sm:$0xff]   ;;  %v5224_v23 = vld [vmem:[%s8097_s1 + $0x240] ss:$16 sps:$4 sm:$0xff]  }
   0xd   :  { %3287 = vmatprep.subr.bf16.mxu1 %v5209_v13  ;;  %v5225_v24 = vld [vmem:[%s8097_s1 + $0x24] ss:$16 sps:$4 sm:$0xff]   ;;  %v5229_v26 = vld [vmem:[%s8097_s1 + $0x20] ss:$16 sps:$4 sm:$0xff]  }
   0xe   :  { %v5227_v25 = vld [vmem:[%s8097_s1 + $0x224] ss:$16 sps:$4 sm:$0xff]   ;;  %v5230_v27 = vld [vmem:[%s8097_s1 + $0x220] ss:$16 sps:$4 sm:$0xff]  }
   0xf   :  { %3247 = vmatpush1.bf16.msra.mxu0 %v5211_v14  ;;  %v5231_v28 = vld [vmem:[%s8097_s1 + $0x4] ss:$16 sps:$4 sm:$0xff]   ;;  %v5235_v30 = vld [vmem:[%s8097_s1] ss:$16 sps:$4 sm:$0xff]  }
  0x10   :  { %3288 = vmatpush1.bf16.msra.mxu1 %v5212_v15  ;;  %3248 = vmatprep.subr.bf16.mxu0 %v5213_v16  ;;  %v5233_v29 = vld [vmem:[%s8097_s1 + $0x204] ss:$16 sps:$4 sm:$0xff]   ;;  %v5236_v31 = vld [vmem:[%s8097_s1 + $0x200] ss:$16 sps:$4 sm:$0xff]  }
  0x11   :  { %3289 = vmatprep.subr.bf16.mxu1 %v5215_v17  ;;  %v5237_v32 = vld [vmem:[%s8097_s1 + $0x1e4] ss:$16 sps:$4 sm:$0xff]   ;;  %v5241_v34 = vld [vmem:[%s8097_s1 + $0x1e0] ss:$16 sps:$4 sm:$0xff]  }
  0x12   :  { %v5239_v33 = vld [vmem:[%s8097_s1 + $0x3e4] ss:$16 sps:$4 sm:$0xff]   ;;  %v5242_v35 = vld [vmem:[%s8097_s1 + $0x3e0] ss:$16 sps:$4 sm:$0xff]  }
  0x13   :  { %3249 = vmatpush1.bf16.msra.mxu0 %v5217_v18  ;;  %v5243_v39 = vld [vmem:[%s8097_s1 + $0x1c4] ss:$16 sps:$4 sm:$0xff]   ;;  %v5247_v41 = vld [vmem:[%s8097_s1 + $0x1c0] ss:$16 sps:$4 sm:$0xff]  }
  0x14   :  { %3290 = vmatpush1.bf16.msra.mxu1 %v5218_v19  ;;  %3250 = vmatprep.subr.bf16.mxu0 %v5219_v20  ;;  %v5245_v40 = vld [vmem:[%s8097_s1 + $0x3c4] ss:$16 sps:$4 sm:$0xff]   ;;  %v5248_v44 = vld [vmem:[%s8097_s1 + $0x3c0] ss:$16 sps:$4 sm:$0xff]  }
  0x15   :  { %3291 = vmatprep.subr.bf16.mxu1 %v5221_v21  ;;  %v5249_v45 = vld [vmem:[%s8097_s1 + $0x1a4] ss:$16 sps:$4 sm:$0xff]   ;;  %v5253_v47 = vld [vmem:[%s8097_s1 + $0x1a0] ss:$16 sps:$4 sm:$0xff]  }
  0x16   :  { %v5251_v46 = vld [vmem:[%s8097_s1 + $0x3a4] ss:$16 sps:$4 sm:$0xff]   ;;  %v5254_v48 = vld [vmem:[%s8097_s1 + $0x3a0] ss:$16 sps:$4 sm:$0xff]  }
  0x17   :  { %3251 = vmatpush1.bf16.msra.mxu0 %v5223_v22  ;;  %v5255_v50 = vld [vmem:[%s8097_s1 + $0x184] ss:$16 sps:$4 sm:$0xff]   ;;  %v5259_v53 = vld [vmem:[%s8097_s1 + $0x180] ss:$16 sps:$4 sm:$0xff]  }
  0x18   :  { %3292 = vmatpush1.bf16.msra.mxu1 %v5224_v23  ;;  %3252 = vmatprep.subr.bf16.mxu0 %v5225_v24  ;;  %v5257_v51 = vld [vmem:[%s8097_s1 + $0x384] ss:$16 sps:$4 sm:$0xff]   ;;  %v5260_v55 = vld [vmem:[%s8097_s1 + $0x380] ss:$16 sps:$4 sm:$0xff]  }
  0x19   :  { %3293 = vmatprep.subr.bf16.mxu1 %v5227_v25  ;;  %v28_v52 = vld [vmem:[%s8096_s0] sm:$0xff] }
  0x1a   :  { %v573_v54 = vrot.slane %v28_v52, %v6271_v49  ;;  %v5261_v56 = vld [vmem:[%s8097_s1 + $0x164] ss:$16 sps:$4 sm:$0xff]   ;;  %v5265_v59 = vld [vmem:[%s8097_s1 + $0x160] ss:$16 sps:$4 sm:$0xff]   ;;  %v566_v1 = vcombine.high %v28_v52, %v28_v52 }
  0x1b   :  { %3253 = vmatpush1.bf16.msra.mxu0 %v5229_v26  ;;  %v5263_v57 = vld [vmem:[%s8097_s1 + $0x364] ss:$16 sps:$4 sm:$0xff]   ;;  %v5266_v61 = vld [vmem:[%s8097_s1 + $0x360] ss:$16 sps:$4 sm:$0xff]  }
  0x1c   :  { %3294 = vmatpush1.bf16.msra.mxu1 %v5230_v27  ;;  %3254 = vmatprep.subr.bf16.mxu0 %v5231_v28  ;;  %v581_v58 = vcombine.high %v573_v54, %v573_v54  ;;  %v5267_v62 = vld [vmem:[%s8097_s1 + $0x144] ss:$16 sps:$4 sm:$0xff]   ;;  %v5271_v2 = vld [vmem:[%s8097_s1 + $0x140] ss:$16 sps:$4 sm:$0xff]   ;;  %v6329_v6 = vrot.slane %v566_v1, %v6271_v49  ;;  %v6349_v13 = vrot.slane %v573_v54, %v6271_v49 }
  0x1d   :  { %3295 = vmatprep.subr.bf16.mxu1 %v5233_v29  ;;  %v5269_v63 = vld [vmem:[%s8097_s1 + $0x344] ss:$16 sps:$4 sm:$0xff]   ;;  %v5272_v3 = vld [vmem:[%s8097_s1 + $0x340] ss:$16 sps:$4 sm:$0xff]  }
  0x1e   :  { %v6299_v60 = vrot.slane %v581_v58, %v6271_v49  ;;  %v5273_v4 = vld [vmem:[%s8097_s1 + $0x124] ss:$16 sps:$4 sm:$0xff]   ;;  %v5277_v7 = vld [vmem:[%s8097_s1 + $0x120] ss:$16 sps:$4 sm:$0xff]   ;;  %v582_v11 = vcombine.high %v6329_v6, %v6329_v6  ;;  %v6365_v18 = vcombine.high %v6349_v13, %v6349_v13 }
  0x1f   :  { %3255 = vmatpush1.bf16.msra.mxu0 %v5235_v30  ;;  %v5275_v5 = vld [vmem:[%s8097_s1 + $0x324] ss:$16 sps:$4 sm:$0xff]   ;;  %v5278_v8 = vld [vmem:[%s8097_s1 + $0x320] ss:$16 sps:$4 sm:$0xff]  }
  0x20   :  { %3296 = vmatpush1.bf16.msra.mxu1 %v5236_v31  ;;  %3256 = vmatprep.subr.bf16.mxu0 %v5237_v32  ;;  %v6312_v0 = vcombine.high %v6299_v60, %v6299_v60  ;;  %v5279_v9 = vld [vmem:[%s8097_s1 + $0x104] ss:$16 sps:$4 sm:$0xff]   ;;  %v5283_v12 = vld [vmem:[%s8097_s1 + $0x100] ss:$16 sps:$4 sm:$0xff]   ;;  %v6361_v17 = vrot.slane %v582_v11, %v6271_v49 }
  0x21   :  { %3297 = vmatprep.subr.bf16.mxu1 %v5239_v33  ;;  %3272 = vmatprep.mubr.bf16.mxu0 %v6299_v60  ;;  %v5281_v10 = vld [vmem:[%s8097_s1 + $0x304] ss:$16 sps:$4 sm:$0xff]   ;;  %v5284_v14 = vld [vmem:[%s8097_s1 + $0x300] ss:$16 sps:$4 sm:$0xff]  }
  0x22   :  { %3313 = vmatprep.mubr.bf16.mxu1 %v6312_v0  ;;  %v5287_v15 = vld [vmem:[%s8097_s1 + $0x4e4] ss:$16 sps:$4 sm:$0xff]   ;;  %v5285_v19 = vld [vmem:[%s8097_s1 + $0x4e0] ss:$16 sps:$4 sm:$0xff]   ;;  %v6381_v23 = vcombine.high %v6361_v17, %v6361_v17 }
  0x23   :  { %3257 = vmatpush2.bf16.msra.mxu0 %v5241_v34  ;;  %v5290_v16 = vld [vmem:[%s8097_s1 + $0x6e4] ss:$16 sps:$4 sm:$0xff]   ;;  %v5288_v20 = vld [vmem:[%s8097_s1 + $0x6e0] ss:$16 sps:$4 sm:$0xff]  }
  0x24   :  { %3298 = vmatpush2.bf16.msra.mxu1 %v5242_v35  ;;  %3258 = vmatprep.subr.bf16.mxu0 %v5243_v39  ;;  %v5293_v21 = vld [vmem:[%s8097_s1 + $0x4c4] ss:$16 sps:$4 sm:$0xff]   ;;  %v5291_v24 = vld [vmem:[%s8097_s1 + $0x4c0] ss:$16 sps:$4 sm:$0xff]  }
  0x25   :  { %3299 = vmatprep.subr.bf16.mxu1 %v5245_v40  ;;  %v5296_v22 = vld [vmem:[%s8097_s1 + $0x6c4] ss:$16 sps:$4 sm:$0xff]   ;;  %v5294_v25 = vld [vmem:[%s8097_s1 + $0x6c0] ss:$16 sps:$4 sm:$0xff]  }
  0x26   :  { %v5299_v26 = vld [vmem:[%s8097_s1 + $0x4a4] ss:$16 sps:$4 sm:$0xff]   ;;  %v5297_v28 = vld [vmem:[%s8097_s1 + $0x4a0] ss:$16 sps:$4 sm:$0xff]  }
  0x27   :  { %3259 = vmatpush2.bf16.msra.mxu0 %v5247_v41  ;;  %v5302_v27 = vld [vmem:[%s8097_s1 + $0x6a4] ss:$16 sps:$4 sm:$0xff]   ;;  %v5300_v29 = vld [vmem:[%s8097_s1 + $0x6a0] ss:$16 sps:$4 sm:$0xff]  }
  0x28   :  { %3300 = vmatpush2.bf16.msra.mxu1 %v5248_v44  ;;  %3260 = vmatprep.subr.bf16.mxu0 %v5249_v45  ;;  %v5305_v30 = vld [vmem:[%s8097_s1 + $0x484] ss:$16 sps:$4 sm:$0xff]   ;;  %v5303_v32 = vld [vmem:[%s8097_s1 + $0x480] ss:$16 sps:$4 sm:$0xff]  }
  0x29   :  { %3301 = vmatprep.subr.bf16.mxu1 %v5251_v46  ;;  %v5308_v31 = vld [vmem:[%s8097_s1 + $0x684] ss:$16 sps:$4 sm:$0xff]   ;;  %v5306_v33 = vld [vmem:[%s8097_s1 + $0x680] ss:$16 sps:$4 sm:$0xff]  }
  0x2a   :  { %v5311_v34 = vld [vmem:[%s8097_s1 + $0x464] ss:$16 sps:$4 sm:$0xff]   ;;  %v5309_v36 = vld [vmem:[%s8097_s1 + $0x460] ss:$16 sps:$4 sm:$0xff]  }
  0x2b   :  { %3261 = vmatpush2.bf16.msra.mxu0 %v5253_v47  ;;  %v5314_v35 = vld [vmem:[%s8097_s1 + $0x664] ss:$16 sps:$4 sm:$0xff]   ;;  %v5312_v37 = vld [vmem:[%s8097_s1 + $0x660] ss:$16 sps:$4 sm:$0xff]  }
  0x2c   :  { %3302 = vmatpush2.bf16.msra.mxu1 %v5254_v48  ;;  %3262 = vmatprep.subr.bf16.mxu0 %v5255_v50  ;;  %v5317_v38 = vld [vmem:[%s8097_s1 + $0x444] ss:$16 sps:$4 sm:$0xff]   ;;  %v5315_v40 = vld [vmem:[%s8097_s1 + $0x440] ss:$16 sps:$4 sm:$0xff]  }
  0x2d   :  { %3303 = vmatprep.subr.bf16.mxu1 %v5257_v51  ;;  %v5320_v39 = vld [vmem:[%s8097_s1 + $0x644] ss:$16 sps:$4 sm:$0xff]   ;;  %v5318_v41 = vld [vmem:[%s8097_s1 + $0x640] ss:$16 sps:$4 sm:$0xff]  }
  0x2e   :  { %v5323_v43 = vld [vmem:[%s8097_s1 + $0x424] ss:$16 sps:$4 sm:$0xff]   ;;  %v5321_v45 = vld [vmem:[%s8097_s1 + $0x420] ss:$16 sps:$4 sm:$0xff]  }
  0x2f   :  { %3263 = vmatpush2.bf16.msra.mxu0 %v5259_v53  ;;  %v5326_v44 = vld [vmem:[%s8097_s1 + $0x624] ss:$16 sps:$4 sm:$0xff]   ;;  %v5324_v46 = vld [vmem:[%s8097_s1 + $0x620] ss:$16 sps:$4 sm:$0xff]  }
  0x30   :  { %3304 = vmatpush2.bf16.msra.mxu1 %v5260_v55  ;;  %3264 = vmatprep.subr.bf16.mxu0 %v5261_v56  ;;  %v5329_v47 = vld [vmem:[%s8097_s1 + $0x404] ss:$16 sps:$4 sm:$0xff]   ;;  %v5327_v50 = vld [vmem:[%s8097_s1 + $0x400] ss:$16 sps:$4 sm:$0xff]  }
  0x31   :  { %3305 = vmatprep.subr.bf16.mxu1 %v5263_v57  ;;  %v5332_v48 = vld [vmem:[%s8097_s1 + $0x604] ss:$16 sps:$4 sm:$0xff]   ;;  %v5330_v51 = vld [vmem:[%s8097_s1 + $0x600] ss:$16 sps:$4 sm:$0xff]  }
  0x32   :  { %v5335_v52 = vld [vmem:[%s8097_s1 + $0x5e4] ss:$16 sps:$4 sm:$0xff]   ;;  %v5333_v54 = vld [vmem:[%s8097_s1 + $0x5e0] ss:$16 sps:$4 sm:$0xff]  }
  0x33   :  { %3265 = vmatpush2.bf16.msra.mxu0 %v5265_v59  ;;  %v5338_v53 = vld [vmem:[%s8097_s1 + $0x7e4] ss:$16 sps:$4 sm:$0xff]   ;;  %v5336_v55 = vld [vmem:[%s8097_s1 + $0x7e0] ss:$16 sps:$4 sm:$0xff]  }
  0x34   :  { %3306 = vmatpush2.bf16.msra.mxu1 %v5266_v61  ;;  %3266 = vmatprep.subr.bf16.mxu0 %v5267_v62  ;;  %v5341_v56 = vld [vmem:[%s8097_s1 + $0x5c4] ss:$16 sps:$4 sm:$0xff]   ;;  %v5339_v58 = vld [vmem:[%s8097_s1 + $0x5c0] ss:$16 sps:$4 sm:$0xff]  }
  0x35   :  { %3307 = vmatprep.subr.bf16.mxu1 %v5269_v63  ;;  %v5344_v57 = vld [vmem:[%s8097_s1 + $0x7c4] ss:$16 sps:$4 sm:$0xff]   ;;  %v5342_v59 = vld [vmem:[%s8097_s1 + $0x7c0] ss:$16 sps:$4 sm:$0xff]  }
  0x36   :  { %v5347_v61 = vld [vmem:[%s8097_s1 + $0x5a4] ss:$16 sps:$4 sm:$0xff]   ;;  %v5345_v63 = vld [vmem:[%s8097_s1 + $0x5a0] ss:$16 sps:$4 sm:$0xff]  }
  0x37   :  { %3267 = vmatpush2.bf16.msra.mxu0 %v5271_v2  ;;  %v5350_v62 = vld [vmem:[%s8097_s1 + $0x7a4] ss:$16 sps:$4 sm:$0xff]   ;;  %v5348_v1 = vld [vmem:[%s8097_s1 + $0x7a0] ss:$16 sps:$4 sm:$0xff]  }
  0x38   :  { %3308 = vmatpush2.bf16.msra.mxu1 %v5272_v3  ;;  %3268 = vmatprep.subr.bf16.mxu0 %v5273_v4  ;;  %v5353_v2 = vld [vmem:[%s8097_s1 + $0x584] ss:$16 sps:$4 sm:$0xff]   ;;  %v5351_v4 = vld [vmem:[%s8097_s1 + $0x580] ss:$16 sps:$4 sm:$0xff]  }
  0x39   :  { %3309 = vmatprep.subr.bf16.mxu1 %v5275_v5  ;;  %v5356_v3 = vld [vmem:[%s8097_s1 + $0x784] ss:$16 sps:$4 sm:$0xff]   ;;  %v5354_v5 = vld [vmem:[%s8097_s1 + $0x780] ss:$16 sps:$4 sm:$0xff]  }
  0x3a   :  { %v5365_v11 = vld [vmem:[%s8097_s1 + $0x544] ss:$16 sps:$4 sm:$0xff]  }
  0x3b   :  { %3269 = vmatpush2.bf16.msra.mxu0 %v5277_v7  ;;  %v5359_v7 = vld [vmem:[%s8097_s1 + $0x564] ss:$16 sps:$4 sm:$0xff]  }
  0x3c   :  { %3310 = vmatpush2.bf16.msra.mxu1 %v5278_v8  ;;  %3270 = vmatprep.subr.bf16.mxu0 %v5279_v9  ;;  %v5362_v8 = vld [vmem:[%s8097_s1 + $0x764] ss:$16 sps:$4 sm:$0xff]   ;;  %v5357_v9 = vld [vmem:[%s8097_s1 + $0x560] ss:$16 sps:$4 sm:$0xff]  }
  0x3d   :  { %3311 = vmatprep.subr.bf16.mxu1 %v5281_v10  ;;  %v5360_v10 = vld [vmem:[%s8097_s1 + $0x760] ss:$16 sps:$4 sm:$0xff]  }
  0x3f   :  { %3271 = vmatpush2.bf16.msra.mxu0 %v5283_v12  ;;  %v5368_v12 = vld [vmem:[%s8097_s1 + $0x744] ss:$16 sps:$4 sm:$0xff]  }
  0x40   :  { %3312 = vmatpush2.bf16.msra.mxu1 %v5284_v14  ;;  %3322 = vmatprep.subr.bf16.mxu0 %v5287_v15  ;;  %v5363_v14 = vld [vmem:[%s8097_s1 + $0x540] ss:$16 sps:$4 sm:$0xff]  }
  0x41   :  { %3363 = vmatprep.subr.bf16.mxu1 %v5290_v16  ;;  %v5366_v15 = vld [vmem:[%s8097_s1 + $0x740] ss:$16 sps:$4 sm:$0xff]   ;;  %v5371_v16 = vld [vmem:[%s8097_s1 + $0x524] ss:$16 sps:$4 sm:$0xff]  }
  0x42   :  { %3273 = vmatmul.mubr.bf16.vlgmr.msra.gmra.mxu0 %v6349_v13 }
  0x43   :  { %3314 = vmatmul.mubr.bf16.vlgmr.msra.gmra.mxu1 %v6365_v18  ;;  %3323 = vmatpush1.bf16.msra.mxu0 %v5285_v19  ;;  %v5374_v19 = vld [vmem:[%s8097_s1 + $0x724] ss:$16 sps:$4 sm:$0xff]  }
  0x44   :  { %3364 = vmatpush1.bf16.msra.mxu1 %v5288_v20  ;;  %3324 = vmatprep.subr.bf16.mxu0 %v5293_v21  ;;  %v5369_v20 = vld [vmem:[%s8097_s1 + $0x520] ss:$16 sps:$4 sm:$0xff]  }
  0x45   :  { %3365 = vmatprep.subr.bf16.mxu1 %v5296_v22  ;;  %3354 = vmatprep.mubr.bf16.mxu0 %v6361_v17  ;;  %v5372_v21 = vld [vmem:[%s8097_s1 + $0x720] ss:$16 sps:$4 sm:$0xff]   ;;  %v5377_v22 = vld [vmem:[%s8097_s1 + $0x504] ss:$16 sps:$4 sm:$0xff]  }
  0x46   :  { %3395 = vmatprep.mubr.bf16.mxu1 %v6381_v23 }
  0x47   :  { %3325 = vmatpush1.bf16.msra.mxu0 %v5291_v24  ;;  %v5380_v24 = vld [vmem:[%s8097_s1 + $0x704] ss:$16 sps:$4 sm:$0xff]  }
  0x48   :  { %3366 = vmatpush1.bf16.msra.mxu1 %v5294_v25  ;;  %3326 = vmatprep.subr.bf16.mxu0 %v5299_v26  ;;  %v5375_v25 = vld [vmem:[%s8097_s1 + $0x500] ss:$16 sps:$4 sm:$0xff]   ;;  %v6560_v26 = vrot.slane %v6329_v6, %v6271_v49 }
  0x49   :  { %3367 = vmatprep.subr.bf16.mxu1 %v5302_v27  ;;  %v5378_v27 = vld [vmem:[%s8097_s1 + $0x700] ss:$16 sps:$4 sm:$0xff]  }
  0x4a   :  { %v6573_v6 = vcombine.high %v6560_v26, %v6560_v26 }
  0x4b   :  { %3327 = vmatpush1.bf16.msra.mxu0 %v5297_v28  ;;  %v5384_v28 = vld [vmem:[%s8097_s1 + $0x8e4] ss:$16 sps:$4 sm:$0xff]  }
  0x4c   :  { %3368 = vmatpush1.bf16.msra.mxu1 %v5300_v29  ;;  %3328 = vmatprep.subr.bf16.mxu0 %v5305_v30  ;;  %v5387_v29 = vld [vmem:[%s8097_s1 + $0xae4] ss:$16 sps:$4 sm:$0xff]   ;;  %v5382_v30 = vld [vmem:[%s8097_s1 + $0x8e0] ss:$16 sps:$4 sm:$0xff]  }
  0x4d   :  { %3369 = vmatprep.subr.bf16.mxu1 %v5308_v31  ;;  %v5385_v31 = vld [vmem:[%s8097_s1 + $0xae0] ss:$16 sps:$4 sm:$0xff]  }
  0x4f   :  { %3329 = vmatpush1.bf16.msra.mxu0 %v5303_v32  ;;  %v6584_v32 = vld [vmem:[%s8096_s0 + $0x8] sm:$0xff] }
  0x50   :  { %3370 = vmatpush1.bf16.msra.mxu1 %v5306_v33  ;;  %3330 = vmatprep.subr.bf16.mxu0 %v5311_v34  ;;  %v5390_v33 = vld [vmem:[%s8097_s1 + $0x8c4] ss:$16 sps:$4 sm:$0xff]  }
  0x51   :  { %3371 = vmatprep.subr.bf16.mxu1 %v5314_v35  ;;  %v5393_v34 = vld [vmem:[%s8097_s1 + $0xac4] ss:$16 sps:$4 sm:$0xff]   ;;  %v6594_v35 = vrot.slane %v6584_v32, %v6271_v49 }
  0x53   :  { %3331 = vmatpush1.bf16.msra.mxu0 %v5309_v36  ;;  %v630_v36 = vcombine.high %v6594_v35, %v6594_v35 }
  0x54   :  { %3372 = vmatpush1.bf16.msra.mxu1 %v5312_v37  ;;  %3332 = vmatprep.subr.bf16.mxu0 %v5317_v38  ;;  %v5388_v37 = vld [vmem:[%s8097_s1 + $0x8c0] ss:$16 sps:$4 sm:$0xff]  }
  0x55   :  { %3373 = vmatprep.subr.bf16.mxu1 %v5320_v39  ;;  %v5391_v38 = vld [vmem:[%s8097_s1 + $0xac0] ss:$16 sps:$4 sm:$0xff]   ;;  %v5396_v39 = vld [vmem:[%s8097_s1 + $0x8a4] ss:$16 sps:$4 sm:$0xff]  }
  0x57   :  { %3333 = vmatpush1.bf16.msra.mxu0 %v5315_v40  ;;  %v5399_v40 = vld [vmem:[%s8097_s1 + $0xaa4] ss:$16 sps:$4 sm:$0xff]  }
  0x58   :  { %3374 = vmatpush1.bf16.msra.mxu1 %v5318_v41  ;;  %3334 = vmatprep.subr.bf16.mxu0 %v5323_v43  ;;  %v6613_v41 = vrot.slane %v630_v36, %v6271_v49  ;;  %v5460_v36 = vld [vmem:[%s8097_s1 + $0x940] ss:$16 sps:$4 sm:$0xff]  }
  0x59   :  { %3375 = vmatprep.subr.bf16.mxu1 %v5326_v44  ;;  %v5394_v44 = vld [vmem:[%s8097_s1 + $0x8a0] ss:$16 sps:$4 sm:$0xff]  }
  0x5a   :  { %v6618_v43 = vcombine.high %v6613_v41, %v6613_v41 }
  0x5b   :  { %3335 = vmatpush1.bf16.msra.mxu0 %v5321_v45  ;;  %v5397_v45 = vld [vmem:[%s8097_s1 + $0xaa0] ss:$16 sps:$4 sm:$0xff]  }
  0x5c   :  { %3376 = vmatpush1.bf16.msra.mxu1 %v5324_v46  ;;  %3336 = vmatprep.subr.bf16.mxu0 %v5329_v47  ;;  %v5402_v46 = vld [vmem:[%s8097_s1 + $0x884] ss:$16 sps:$4 sm:$0xff]  }
  0x5d   :  { %3377 = vmatprep.subr.bf16.mxu1 %v5332_v48  ;;  %v5405_v47 = vld [vmem:[%s8097_s1 + $0xa84] ss:$16 sps:$4 sm:$0xff]   ;;  %v5400_v48 = vld [vmem:[%s8097_s1 + $0x880] ss:$16 sps:$4 sm:$0xff]  }
  0x5f   :  { %3337 = vmatpush1.bf16.msra.mxu0 %v5327_v50  ;;  %v5403_v50 = vld [vmem:[%s8097_s1 + $0xa80] ss:$16 sps:$4 sm:$0xff]  }
  0x60   :  { %3378 = vmatpush1.bf16.msra.mxu1 %v5330_v51  ;;  %3338 = vmatprep.subr.bf16.mxu0 %v5335_v52  ;;  %v5408_v51 = vld [vmem:[%s8097_s1 + $0x864] ss:$16 sps:$4 sm:$0xff]  }
  0x61   :  { %3379 = vmatprep.subr.bf16.mxu1 %v5338_v53  ;;  %v5411_v52 = vld [vmem:[%s8097_s1 + $0xa64] ss:$16 sps:$4 sm:$0xff]   ;;  %v5406_v53 = vld [vmem:[%s8097_s1 + $0x860] ss:$16 sps:$4 sm:$0xff]  }
  0x63   :  { %3339 = vmatpush2.bf16.msra.mxu0 %v5333_v54  ;;  %v5409_v54 = vld [vmem:[%s8097_s1 + $0xa60] ss:$16 sps:$4 sm:$0xff]  }
  0x64   :  { %3380 = vmatpush2.bf16.msra.mxu1 %v5336_v55  ;;  %3340 = vmatprep.subr.bf16.mxu0 %v5341_v56  ;;  %v5414_v55 = vld [vmem:[%s8097_s1 + $0x844] ss:$16 sps:$4 sm:$0xff]  }
  0x65   :  { %3381 = vmatprep.subr.bf16.mxu1 %v5344_v57  ;;  %v5417_v56 = vld [vmem:[%s8097_s1 + $0xa44] ss:$16 sps:$4 sm:$0xff]   ;;  %v5412_v57 = vld [vmem:[%s8097_s1 + $0x840] ss:$16 sps:$4 sm:$0xff]  }
  0x67   :  { %3341 = vmatpush2.bf16.msra.mxu0 %v5339_v58  ;;  %v5415_v58 = vld [vmem:[%s8097_s1 + $0xa40] ss:$16 sps:$4 sm:$0xff]  }
  0x68   :  { %3382 = vmatpush2.bf16.msra.mxu1 %v5342_v59  ;;  %3342 = vmatprep.subr.bf16.mxu0 %v5347_v61  ;;  %v5420_v59 = vld [vmem:[%s8097_s1 + $0x824] ss:$16 sps:$4 sm:$0xff]  }
  0x69   :  { %3383 = vmatprep.subr.bf16.mxu1 %v5350_v62  ;;  %v5423_v61 = vld [vmem:[%s8097_s1 + $0xa24] ss:$16 sps:$4 sm:$0xff]   ;;  %v5418_v62 = vld [vmem:[%s8097_s1 + $0x820] ss:$16 sps:$4 sm:$0xff]  }
  0x6b   :  { %3343 = vmatpush2.bf16.msra.mxu0 %v5345_v63  ;;  %v5421_v63 = vld [vmem:[%s8097_s1 + $0xa20] ss:$16 sps:$4 sm:$0xff]  }
  0x6c   :  { %3384 = vmatpush2.bf16.msra.mxu1 %v5348_v1  ;;  %3344 = vmatprep.subr.bf16.mxu0 %v5353_v2  ;;  %v5426_v1 = vld [vmem:[%s8097_s1 + $0x804] ss:$16 sps:$4 sm:$0xff]  }
  0x6d   :  { %3385 = vmatprep.subr.bf16.mxu1 %v5356_v3  ;;  %v5429_v2 = vld [vmem:[%s8097_s1 + $0xa04] ss:$16 sps:$4 sm:$0xff]   ;;  %v5424_v3 = vld [vmem:[%s8097_s1 + $0x800] ss:$16 sps:$4 sm:$0xff]  }
  0x6f   :  { %3345 = vmatpush2.bf16.msra.mxu0 %v5351_v4  ;;  %v5427_v4 = vld [vmem:[%s8097_s1 + $0xa00] ss:$16 sps:$4 sm:$0xff]  }
  0x70   :  { %3386 = vmatpush2.bf16.msra.mxu1 %v5354_v5  ;;  %3346 = vmatprep.subr.bf16.mxu0 %v5359_v7  ;;  %v5432_v5 = vld [vmem:[%s8097_s1 + $0x9e4] ss:$16 sps:$4 sm:$0xff]  }
  0x71   :  { %3387 = vmatprep.subr.bf16.mxu1 %v5362_v8  ;;  %v5435_v7 = vld [vmem:[%s8097_s1 + $0xbe4] ss:$16 sps:$4 sm:$0xff]   ;;  %v5430_v8 = vld [vmem:[%s8097_s1 + $0x9e0] ss:$16 sps:$4 sm:$0xff]  }
  0x73   :  { %3347 = vmatpush2.bf16.msra.mxu0 %v5357_v9  ;;  %v5433_v9 = vld [vmem:[%s8097_s1 + $0xbe0] ss:$16 sps:$4 sm:$0xff]  }
  0x74   :  { %3388 = vmatpush2.bf16.msra.mxu1 %v5360_v10  ;;  %3348 = vmatprep.subr.bf16.mxu0 %v5365_v11  ;;  %v5438_v10 = vld [vmem:[%s8097_s1 + $0x9c4] ss:$16 sps:$4 sm:$0xff]  }
  0x75   :  { %3389 = vmatprep.subr.bf16.mxu1 %v5368_v12  ;;  %v5441_v11 = vld [vmem:[%s8097_s1 + $0xbc4] ss:$16 sps:$4 sm:$0xff]   ;;  %v5436_v12 = vld [vmem:[%s8097_s1 + $0x9c0] ss:$16 sps:$4 sm:$0xff]  }
  0x77   :  { %3349 = vmatpush2.bf16.msra.mxu0 %v5363_v14  ;;  %v5439_v14 = vld [vmem:[%s8097_s1 + $0xbc0] ss:$16 sps:$4 sm:$0xff]  }
  0x78   :  { %3390 = vmatpush2.bf16.msra.mxu1 %v5366_v15  ;;  %3350 = vmatprep.subr.bf16.mxu0 %v5371_v16  ;;  %v5444_v15 = vld [vmem:[%s8097_s1 + $0x9a4] ss:$16 sps:$4 sm:$0xff]  }
  0x79   :  { %3391 = vmatprep.subr.bf16.mxu1 %v5374_v19  ;;  %v5447_v16 = vld [vmem:[%s8097_s1 + $0xba4] ss:$16 sps:$4 sm:$0xff]   ;;  %v5442_v19 = vld [vmem:[%s8097_s1 + $0x9a0] ss:$16 sps:$4 sm:$0xff]  }
  0x7b   :  { %3351 = vmatpush2.bf16.msra.mxu0 %v5369_v20  ;;  %v5445_v20 = vld [vmem:[%s8097_s1 + $0xba0] ss:$16 sps:$4 sm:$0xff]  }
  0x7c   :  { %3392 = vmatpush2.bf16.msra.mxu1 %v5372_v21  ;;  %3352 = vmatprep.subr.bf16.mxu0 %v5377_v22  ;;  %v5450_v21 = vld [vmem:[%s8097_s1 + $0x984] ss:$16 sps:$4 sm:$0xff]  }
  0x7d   :  { %3393 = vmatprep.subr.bf16.mxu1 %v5380_v24  ;;  %v5453_v22 = vld [vmem:[%s8097_s1 + $0xb84] ss:$16 sps:$4 sm:$0xff]   ;;  %v5448_v24 = vld [vmem:[%s8097_s1 + $0x980] ss:$16 sps:$4 sm:$0xff]  }
  0x7f   :  { %3353 = vmatpush2.bf16.msra.mxu0 %v5375_v25  ;;  %v5451_v25 = vld [vmem:[%s8097_s1 + $0xb80] ss:$16 sps:$4 sm:$0xff]  }
  0x80   :  { %3394 = vmatpush2.bf16.msra.mxu1 %v5378_v27  ;;  %3404 = vmatprep.subr.bf16.mxu0 %v5384_v28  ;;  %v5456_v27 = vld [vmem:[%s8097_s1 + $0x964] ss:$16 sps:$4 sm:$0xff]  }
  0x81   :  { %3445 = vmatprep.subr.bf16.mxu1 %v5387_v29  ;;  %v5459_v28 = vld [vmem:[%s8097_s1 + $0xb64] ss:$16 sps:$4 sm:$0xff]   ;;  %v5454_v29 = vld [vmem:[%s8097_s1 + $0x960] ss:$16 sps:$4 sm:$0xff]  }
  0x82   :  { %3355 = vmatmul.mubr.bf16.vlgmr.msra.gmra.mxu0 %v6560_v26 }
  0x83   :  { %3396 = vmatmul.mubr.bf16.vlgmr.msra.gmra.mxu1 %v6573_v6  ;;  %3405 = vmatpush1.bf16.msra.mxu0 %v5382_v30  ;;  %v5457_v30 = vld [vmem:[%s8097_s1 + $0xb60] ss:$16 sps:$4 sm:$0xff]  }
  0x84   :  { %3446 = vmatpush1.bf16.msra.mxu1 %v5385_v31  ;;  %3406 = vmatprep.subr.bf16.mxu0 %v5390_v33  ;;  %v5462_v31 = vld [vmem:[%s8097_s1 + $0x944] ss:$16 sps:$4 sm:$0xff]  }
  0x85   :  { %3447 = vmatprep.subr.bf16.mxu1 %v5393_v34  ;;  %3436 = vmatprep.mubr.bf16.mxu0 %v6613_v41  ;;  %v5465_v33 = vld [vmem:[%s8097_s1 + $0xb44] ss:$16 sps:$4 sm:$0xff]   ;;  %v615_v34 = vcombine.high %v6584_v32, %v6584_v32 }
  0x86   :  { %3477 = vmatprep.mubr.bf16.mxu1 %v6618_v43  ;;  %v5471_v32 = vld [vmem:[%s8097_s1 + $0xb24] ss:$16 sps:$4 sm:$0xff]  }
  0x87   :  { %3407 = vmatpush1.bf16.msra.mxu0 %v5388_v37  ;;  %v5463_v37 = vld [vmem:[%s8097_s1 + $0xb40] ss:$16 sps:$4 sm:$0xff]  }
  0x88   :  { %3448 = vmatpush1.bf16.msra.mxu1 %v5391_v38  ;;  %3408 = vmatprep.subr.bf16.mxu0 %v5396_v39  ;;  %v5468_v38 = vld [vmem:[%s8097_s1 + $0x924] ss:$16 sps:$4 sm:$0xff]   ;;  %v6768_v39 = vrot.slane %v615_v34, %v6271_v49  ;;  %v5529_v34 = vld [vmem:[%s8097_s1 + $0xfe0] ss:$16 sps:$4 sm:$0xff]  }
  0x89   :  { %3449 = vmatprep.subr.bf16.mxu1 %v5399_v40  ;;  %v5466_v40 = vld [vmem:[%s8097_s1 + $0x920] ss:$16 sps:$4 sm:$0xff]  }
  0x8b   :  { %3409 = vmatpush1.bf16.msra.mxu0 %v5394_v44  ;;  %v5469_v44 = vld [vmem:[%s8097_s1 + $0xb20] ss:$16 sps:$4 sm:$0xff]  }
  0x8c   :  { %3450 = vmatpush1.bf16.msra.mxu1 %v5397_v45  ;;  %3410 = vmatprep.subr.bf16.mxu0 %v5402_v46  ;;  %v5474_v45 = vld [vmem:[%s8097_s1 + $0x904] ss:$16 sps:$4 sm:$0xff]  }
  0x8d   :  { %3451 = vmatprep.subr.bf16.mxu1 %v5405_v47  ;;  %v5477_v46 = vld [vmem:[%s8097_s1 + $0xb04] ss:$16 sps:$4 sm:$0xff]   ;;  %v631_v47 = vcombine.high %v6768_v39, %v6768_v39 }
  0x8f   :  { %3411 = vmatpush1.bf16.msra.mxu0 %v5400_v48  ;;  %v5472_v48 = vld [vmem:[%s8097_s1 + $0x900] ss:$16 sps:$4 sm:$0xff]  }
  0x90   :  { %3452 = vmatpush1.bf16.msra.mxu1 %v5403_v50  ;;  %3412 = vmatprep.subr.bf16.mxu0 %v5408_v51  ;;  %v6789_v50 = vrot.slane %v6594_v35, %v6271_v49  ;;  %v5475_v51 = vld [vmem:[%s8097_s1 + $0xb00] ss:$16 sps:$4 sm:$0xff]  }
  0x91   :  { %3453 = vmatprep.subr.bf16.mxu1 %v5411_v52  ;;  %v5480_v52 = vld [vmem:[%s8097_s1 + $0xce4] ss:$16 sps:$4 sm:$0xff]  }
  0x92   :  { %v6805_v35 = vcombine.high %v6789_v50, %v6789_v50 }
  0x93   :  { %3413 = vmatpush1.bf16.msra.mxu0 %v5406_v53  ;;  %v5483_v53 = vld [vmem:[%s8097_s1 + $0xee4] ss:$16 sps:$4 sm:$0xff]  }
  0x94   :  { %3454 = vmatpush1.bf16.msra.mxu1 %v5409_v54  ;;  %3414 = vmatprep.subr.bf16.mxu0 %v5414_v55  ;;  %v6801_v54 = vrot.slane %v631_v47, %v6271_v49  ;;  %v5478_v55 = vld [vmem:[%s8097_s1 + $0xce0] ss:$16 sps:$4 sm:$0xff]   ;;  %v5546_v47 = vld [vmem:[%s8097_s1 + $0xd84] ss:$16 sps:$4 sm:$0xff]  }
  0x95   :  { %3455 = vmatprep.subr.bf16.mxu1 %v5417_v56  ;;  %v5481_v56 = vld [vmem:[%s8097_s1 + $0xee0] ss:$16 sps:$4 sm:$0xff]  }
  0x97   :  { %3415 = vmatpush1.bf16.msra.mxu0 %v5412_v57  ;;  %v5486_v57 = vld [vmem:[%s8097_s1 + $0xcc4] ss:$16 sps:$4 sm:$0xff]  }
  0x98   :  { %3456 = vmatpush1.bf16.msra.mxu1 %v5415_v58  ;;  %3416 = vmatprep.subr.bf16.mxu0 %v5420_v59  ;;  %v5489_v58 = vld [vmem:[%s8097_s1 + $0xec4] ss:$16 sps:$4 sm:$0xff]   ;;  %v6821_v59 = vcombine.high %v6801_v54, %v6801_v54 }
  0x99   :  { %3457 = vmatprep.subr.bf16.mxu1 %v5423_v61  ;;  %v5484_v61 = vld [vmem:[%s8097_s1 + $0xcc0] ss:$16 sps:$4 sm:$0xff]  }
  0x9b   :  { %3417 = vmatpush1.bf16.msra.mxu0 %v5418_v62  ;;  %v5487_v62 = vld [vmem:[%s8097_s1 + $0xec0] ss:$16 sps:$4 sm:$0xff]  }
  0x9c   :  { %3458 = vmatpush1.bf16.msra.mxu1 %v5421_v63  ;;  %3418 = vmatprep.subr.bf16.mxu0 %v5426_v1  ;;  %v5492_v63 = vld [vmem:[%s8097_s1 + $0xca4] ss:$16 sps:$4 sm:$0xff]  }
  0x9d   :  { %3459 = vmatprep.subr.bf16.mxu1 %v5429_v2  ;;  %v5495_v1 = vld [vmem:[%s8097_s1 + $0xea4] ss:$16 sps:$4 sm:$0xff]   ;;  %v5490_v2 = vld [vmem:[%s8097_s1 + $0xca0] ss:$16 sps:$4 sm:$0xff]  }
  0x9f   :  { %3419 = vmatpush1.bf16.msra.mxu0 %v5424_v3  ;;  %v5493_v3 = vld [vmem:[%s8097_s1 + $0xea0] ss:$16 sps:$4 sm:$0xff]  }
  0xa0   :  { %3460 = vmatpush1.bf16.msra.mxu1 %v5427_v4  ;;  %3420 = vmatprep.subr.bf16.mxu0 %v5432_v5  ;;  %v5498_v4 = vld [vmem:[%s8097_s1 + $0xc84] ss:$16 sps:$4 sm:$0xff]  }
  0xa1   :  { %3461 = vmatprep.subr.bf16.mxu1 %v5435_v7  ;;  %v5501_v5 = vld [vmem:[%s8097_s1 + $0xe84] ss:$16 sps:$4 sm:$0xff]   ;;  %v5496_v7 = vld [vmem:[%s8097_s1 + $0xc80] ss:$16 sps:$4 sm:$0xff]  }
  0xa3   :  { %3421 = vmatpush2.bf16.msra.mxu0 %v5430_v8  ;;  %v5499_v8 = vld [vmem:[%s8097_s1 + $0xe80] ss:$16 sps:$4 sm:$0xff]  }
  0xa4   :  { %3462 = vmatpush2.bf16.msra.mxu1 %v5433_v9  ;;  %3422 = vmatprep.subr.bf16.mxu0 %v5438_v10  ;;  %v5504_v9 = vld [vmem:[%s8097_s1 + $0xc64] ss:$16 sps:$4 sm:$0xff]  }
  0xa5   :  { %3463 = vmatprep.subr.bf16.mxu1 %v5441_v11  ;;  %v5507_v10 = vld [vmem:[%s8097_s1 + $0xe64] ss:$16 sps:$4 sm:$0xff]   ;;  %v5502_v11 = vld [vmem:[%s8097_s1 + $0xc60] ss:$16 sps:$4 sm:$0xff]  }
  0xa7   :  { %3423 = vmatpush2.bf16.msra.mxu0 %v5436_v12  ;;  %v5505_v12 = vld [vmem:[%s8097_s1 + $0xe60] ss:$16 sps:$4 sm:$0xff]  }
  0xa8   :  { %3464 = vmatpush2.bf16.msra.mxu1 %v5439_v14  ;;  %3424 = vmatprep.subr.bf16.mxu0 %v5444_v15  ;;  %v5510_v14 = vld [vmem:[%s8097_s1 + $0xc44] ss:$16 sps:$4 sm:$0xff]  }
  0xa9   :  { %3465 = vmatprep.subr.bf16.mxu1 %v5447_v16  ;;  %v5513_v15 = vld [vmem:[%s8097_s1 + $0xe44] ss:$16 sps:$4 sm:$0xff]   ;;  %v5508_v16 = vld [vmem:[%s8097_s1 + $0xc40] ss:$16 sps:$4 sm:$0xff]  }
  0xab   :  { %3425 = vmatpush2.bf16.msra.mxu0 %v5442_v19  ;;  %v5511_v19 = vld [vmem:[%s8097_s1 + $0xe40] ss:$16 sps:$4 sm:$0xff]  }
  0xac   :  { %3466 = vmatpush2.bf16.msra.mxu1 %v5445_v20  ;;  %3426 = vmatprep.subr.bf16.mxu0 %v5450_v21  ;;  %v5516_v20 = vld [vmem:[%s8097_s1 + $0xc24] ss:$16 sps:$4 sm:$0xff]  }
  0xad   :  { %3467 = vmatprep.subr.bf16.mxu1 %v5453_v22  ;;  %v5519_v21 = vld [vmem:[%s8097_s1 + $0xe24] ss:$16 sps:$4 sm:$0xff]   ;;  %v5514_v22 = vld [vmem:[%s8097_s1 + $0xc20] ss:$16 sps:$4 sm:$0xff]  }
  0xaf   :  { %3427 = vmatpush2.bf16.msra.mxu0 %v5448_v24  ;;  %v5517_v24 = vld [vmem:[%s8097_s1 + $0xe20] ss:$16 sps:$4 sm:$0xff]  }
  0xb0   :  { %3468 = vmatpush2.bf16.msra.mxu1 %v5451_v25  ;;  %3428 = vmatprep.subr.bf16.mxu0 %v5456_v27  ;;  %v5522_v25 = vld [vmem:[%s8097_s1 + $0xc04] ss:$16 sps:$4 sm:$0xff]  }
  0xb1   :  { %3469 = vmatprep.subr.bf16.mxu1 %v5459_v28  ;;  %v5525_v27 = vld [vmem:[%s8097_s1 + $0xe04] ss:$16 sps:$4 sm:$0xff]   ;;  %v5520_v28 = vld [vmem:[%s8097_s1 + $0xc00] ss:$16 sps:$4 sm:$0xff]  }
  0xb3   :  { %3429 = vmatpush2.bf16.msra.mxu0 %v5454_v29  ;;  %v5523_v29 = vld [vmem:[%s8097_s1 + $0xe00] ss:$16 sps:$4 sm:$0xff]  }
  0xb4   :  { %3470 = vmatpush2.bf16.msra.mxu1 %v5457_v30  ;;  %3430 = vmatprep.subr.bf16.mxu0 %v5462_v31  ;;  %v5528_v30 = vld [vmem:[%s8097_s1 + $0xde4] ss:$16 sps:$4 sm:$0xff]  }
  0xb5   :  { %3471 = vmatprep.subr.bf16.mxu1 %v5465_v33  ;;  %v5531_v31 = vld [vmem:[%s8097_s1 + $0xfe4] ss:$16 sps:$4 sm:$0xff]   ;;  %v5526_v33 = vld [vmem:[%s8097_s1 + $0xde0] ss:$16 sps:$4 sm:$0xff]  }
  0xb7   :  { %3431 = vmatpush2.bf16.msra.mxu0 %v5460_v36  ;;  %v5534_v36 = vld [vmem:[%s8097_s1 + $0xdc4] ss:$16 sps:$4 sm:$0xff]  }
  0xb8   :  { %3472 = vmatpush2.bf16.msra.mxu1 %v5463_v37  ;;  %3432 = vmatprep.subr.bf16.mxu0 %v5468_v38  ;;  %v5537_v37 = vld [vmem:[%s8097_s1 + $0xfc4] ss:$16 sps:$4 sm:$0xff]   ;;  %v5532_v38 = vld [vmem:[%s8097_s1 + $0xdc0] ss:$16 sps:$4 sm:$0xff]  }
  0xb9   :  { %3473 = vmatprep.subr.bf16.mxu1 %v5471_v32  ;;  %v5535_v32 = vld [vmem:[%s8097_s1 + $0xfc0] ss:$16 sps:$4 sm:$0xff]  }
  0xbb   :  { %3433 = vmatpush2.bf16.msra.mxu0 %v5466_v40  ;;  %v5540_v40 = vld [vmem:[%s8097_s1 + $0xda4] ss:$16 sps:$4 sm:$0xff]  }
  0xbc   :  { %3474 = vmatpush2.bf16.msra.mxu1 %v5469_v44  ;;  %3434 = vmatprep.subr.bf16.mxu0 %v5474_v45  ;;  %v5543_v44 = vld [vmem:[%s8097_s1 + $0xfa4] ss:$16 sps:$4 sm:$0xff]   ;;  %v5538_v45 = vld [vmem:[%s8097_s1 + $0xda0] ss:$16 sps:$4 sm:$0xff]  }
  0xbd   :  { %3475 = vmatprep.subr.bf16.mxu1 %v5477_v46  ;;  %v5541_v46 = vld [vmem:[%s8097_s1 + $0xfa0] ss:$16 sps:$4 sm:$0xff]  }
  0xbf   :  { %3435 = vmatpush2.bf16.msra.mxu0 %v5472_v48  ;;  %v5549_v48 = vld [vmem:[%s8097_s1 + $0xf84] ss:$16 sps:$4 sm:$0xff]  }
  0xc0   :  { %3476 = vmatpush2.bf16.msra.mxu1 %v5475_v51  ;;  %3486 = vmatprep.subr.bf16.mxu0 %v5480_v52  ;;  %v5544_v51 = vld [vmem:[%s8097_s1 + $0xd80] ss:$16 sps:$4 sm:$0xff]  }
  0xc1   :  { %3527 = vmatprep.subr.bf16.mxu1 %v5483_v53  ;;  %v5547_v52 = vld [vmem:[%s8097_s1 + $0xf80] ss:$16 sps:$4 sm:$0xff]   ;;  %v5552_v53 = vld [vmem:[%s8097_s1 + $0xd64] ss:$16 sps:$4 sm:$0xff]  }
  0xc2   :  { %3437 = vmatmul.mubr.bf16.vlgmr.msra.gmra.mxu0 %v6789_v50 }
  0xc3   :  { %3478 = vmatmul.mubr.bf16.vlgmr.msra.gmra.mxu1 %v6805_v35  ;;  %3487 = vmatpush1.bf16.msra.mxu0 %v5478_v55  ;;  %v5555_v55 = vld [vmem:[%s8097_s1 + $0xf64] ss:$16 sps:$4 sm:$0xff]  }
  0xc4   :  { %3528 = vmatpush1.bf16.msra.mxu1 %v5481_v56  ;;  %3488 = vmatprep.subr.bf16.mxu0 %v5486_v57  ;;  %v5550_v56 = vld [vmem:[%s8097_s1 + $0xd60] ss:$16 sps:$4 sm:$0xff]  }
  0xc5   :  { %3529 = vmatprep.subr.bf16.mxu1 %v5489_v58  ;;  %3518 = vmatprep.mubr.bf16.mxu0 %v6801_v54  ;;  %v5553_v57 = vld [vmem:[%s8097_s1 + $0xf60] ss:$16 sps:$4 sm:$0xff]   ;;  %v5558_v58 = vld [vmem:[%s8097_s1 + $0xd44] ss:$16 sps:$4 sm:$0xff]  }
  0xc6   :  { %3559 = vmatprep.mubr.bf16.mxu1 %v6821_v59 }
  0xc7   :  { %3489 = vmatpush1.bf16.msra.mxu0 %v5484_v61  ;;  %v5561_v61 = vld [vmem:[%s8097_s1 + $0xf44] ss:$16 sps:$4 sm:$0xff]  }
  0xc8   :  { %3530 = vmatpush1.bf16.msra.mxu1 %v5487_v62  ;;  %3490 = vmatprep.subr.bf16.mxu0 %v5492_v63  ;;  %v5556_v62 = vld [vmem:[%s8097_s1 + $0xd40] ss:$16 sps:$4 sm:$0xff]  }
  0xc9   :  { %3531 = vmatprep.subr.bf16.mxu1 %v5495_v1  ;;  %v5559_v63 = vld [vmem:[%s8097_s1 + $0xf40] ss:$16 sps:$4 sm:$0xff]   ;;  %v5564_v1 = vld [vmem:[%s8097_s1 + $0xd24] ss:$16 sps:$4 sm:$0xff]  }
  0xcb   :  { %3491 = vmatpush1.bf16.msra.mxu0 %v5490_v2  ;;  %v5567_v2 = vld [vmem:[%s8097_s1 + $0xf24] ss:$16 sps:$4 sm:$0xff]  }
  0xcc   :  { %3532 = vmatpush1.bf16.msra.mxu1 %v5493_v3  ;;  %3492 = vmatprep.subr.bf16.mxu0 %v5498_v4  ;;  %v5562_v3 = vld [vmem:[%s8097_s1 + $0xd20] ss:$16 sps:$4 sm:$0xff]  }
  0xcd   :  { %3533 = vmatprep.subr.bf16.mxu1 %v5501_v5  ;;  %v5565_v4 = vld [vmem:[%s8097_s1 + $0xf20] ss:$16 sps:$4 sm:$0xff]   ;;  %v5570_v5 = vld [vmem:[%s8097_s1 + $0xd04] ss:$16 sps:$4 sm:$0xff]  }
  0xcf   :  { %3493 = vmatpush1.bf16.msra.mxu0 %v5496_v7  ;;  %v5573_v7 = vld [vmem:[%s8097_s1 + $0xf04] ss:$16 sps:$4 sm:$0xff]  }
  0xd0   :  { %3534 = vmatpush1.bf16.msra.mxu1 %v5499_v8  ;;  %3494 = vmatprep.subr.bf16.mxu0 %v5504_v9  ;;  %v5568_v8 = vld [vmem:[%s8097_s1 + $0xd00] ss:$16 sps:$4 sm:$0xff]  }
  0xd1   :  { %3535 = vmatprep.subr.bf16.mxu1 %v5507_v10  ;;  %v5571_v9 = vld [vmem:[%s8097_s1 + $0xf00] ss:$16 sps:$4 sm:$0xff]   ;;  %v7003_v10 = vrot.slane %v6768_v39, %v6271_v49  ;;  %v550_v49 = vsub.s32 1, %v6253_v42 }
  0xd3   :  { %3495 = vmatpush1.bf16.msra.mxu0 %v5502_v11  ;;  %v542_v11 = vld [vmem:[%s8098_s2] sm:$0xf]  ;;  %v7018_v39 = vcombine.high %v7003_v10, %v7003_v10 }
  0xd4   :  { %3536 = vmatpush1.bf16.msra.mxu1 %v5505_v12  ;;  %3496 = vmatprep.subr.bf16.mxu0 %v5510_v14  ;;  %v546_v12 = vsub.s32 0, %v6253_v42  ;;  %v5577_v14 = vld [vmem:[%s8097_s1 + $0xec] ss:$16 sps:$4 sm:$0xff]  }
  0xd5   :  { %3537 = vmatprep.subr.bf16.mxu1 %v5513_v15  ;;  %v5580_v15 = vld [vmem:[%s8097_s1 + $0x2ec] ss:$16 sps:$4 sm:$0xff]  }
  0xd7   :  { %3497 = vmatpush1.bf16.msra.mxu0 %v5508_v16  ;;  %v5575_v16 = vld [vmem:[%s8097_s1 + $0xe8] ss:$16 sps:$4 sm:$0xff]  }
  0xd8   :  { %3538 = vmatpush1.bf16.msra.mxu1 %v5511_v19  ;;  %3498 = vmatprep.subr.bf16.mxu0 %v5516_v20  ;;  %v547_v19 = vrot.slane %v542_v11, %v546_v12  ;;  %v5578_v20 = vld [vmem:[%s8097_s1 + $0x2e8] ss:$16 sps:$4 sm:$0xff]  }
  0xd9   :  { %3539 = vmatprep.subr.bf16.mxu1 %v5519_v21  ;;  %v5583_v21 = vld [vmem:[%s8097_s1 + $0xcc] ss:$16 sps:$4 sm:$0xff]  }
  0xdb   :  { %3499 = vmatpush1.bf16.msra.mxu0 %v5514_v22  ;;  %v5586_v22 = vld [vmem:[%s8097_s1 + $0x2cc] ss:$16 sps:$4 sm:$0xff]  }
  0xdc   :  { %3540 = vmatpush1.bf16.msra.mxu1 %v5517_v24  ;;  %3500 = vmatprep.subr.bf16.mxu0 %v5522_v25  ;;  %v551_v24 = vrot.slane %v542_v11, %v550_v49  ;;  %v5625_v11 = vld [vmem:[%s8097_s1 + $0x1ec] ss:$16 sps:$4 sm:$0xff]  }
  0xdd   :  { %3541 = vmatprep.subr.bf16.mxu1 %v5525_v27 }
  0xdf   :  { %3501 = vmatpush1.bf16.msra.mxu0 %v5520_v28  ;;  %v5581_v28 = vld [vmem:[%s8097_s1 + $0xc8] ss:$16 sps:$4 sm:$0xff]  }
  0xe0   :  { %3542 = vmatpush1.bf16.msra.mxu1 %v5523_v29  ;;  %3502 = vmatprep.subr.bf16.mxu0 %v5528_v30  ;;  %v5584_v29 = vld [vmem:[%s8097_s1 + $0x2c8] ss:$16 sps:$4 sm:$0xff]  }
  0xe1   :  { %3543 = vmatprep.subr.bf16.mxu1 %v5531_v31 }
  0xe3   :  { %3503 = vmatpush2.bf16.msra.mxu0 %v5526_v33 }
  0xe4   :  { %3544 = vmatpush2.bf16.msra.mxu1 %v5529_v34  ;;  %3504 = vmatprep.subr.bf16.mxu0 %v5534_v36  ;;  %v5589_v34 = vld [vmem:[%s8097_s1 + $0xac] ss:$16 sps:$4 sm:$0xff]  }
  0xe5   :  { %3545 = vmatprep.subr.bf16.mxu1 %v5537_v37  ;;  %v5592_v36 = vld [vmem:[%s8097_s1 + $0x2ac] ss:$16 sps:$4 sm:$0xff]  }
  0xe7   :  { %3505 = vmatpush2.bf16.msra.mxu0 %v5532_v38 }
  0xe8   :  { %3546 = vmatpush2.bf16.msra.mxu1 %v5535_v32  ;;  %3506 = vmatprep.subr.bf16.mxu0 %v5540_v40  ;;  %v5587_v32 = vld [vmem:[%s8097_s1 + $0xa8] ss:$16 sps:$4 sm:$0xff]  }
  0xe9   :  { %3547 = vmatprep.subr.bf16.mxu1 %v5543_v44  ;;  %v5590_v40 = vld [vmem:[%s8097_s1 + $0x2a8] ss:$16 sps:$4 sm:$0xff]  }
  0xeb   :  { %3507 = vmatpush2.bf16.msra.mxu0 %v5538_v45 }
  0xec   :  { %3548 = vmatpush2.bf16.msra.mxu1 %v5541_v46  ;;  %3508 = vmatprep.subr.bf16.mxu0 %v5546_v47 }
  0xed   :  { %3549 = vmatprep.subr.bf16.mxu1 %v5549_v48 }
  0xef   :  { %3509 = vmatpush2.bf16.msra.mxu0 %v5544_v51  ;;  %v5595_v51 = vld [vmem:[%s8097_s1 + $0x8c] ss:$16 sps:$4 sm:$0xff]  }
  0xf0   :  { %3550 = vmatpush2.bf16.msra.mxu1 %v5547_v52  ;;  %3510 = vmatprep.subr.bf16.mxu0 %v5552_v53  ;;  %v5596_v52 = vld [vmem:[%s8097_s1 + $0x288] ss:$16 sps:$4 sm:$0xff]   ;;  %v5601_v53 = vld [vmem:[%s8097_s1 + $0x6c] ss:$16 sps:$4 sm:$0xff]  }
  0xf1   :  { %3551 = vmatprep.subr.bf16.mxu1 %v5555_v55  ;;  %v5604_v55 = vld [vmem:[%s8097_s1 + $0x26c] ss:$16 sps:$4 sm:$0xff]  }
  0xf3   :  { %3511 = vmatpush2.bf16.msra.mxu0 %v5550_v56  ;;  %v5599_v56 = vld [vmem:[%s8097_s1 + $0x68] ss:$16 sps:$4 sm:$0xff]  }
  0xf4   :  { %3552 = vmatpush2.bf16.msra.mxu1 %v5553_v57  ;;  %3512 = vmatprep.subr.bf16.mxu0 %v5558_v58  ;;  %v5602_v57 = vld [vmem:[%s8097_s1 + $0x268] ss:$16 sps:$4 sm:$0xff]   ;;  %v5607_v58 = vld [vmem:[%s8097_s1 + $0x4c] ss:$16 sps:$4 sm:$0xff]  }
  0xf5   :  { %3553 = vmatprep.subr.bf16.mxu1 %v5561_v61  ;;  %v5610_v61 = vld [vmem:[%s8097_s1 + $0x24c] ss:$16 sps:$4 sm:$0xff]  }
  0xf7   :  { %3513 = vmatpush2.bf16.msra.mxu0 %v5556_v62  ;;  %v5605_v62 = vld [vmem:[%s8097_s1 + $0x48] ss:$16 sps:$4 sm:$0xff]  }
  0xf8   :  { %3554 = vmatpush2.bf16.msra.mxu1 %v5559_v63  ;;  %3514 = vmatprep.subr.bf16.mxu0 %v5564_v1  ;;  %v5608_v63 = vld [vmem:[%s8097_s1 + $0x248] ss:$16 sps:$4 sm:$0xff]   ;;  %v5613_v1 = vld [vmem:[%s8097_s1 + $0x2c] ss:$16 sps:$4 sm:$0xff]  }
  0xf9   :  { %3555 = vmatprep.subr.bf16.mxu1 %v5567_v2  ;;  %v5616_v2 = vld [vmem:[%s8097_s1 + $0x22c] ss:$16 sps:$4 sm:$0xff]  }
  0xfb   :  { %3515 = vmatpush2.bf16.msra.mxu0 %v5562_v3  ;;  %v5611_v3 = vld [vmem:[%s8097_s1 + $0x28] ss:$16 sps:$4 sm:$0xff]  }
  0xfc   :  { %3556 = vmatpush2.bf16.msra.mxu1 %v5565_v4  ;;  %3516 = vmatprep.subr.bf16.mxu0 %v5570_v5  ;;  %v5614_v4 = vld [vmem:[%s8097_s1 + $0x228] ss:$16 sps:$4 sm:$0xff]   ;;  %v5619_v5 = vld [vmem:[%s8097_s1 + $0xc] ss:$16 sps:$4 sm:$0xff]  }
  0xfd   :  { %3557 = vmatprep.subr.bf16.mxu1 %v5573_v7  ;;  %v5622_v7 = vld [vmem:[%s8097_s1 + $0x20c] ss:$16 sps:$4 sm:$0xff]  }
  0xff   :  { %3517 = vmatpush2.bf16.msra.mxu0 %v5568_v8  ;;  %v5617_v8 = vld [vmem:[%s8097_s1 + $0x8] ss:$16 sps:$4 sm:$0xff]  }
 0x100   :  { %3558 = vmatpush2.bf16.msra.mxu1 %v5571_v9  ;;  %3568 = vmatprep.subr.bf16.mxu0 %v5577_v14  ;;  %v5620_v9 = vld [vmem:[%s8097_s1 + $0x208] ss:$16 sps:$4 sm:$0xff]   ;;  %v5628_v14 = vld [vmem:[%s8097_s1 + $0x3ec] ss:$16 sps:$4 sm:$0xff]  }
 0x101   :  { %3609 = vmatprep.subr.bf16.mxu1 %v5580_v15  ;;  %v5623_v15 = vld [vmem:[%s8097_s1 + $0x1e8] ss:$16 sps:$4 sm:$0xff]  }
 0x102   :  { %v3274_v25 = vpop.f32.mrf.mxu0  ;;  %3519 = vmatmul.mubr.bf16.vlgmr.msra.gmra.mxu0 %v7003_v10 }
 0x103   :  { %v3315_v27 = vpop.f32.mrf.mxu1  ;;  %3560 = vmatmul.mubr.bf16.vlgmr.msra.gmra.mxu1 %v7018_v39  ;;  %v3275_v30 = vadd.f32 %v3274_v25, %v547_v19  ;;  %3569 = vmatpush1.bf16.msra.mxu0 %v5575_v16  ;;  %v5626_v16 = vld [vmem:[%s8097_s1 + $0x3e8] ss:$16 sps:$4 sm:$0xff]   ;;  %v5631_v19 = vld [vmem:[%s8097_s1 + $0x1cc] ss:$16 sps:$4 sm:$0xff]  }
 0x104   :  { %3610 = vmatpush1.bf16.msra.mxu1 %v5578_v20  ;;  %v3276_v31 = vpop.f32.mrf.mxu0  ;;  %3570 = vmatprep.subr.bf16.mxu0 %v5583_v21  ;;  %v5634_v20 = vld [vmem:[%s8097_s1 + $0x3cc] ss:$16 sps:$4 sm:$0xff]   ;;  %v5629_v21 = vld [vmem:[%s8097_s1 + $0x1c8] ss:$16 sps:$4 sm:$0xff]  }
 0x105   :  { %v3317_v33 = vpop.f32.mrf.mxu1  ;;  %3611 = vmatprep.subr.bf16.mxu1 %v5586_v22  ;;  %v7050_v37 = vadd.f32 %v3315_v27, %v3275_v30  ;;  %v3277_v38 = vadd.f32 %v3276_v31, %v551_v24  ;;  %3600 = vmatprep.mubr.bf16.mxu0 %v6299_v60  ;;  %v5598_v60 = vld [vmem:[%s8097_s1 + $0x28c] ss:$16 sps:$4 sm:$0xff]   ;;  %v5632_v22 = vld [vmem:[%s8097_s1 + $0x3c8] ss:$16 sps:$4 sm:$0xff]  }
 0x106   :  { %3641 = vmatprep.mubr.bf16.mxu1 %v6312_v0  ;;  %v3278_v44 = vpop.f32.mrf.mxu0  ;;  %v5593_v0 = vld [vmem:[%s8097_s1 + $0x88] ss:$16 sps:$4 sm:$0xff]   ;;  %v5637_v24 = vld [vmem:[%s8097_s1 + $0x1ac] ss:$16 sps:$4 sm:$0xff]  }
 0x107   :  { %v3319_v45 = vpop.f32.mrf.mxu1  ;;  %v7060_v46 = vadd.f32 %v3317_v33, %v3277_v38  ;;  %3571 = vmatpush1.bf16.msra.mxu0 %v5581_v28  ;;  %v5640_v25 = vld [vmem:[%s8097_s1 + $0x3ac] ss:$16 sps:$4 sm:$0xff]   ;;  %v5635_v27 = vld [vmem:[%s8097_s1 + $0x1a8] ss:$16 sps:$4 sm:$0xff]  }
 0x108   :  { %3612 = vmatpush1.bf16.msra.mxu1 %v5584_v29  ;;  %v3279_v47 = vpop.f32.mrf.mxu0  ;;  %3572 = vmatprep.subr.bf16.mxu0 %v5589_v34  ;;  %v5638_v28 = vld [vmem:[%s8097_s1 + $0x3a8] ss:$16 sps:$4 sm:$0xff]   ;;  %v5643_v29 = vld [vmem:[%s8097_s1 + $0x18c] ss:$16 sps:$4 sm:$0xff]  }
 0x109   :  { %v3320_v48 = vpop.f32.mrf.mxu1  ;;  %3613 = vmatprep.subr.bf16.mxu1 %v5592_v36  ;;  %v5646_v30 = vld [vmem:[%s8097_s1 + $0x38c] ss:$16 sps:$4 sm:$0xff]   ;;  %v5641_v31 = vld [vmem:[%s8097_s1 + $0x188] ss:$16 sps:$4 sm:$0xff]  }
 0x10a   :  { %v5644_v33 = vld [vmem:[%s8097_s1 + $0x388] ss:$16 sps:$4 sm:$0xff]   ;;  %v5649_v34 = vld [vmem:[%s8097_s1 + $0x16c] ss:$16 sps:$4 sm:$0xff]  }
 0x10b   :  { %3573 = vmatpush1.bf16.msra.mxu0 %v5587_v32  ;;  %v5652_v36 = vld [vmem:[%s8097_s1 + $0x36c] ss:$16 sps:$4 sm:$0xff]   ;;  %v5647_v38 = vld [vmem:[%s8097_s1 + $0x168] ss:$16 sps:$4 sm:$0xff]  }
 0x10c   :  { %3614 = vmatpush1.bf16.msra.mxu1 %v5590_v40  ;;  %3574 = vmatprep.subr.bf16.mxu0 %v5595_v51  ;;  %v5650_v32 = vld [vmem:[%s8097_s1 + $0x368] ss:$16 sps:$4 sm:$0xff]   ;;  %v5655_v40 = vld [vmem:[%s8097_s1 + $0x14c] ss:$16 sps:$4 sm:$0xff]  }
 0x10d   :  { %3615 = vmatprep.subr.bf16.mxu1 %v5598_v60  ;;  %v5658_v44 = vld [vmem:[%s8097_s1 + $0x34c] ss:$16 sps:$4 sm:$0xff]   ;;  %v5653_v45 = vld [vmem:[%s8097_s1 + $0x148] ss:$16 sps:$4 sm:$0xff]  }
 0x10e   :  { %v5656_v47 = vld [vmem:[%s8097_s1 + $0x348] ss:$16 sps:$4 sm:$0xff]   ;;  %v5661_v48 = vld [vmem:[%s8097_s1 + $0x12c] ss:$16 sps:$4 sm:$0xff]  }
 0x10f   :  { %3575 = vmatpush1.bf16.msra.mxu0 %v5593_v0  ;;  %v5664_v51 = vld [vmem:[%s8097_s1 + $0x32c] ss:$16 sps:$4 sm:$0xff]   ;;  %v5659_v60 = vld [vmem:[%s8097_s1 + $0x128] ss:$16 sps:$4 sm:$0xff]  }
 0x110   :  { %3616 = vmatpush1.bf16.msra.mxu1 %v5596_v52  ;;  %3576 = vmatprep.subr.bf16.mxu0 %v5601_v53  ;;  %v5662_v0 = vld [vmem:[%s8097_s1 + $0x328] ss:$16 sps:$4 sm:$0xff]   ;;  %v5667_v52 = vld [vmem:[%s8097_s1 + $0x10c] ss:$16 sps:$4 sm:$0xff]  }
 0x111   :  { %3617 = vmatprep.subr.bf16.mxu1 %v5604_v55  ;;  %v5670_v53 = vld [vmem:[%s8097_s1 + $0x30c] ss:$16 sps:$4 sm:$0xff]   ;;  %v5665_v55 = vld [vmem:[%s8097_s1 + $0x108] ss:$16 sps:$4 sm:$0xff]  }
 0x113   :  { %3577 = vmatpush1.bf16.msra.mxu0 %v5599_v56  ;;  %v5668_v56 = vld [vmem:[%s8097_s1 + $0x308] ss:$16 sps:$4 sm:$0xff]  }
 0x114   :  { %3618 = vmatpush1.bf16.msra.mxu1 %v5602_v57  ;;  %3578 = vmatprep.subr.bf16.mxu0 %v5607_v58  ;;  %v5673_v57 = vld [vmem:[%s8097_s1 + $0x4ec] ss:$16 sps:$4 sm:$0xff]  }
 0x115   :  { %3619 = vmatprep.subr.bf16.mxu1 %v5610_v61  ;;  %v5676_v58 = vld [vmem:[%s8097_s1 + $0x6ec] ss:$16 sps:$4 sm:$0xff]   ;;  %v5671_v61 = vld [vmem:[%s8097_s1 + $0x4e8] ss:$16 sps:$4 sm:$0xff]  }
 0x117   :  { %3579 = vmatpush1.bf16.msra.mxu0 %v5605_v62  ;;  %v5674_v62 = vld [vmem:[%s8097_s1 + $0x6e8] ss:$16 sps:$4 sm:$0xff]  }
 0x118   :  { %3620 = vmatpush1.bf16.msra.mxu1 %v5608_v63  ;;  %3580 = vmatprep.subr.bf16.mxu0 %v5613_v1  ;;  %v5679_v63 = vld [vmem:[%s8097_s1 + $0x4cc] ss:$16 sps:$4 sm:$0xff]  }
 0x119   :  { %3621 = vmatprep.subr.bf16.mxu1 %v5616_v2  ;;  %v5682_v1 = vld [vmem:[%s8097_s1 + $0x6cc] ss:$16 sps:$4 sm:$0xff]   ;;  %v5677_v2 = vld [vmem:[%s8097_s1 + $0x4c8] ss:$16 sps:$4 sm:$0xff]  }
 0x11b   :  { %3581 = vmatpush1.bf16.msra.mxu0 %v5611_v3  ;;  %v5680_v3 = vld [vmem:[%s8097_s1 + $0x6c8] ss:$16 sps:$4 sm:$0xff]  }
 0x11c   :  { %3622 = vmatpush1.bf16.msra.mxu1 %v5614_v4  ;;  %3582 = vmatprep.subr.bf16.mxu0 %v5619_v5 }
 0x11d   :  { %3623 = vmatprep.subr.bf16.mxu1 %v5622_v7 }
 0x11f   :  { %3583 = vmatpush1.bf16.msra.mxu0 %v5617_v8 }
 0x120   :  { %3624 = vmatpush1.bf16.msra.mxu1 %v5620_v9  ;;  %3584 = vmatprep.subr.bf16.mxu0 %v5625_v11  ;;  %v5685_v11 = vld [vmem:[%s8097_s1 + $0x4ac] ss:$16 sps:$4 sm:$0xff]  }
 0x121   :  { %3625 = vmatprep.subr.bf16.mxu1 %v5628_v14  ;;  %v5688_v14 = vld [vmem:[%s8097_s1 + $0x6ac] ss:$16 sps:$4 sm:$0xff]  }
 0x123   :  { %3585 = vmatpush2.bf16.msra.mxu0 %v5623_v15 }
 0x124   :  { %3626 = vmatpush2.bf16.msra.mxu1 %v5626_v16  ;;  %3586 = vmatprep.subr.bf16.mxu0 %v5631_v19 }
 0x125   :  { %3627 = vmatprep.subr.bf16.mxu1 %v5634_v20 }
 0x127   :  { %3587 = vmatpush2.bf16.msra.mxu0 %v5629_v21 }
 0x128   :  { %3628 = vmatpush2.bf16.msra.mxu1 %v5632_v22  ;;  %3588 = vmatprep.subr.bf16.mxu0 %v5637_v24  ;;  %v5691_v22 = vld [vmem:[%s8097_s1 + $0x48c] ss:$16 sps:$4 sm:$0xff]   ;;  %v5692_v24 = vld [vmem:[%s8097_s1 + $0x688] ss:$16 sps:$4 sm:$0xff]  }
 0x129   :  { %3629 = vmatprep.subr.bf16.mxu1 %v5640_v25  ;;  %v5697_v25 = vld [vmem:[%s8097_s1 + $0x46c] ss:$16 sps:$4 sm:$0xff]  }
 0x12b   :  { %3589 = vmatpush2.bf16.msra.mxu0 %v5635_v27  ;;  %v5700_v27 = vld [vmem:[%s8097_s1 + $0x66c] ss:$16 sps:$4 sm:$0xff]  }
 0x12c   :  { %3630 = vmatpush2.bf16.msra.mxu1 %v5638_v28  ;;  %3590 = vmatprep.subr.bf16.mxu0 %v5643_v29  ;;  %v5695_v28 = vld [vmem:[%s8097_s1 + $0x468] ss:$16 sps:$4 sm:$0xff]  }
 0x12d   :  { %3631 = vmatprep.subr.bf16.mxu1 %v5646_v30  ;;  %v5698_v29 = vld [vmem:[%s8097_s1 + $0x668] ss:$16 sps:$4 sm:$0xff]   ;;  %v5703_v30 = vld [vmem:[%s8097_s1 + $0x44c] ss:$16 sps:$4 sm:$0xff]  }
 0x12f   :  { %3591 = vmatpush2.bf16.msra.mxu0 %v5641_v31  ;;  %v5706_v31 = vld [vmem:[%s8097_s1 + $0x64c] ss:$16 sps:$4 sm:$0xff]  }
 0x130   :  { %3632 = vmatpush2.bf16.msra.mxu1 %v5644_v33  ;;  %3592 = vmatprep.subr.bf16.mxu0 %v5649_v34  ;;  %v5701_v33 = vld [vmem:[%s8097_s1 + $0x448] ss:$16 sps:$4 sm:$0xff]  }
 0x131   :  { %3633 = vmatprep.subr.bf16.mxu1 %v5652_v36  ;;  %v5704_v34 = vld [vmem:[%s8097_s1 + $0x648] ss:$16 sps:$4 sm:$0xff]   ;;  %v5709_v36 = vld [vmem:[%s8097_s1 + $0x42c] ss:$16 sps:$4 sm:$0xff]  }
 0x133   :  { %3593 = vmatpush2.bf16.msra.mxu0 %v5647_v38  ;;  %v5712_v38 = vld [vmem:[%s8097_s1 + $0x62c] ss:$16 sps:$4 sm:$0xff]  }
 0x134   :  { %3634 = vmatpush2.bf16.msra.mxu1 %v5650_v32  ;;  %3594 = vmatprep.subr.bf16.mxu0 %v5655_v40  ;;  %v5707_v32 = vld [vmem:[%s8097_s1 + $0x428] ss:$16 sps:$4 sm:$0xff]  }
 0x135   :  { %3635 = vmatprep.subr.bf16.mxu1 %v5658_v44  ;;  %v5710_v40 = vld [vmem:[%s8097_s1 + $0x628] ss:$16 sps:$4 sm:$0xff]   ;;  %v5715_v44 = vld [vmem:[%s8097_s1 + $0x40c] ss:$16 sps:$4 sm:$0xff]  }
 0x137   :  { %3595 = vmatpush2.bf16.msra.mxu0 %v5653_v45  ;;  %v5718_v45 = vld [vmem:[%s8097_s1 + $0x60c] ss:$16 sps:$4 sm:$0xff]  }
 0x138   :  { %3636 = vmatpush2.bf16.msra.mxu1 %v5656_v47  ;;  %3596 = vmatprep.subr.bf16.mxu0 %v5661_v48  ;;  %v5713_v47 = vld [vmem:[%s8097_s1 + $0x408] ss:$16 sps:$4 sm:$0xff]  }
 0x139   :  { %3637 = vmatprep.subr.bf16.mxu1 %v5664_v51  ;;  %v5716_v48 = vld [vmem:[%s8097_s1 + $0x608] ss:$16 sps:$4 sm:$0xff]   ;;  %v5721_v51 = vld [vmem:[%s8097_s1 + $0x5ec] ss:$16 sps:$4 sm:$0xff]  }
 0x13b   :  { %3597 = vmatpush2.bf16.msra.mxu0 %v5659_v60  ;;  %v5724_v60 = vld [vmem:[%s8097_s1 + $0x7ec] ss:$16 sps:$4 sm:$0xff]  }
 0x13c   :  { %3638 = vmatpush2.bf16.msra.mxu1 %v5662_v0  ;;  %3598 = vmatprep.subr.bf16.mxu0 %v5667_v52  ;;  %v5719_v0 = vld [vmem:[%s8097_s1 + $0x5e8] ss:$16 sps:$4 sm:$0xff]  }
 0x13d   :  { %3639 = vmatprep.subr.bf16.mxu1 %v5670_v53  ;;  %v5722_v52 = vld [vmem:[%s8097_s1 + $0x7e8] ss:$16 sps:$4 sm:$0xff]   ;;  %v5727_v53 = vld [vmem:[%s8097_s1 + $0x5cc] ss:$16 sps:$4 sm:$0xff]  }
 0x13f   :  { %3599 = vmatpush2.bf16.msra.mxu0 %v5665_v55  ;;  %v5730_v55 = vld [vmem:[%s8097_s1 + $0x7cc] ss:$16 sps:$4 sm:$0xff]  }
 0x140   :  { %3640 = vmatpush2.bf16.msra.mxu1 %v5668_v56  ;;  %3650 = vmatprep.subr.bf16.mxu0 %v5673_v57  ;;  %v5725_v56 = vld [vmem:[%s8097_s1 + $0x5c8] ss:$16 sps:$4 sm:$0xff]  }
 0x141   :  { %3691 = vmatprep.subr.bf16.mxu1 %v5676_v58  ;;  %v5728_v57 = vld [vmem:[%s8097_s1 + $0x7c8] ss:$16 sps:$4 sm:$0xff]   ;;  %v5733_v58 = vld [vmem:[%s8097_s1 + $0x5ac] ss:$16 sps:$4 sm:$0xff]  }
 0x142   :  { %v3356_v4 = vpop.f32.mrf.mxu0  ;;  %3601 = vmatmul.mubr.bf16.vlgmr.msra.gmra.mxu0 %v6349_v13 }
 0x143   :  { %v3397_v5 = vpop.f32.mrf.mxu1  ;;  %3642 = vmatmul.mubr.bf16.vlgmr.msra.gmra.mxu1 %v6365_v18  ;;  %v3357_v7 = vadd.f32 %v3356_v4, %v7050_v37  ;;  %3651 = vmatpush1.bf16.msra.mxu0 %v5671_v61  ;;  %v5683_v18 = vld [vmem:[%s8097_s1 + $0x4a8] ss:$16 sps:$4 sm:$0xff]   ;;  %v5736_v61 = vld [vmem:[%s8097_s1 + $0x7ac] ss:$16 sps:$4 sm:$0xff]  }
 0x144   :  { %3692 = vmatpush1.bf16.msra.mxu1 %v5674_v62  ;;  %v3358_v8 = vpop.f32.mrf.mxu0  ;;  %3652 = vmatprep.subr.bf16.mxu0 %v5679_v63  ;;  %v5686_v37 = vld [vmem:[%s8097_s1 + $0x6a8] ss:$16 sps:$4 sm:$0xff]  }
 0x145   :  { %v3399_v9 = vpop.f32.mrf.mxu1  ;;  %3693 = vmatprep.subr.bf16.mxu1 %v5682_v1  ;;  %v7251_v15 = vadd.f32 %v3397_v5, %v3357_v7  ;;  %v3359_v13 = vadd.f32 %v3358_v8, %v7060_v46  ;;  %3682 = vmatprep.mubr.bf16.mxu0 %v6361_v17  ;;  %v5694_v17 = vld [vmem:[%s8097_s1 + $0x68c] ss:$16 sps:$4 sm:$0xff]   ;;  %v5731_v62 = vld [vmem:[%s8097_s1 + $0x5a8] ss:$16 sps:$4 sm:$0xff]  }
 0x146   :  { %3723 = vmatprep.mubr.bf16.mxu1 %v6381_v23  ;;  %v3360_v16 = vpop.f32.mrf.mxu0  ;;  %v5689_v23 = vld [vmem:[%s8097_s1 + $0x488] ss:$16 sps:$4 sm:$0xff]   ;;  %v5739_v1 = vld [vmem:[%s8097_s1 + $0x58c] ss:$16 sps:$4 sm:$0xff]  }
 0x147   :  { %v3401_v19 = vpop.f32.mrf.mxu1  ;;  %v7262_v20 = vadd.f32 %v3399_v9, %v3359_v13  ;;  %3653 = vmatpush1.bf16.msra.mxu0 %v5677_v2  ;;  %v5734_v63 = vld [vmem:[%s8097_s1 + $0x7a8] ss:$16 sps:$4 sm:$0xff]   ;;  %v5742_v2 = vld [vmem:[%s8097_s1 + $0x78c] ss:$16 sps:$4 sm:$0xff]  }
 0x148   :  { %3694 = vmatpush1.bf16.msra.mxu1 %v5680_v3  ;;  %v3361_v21 = vpop.f32.mrf.mxu0  ;;  %3654 = vmatprep.subr.bf16.mxu0 %v5685_v11  ;;  %v5737_v3 = vld [vmem:[%s8097_s1 + $0x588] ss:$16 sps:$4 sm:$0xff]   ;;  %v5745_v5 = vld [vmem:[%s8097_s1 + $0x56c] ss:$16 sps:$4 sm:$0xff]  }
 0x149   :  { %v3402_v46 = vpop.f32.mrf.mxu1  ;;  %3695 = vmatprep.subr.bf16.mxu1 %v5688_v14  ;;  %v5740_v4 = vld [vmem:[%s8097_s1 + $0x788] ss:$16 sps:$4 sm:$0xff]   ;;  %v5748_v7 = vld [vmem:[%s8097_s1 + $0x76c] ss:$16 sps:$4 sm:$0xff]  }
 0x14a   :  { %v5743_v8 = vld [vmem:[%s8097_s1 + $0x568] ss:$16 sps:$4 sm:$0xff]   ;;  %v5751_v11 = vld [vmem:[%s8097_s1 + $0x54c] ss:$16 sps:$4 sm:$0xff]  }
 0x14b   :  { %3655 = vmatpush1.bf16.msra.mxu0 %v5683_v18  ;;  %v5746_v9 = vld [vmem:[%s8097_s1 + $0x768] ss:$16 sps:$4 sm:$0xff]   ;;  %v5754_v14 = vld [vmem:[%s8097_s1 + $0x74c] ss:$16 sps:$4 sm:$0xff]  }
 0x14c   :  { %3696 = vmatpush1.bf16.msra.mxu1 %v5686_v37  ;;  %3656 = vmatprep.subr.bf16.mxu0 %v5691_v22 }
 0x14d   :  { %3697 = vmatprep.subr.bf16.mxu1 %v5694_v17 }
 0x14f   :  { %3657 = vmatpush1.bf16.msra.mxu0 %v5689_v23 }
 0x150   :  { %3698 = vmatpush1.bf16.msra.mxu1 %v5692_v24  ;;  %3658 = vmatprep.subr.bf16.mxu0 %v5697_v25 }
 0x151   :  { %3699 = vmatprep.subr.bf16.mxu1 %v5700_v27 }
 0x153   :  { %3659 = vmatpush1.bf16.msra.mxu0 %v5695_v28 }
 0x154   :  { %3700 = vmatpush1.bf16.msra.mxu1 %v5698_v29  ;;  %3660 = vmatprep.subr.bf16.mxu0 %v5703_v30 }
 0x155   :  { %3701 = vmatprep.subr.bf16.mxu1 %v5706_v31 }
 0x157   :  { %3661 = vmatpush1.bf16.msra.mxu0 %v5701_v33 }
 0x158   :  { %3702 = vmatpush1.bf16.msra.mxu1 %v5704_v34  ;;  %3662 = vmatprep.subr.bf16.mxu0 %v5709_v36 }
 0x159   :  { %3703 = vmatprep.subr.bf16.mxu1 %v5712_v38 }
 0x15b   :  { %3663 = vmatpush1.bf16.msra.mxu0 %v5707_v32 }
 0x15c   :  { %3704 = vmatpush1.bf16.msra.mxu1 %v5710_v40  ;;  %3664 = vmatprep.subr.bf16.mxu0 %v5715_v44 }
 0x15d   :  { %3705 = vmatprep.subr.bf16.mxu1 %v5718_v45 }
 0x15f   :  { %3665 = vmatpush1.bf16.msra.mxu0 %v5713_v47 }
 0x160   :  { %3706 = vmatpush1.bf16.msra.mxu1 %v5716_v48  ;;  %3666 = vmatprep.subr.bf16.mxu0 %v5721_v51 }
 0x161   :  { %3707 = vmatprep.subr.bf16.mxu1 %v5724_v60 }
 0x163   :  { %3667 = vmatpush2.bf16.msra.mxu0 %v5719_v0 }
 0x164   :  { %3708 = vmatpush2.bf16.msra.mxu1 %v5722_v52  ;;  %3668 = vmatprep.subr.bf16.mxu0 %v5727_v53 }
 0x165   :  { %3709 = vmatprep.subr.bf16.mxu1 %v5730_v55 }
 0x167   :  { %3669 = vmatpush2.bf16.msra.mxu0 %v5725_v56 }
 0x168   :  { %3710 = vmatpush2.bf16.msra.mxu1 %v5728_v57  ;;  %3670 = vmatprep.subr.bf16.mxu0 %v5733_v58 }
 0x169   :  { %3711 = vmatprep.subr.bf16.mxu1 %v5736_v61 }
 0x16b   :  { %3671 = vmatpush2.bf16.msra.mxu0 %v5731_v62 }
 0x16c   :  { %3712 = vmatpush2.bf16.msra.mxu1 %v5734_v63  ;;  %3672 = vmatprep.subr.bf16.mxu0 %v5739_v1 }
 0x16d   :  { %3713 = vmatprep.subr.bf16.mxu1 %v5742_v2 }
 0x16f   :  { %3673 = vmatpush2.bf16.msra.mxu0 %v5737_v3 }
 0x170   :  { %3714 = vmatpush2.bf16.msra.mxu1 %v5740_v4  ;;  %3674 = vmatprep.subr.bf16.mxu0 %v5745_v5 }
 0x171   :  { %3715 = vmatprep.subr.bf16.mxu1 %v5748_v7 }
 0x172   :  { %12 = vsyncpa [#allocation3], 0  ;;  %v5749_v13 = vld [vmem:[%s8097_s1 + $0x548] ss:$16 sps:$4 sm:$0xff]   ;;  %v5757_v37 = vld [vmem:[%s8097_s1 + $0x52c] ss:$16 sps:$4 sm:$0xff]  }
 0x173   :  { %3675 = vmatpush2.bf16.msra.mxu0 %v5743_v8  ;;  %v5752_v18 = vld [vmem:[%s8097_s1 + $0x748] ss:$16 sps:$4 sm:$0xff]   ;;  %v5760_v16 = vld [vmem:[%s8097_s1 + $0x72c] ss:$16 sps:$4 sm:$0xff]   ;;  %s6095_s15 = smov [#allocation2]  }
 0x174   :  { %3716 = vmatpush2.bf16.msra.mxu1 %v5746_v9  ;;  %3676 = vmatprep.subr.bf16.mxu0 %v5751_v11  ;;  %v5755_v19 = vld [vmem:[%s8097_s1 + $0x528] ss:$16 sps:$4 sm:$0xff]   ;;  %v5763_v46 = vld [vmem:[%s8097_s1 + $0x50c] ss:$16 sps:$4 sm:$0xff]   ;;  %s4564_s16 = sshll.u32 %s6095_s15, 4  ;;  %s4565_s16 = int_to_ptr.vmem [resolvable:$true] %s4564_s16 }
 0x175   :  { %3717 = vmatprep.subr.bf16.mxu1 %v5754_v14  ;;  %v5758_v21 = vld [vmem:[%s8097_s1 + $0x728] ss:$16 sps:$4 sm:$0xff]   ;;  %v5766_v22 = vld [vmem:[%s8097_s1 + $0x70c] ss:$16 sps:$4 sm:$0xff]   ;;  %p6077_p1 = scmp.lt.s32.totalorder %s4565_s16, %s4565_s16 }
 0x176   :  { %v5761_v17 = vld [vmem:[%s8097_s1 + $0x508] ss:$16 sps:$4 sm:$0xff]   ;;  %v5769_v24 = vld [vmem:[%s8097_s1 + $0x8ec] ss:$16 sps:$4 sm:$0xff]  }
 0x177   :  { %3677 = vmatpush2.bf16.msra.mxu0 %v5749_v13  ;;  %v5764_v23 = vld [vmem:[%s8097_s1 + $0x708] ss:$16 sps:$4 sm:$0xff]   ;;  %v5772_v25 = vld [vmem:[%s8097_s1 + $0xaec] ss:$16 sps:$4 sm:$0xff]  }
 0x178   :  { %3718 = vmatpush2.bf16.msra.mxu1 %v5752_v18  ;;  %3678 = vmatprep.subr.bf16.mxu0 %v5757_v37  ;;  %v5767_v27 = vld [vmem:[%s8097_s1 + $0x8e8] ss:$16 sps:$4 sm:$0xff]   ;;  %v5775_v29 = vld [vmem:[%s8097_s1 + $0x8cc] ss:$16 sps:$4 sm:$0xff]  }
 0x179   :  { %3719 = vmatprep.subr.bf16.mxu1 %v5760_v16  ;;  %v5770_v28 = vld [vmem:[%s8097_s1 + $0xae8] ss:$16 sps:$4 sm:$0xff]   ;;  %v5778_v30 = vld [vmem:[%s8097_s1 + $0xacc] ss:$16 sps:$4 sm:$0xff]  }
 0x17a   :  { %v5773_v36 = vld [vmem:[%s8097_s1 + $0x8c8] ss:$16 sps:$4 sm:$0xff]   ;;  %v5793_v55 = vld [vmem:[%s8097_s1 + $0x86c] ss:$16 sps:$4 sm:$0xff]  }
 0x17b   :  { %3679 = vmatpush2.bf16.msra.mxu0 %v5755_v19  ;;  %v5776_v38 = vld [vmem:[%s8097_s1 + $0xac8] ss:$16 sps:$4 sm:$0xff]   ;;  %v5796_v56 = vld [vmem:[%s8097_s1 + $0xa6c] ss:$16 sps:$4 sm:$0xff]  }
 0x17c   :  { %3720 = vmatpush2.bf16.msra.mxu1 %v5758_v21  ;;  %3680 = vmatprep.subr.bf16.mxu0 %v5763_v46  ;;  %v5779_v51 = vld [vmem:[%s8097_s1 + $0x8a8] ss:$16 sps:$4 sm:$0xff]   ;;  %v5799_v61 = vld [vmem:[%s8097_s1 + $0x84c] ss:$16 sps:$4 sm:$0xff]  }
 0x17d   :  { %3721 = vmatprep.subr.bf16.mxu1 %v5766_v22  ;;  %v5782_v60 = vld [vmem:[%s8097_s1 + $0xaa8] ss:$16 sps:$4 sm:$0xff]   ;;  %v5802_v62 = vld [vmem:[%s8097_s1 + $0xa4c] ss:$16 sps:$4 sm:$0xff]  }
 0x17e   :  { %v5785_v52 = vld [vmem:[%s8097_s1 + $0x888] ss:$16 sps:$4 sm:$0xff]   ;;  %v5805_v2 = vld [vmem:[%s8097_s1 + $0x82c] ss:$16 sps:$4 sm:$0xff]  }
 0x17f   :  { %3681 = vmatpush2.bf16.msra.mxu0 %v5761_v17  ;;  %v5788_v53 = vld [vmem:[%s8097_s1 + $0xa88] ss:$16 sps:$4 sm:$0xff]   ;;  %v5808_v3 = vld [vmem:[%s8097_s1 + $0xa2c] ss:$16 sps:$4 sm:$0xff]  }
 0x180   :  { %3722 = vmatpush2.bf16.msra.mxu1 %v5764_v23  ;;  %3732 = vmatprep.subr.bf16.mxu0 %v5769_v24  ;;  %v5791_v57 = vld [vmem:[%s8097_s1 + $0x868] ss:$16 sps:$4 sm:$0xff]   ;;  %v5811_v7 = vld [vmem:[%s8097_s1 + $0x80c] ss:$16 sps:$4 sm:$0xff]  }
 0x181   :  { %3773 = vmatprep.subr.bf16.mxu1 %v5772_v25  ;;  %v5794_v58 = vld [vmem:[%s8097_s1 + $0xa68] ss:$16 sps:$4 sm:$0xff]   ;;  %v5814_v8 = vld [vmem:[%s8097_s1 + $0xa0c] ss:$16 sps:$4 sm:$0xff]  }
 0x182   :  { %v3438_v31 = vpop.f32.mrf.mxu0  ;;  %3683 = vmatmul.mubr.bf16.vlgmr.msra.gmra.mxu0 %v6560_v26  ;;  %v5781_v26 = vld [vmem:[%s8097_s1 + $0x8ac] ss:$16 sps:$4 sm:$0xff]   ;;  %v5797_v63 = vld [vmem:[%s8097_s1 + $0x848] ss:$16 sps:$4 sm:$0xff]  }
 0x183   :  { %v3479_v33 = vpop.f32.mrf.mxu1  ;;  %3724 = vmatmul.mubr.bf16.vlgmr.msra.gmra.mxu1 %v6573_v6  ;;  %v3439_v34 = vadd.f32 %v3438_v31, %v7251_v15  ;;  %3733 = vmatpush1.bf16.msra.mxu0 %v5767_v27  ;;  %v5784_v6 = vld [vmem:[%s8097_s1 + $0xaac] ss:$16 sps:$4 sm:$0xff]   ;;  %v5800_v1 = vld [vmem:[%s8097_s1 + $0xa48] ss:$16 sps:$4 sm:$0xff]  }
 0x184   :  { %3774 = vmatpush1.bf16.msra.mxu1 %v5770_v28  ;;  %v3440_v32 = vpop.f32.mrf.mxu0  ;;  %3734 = vmatprep.subr.bf16.mxu0 %v5775_v29  ;;  %v5803_v4 = vld [vmem:[%s8097_s1 + $0x828] ss:$16 sps:$4 sm:$0xff]   ;;  %v5817_v14 = vld [vmem:[%s8097_s1 + $0x9ec] ss:$16 sps:$4 sm:$0xff]  }
 0x185   :  { %v3481_v40 = vpop.f32.mrf.mxu1  ;;  %3775 = vmatprep.subr.bf16.mxu1 %v5778_v30  ;;  %v7453_v15 = vadd.f32 %v3479_v33, %v3439_v34  ;;  %v3441_v44 = vadd.f32 %v3440_v32, %v7262_v20  ;;  %3764 = vmatprep.mubr.bf16.mxu0 %v6613_v41  ;;  %v5787_v41 = vld [vmem:[%s8097_s1 + $0x88c] ss:$16 sps:$4 sm:$0xff]   ;;  %v5806_v5 = vld [vmem:[%s8097_s1 + $0xa28] ss:$16 sps:$4 sm:$0xff]  }
 0x186   :  { %3805 = vmatprep.mubr.bf16.mxu1 %v6618_v43  ;;  %v3442_v45 = vpop.f32.mrf.mxu0  ;;  %v5790_v43 = vld [vmem:[%s8097_s1 + $0xa8c] ss:$16 sps:$4 sm:$0xff]   ;;  %v5809_v9 = vld [vmem:[%s8097_s1 + $0x808] ss:$16 sps:$4 sm:$0xff]  }
 0x187   :  { %v3483_v47 = vpop.f32.mrf.mxu1  ;;  %v7458_v48 = vadd.f32 %v3481_v40, %v3441_v44  ;;  %3735 = vmatpush1.bf16.msra.mxu0 %v5773_v36  ;;  %v5812_v11 = vld [vmem:[%s8097_s1 + $0xa08] ss:$16 sps:$4 sm:$0xff]   ;;  %v5820_v13 = vld [vmem:[%s8097_s1 + $0xbec] ss:$16 sps:$4 sm:$0xff]  }
 0x188   :  { %3776 = vmatpush1.bf16.msra.mxu1 %v5776_v38  ;;  %v3443_v0 = vpop.f32.mrf.mxu0  ;;  %3736 = vmatprep.subr.bf16.mxu0 %v5781_v26  ;;  %v5815_v18 = vld [vmem:[%s8097_s1 + $0x9e8] ss:$16 sps:$4 sm:$0xff]   ;;  %v5823_v16 = vld [vmem:[%s8097_s1 + $0x9cc] ss:$16 sps:$4 sm:$0xff]  }
 0x189   :  { %v3484_v20 = vpop.f32.mrf.mxu1  ;;  %3777 = vmatprep.subr.bf16.mxu1 %v5784_v6  ;;  %v5818_v37 = vld [vmem:[%s8097_s1 + $0xbe8] ss:$16 sps:$4 sm:$0xff]   ;;  %v5826_v19 = vld [vmem:[%s8097_s1 + $0xbcc] ss:$16 sps:$4 sm:$0xff]  }
 0x18a   :  { %v5821_v21 = vld [vmem:[%s8097_s1 + $0x9c8] ss:$16 sps:$4 sm:$0xff]   ;;  %v5829_v22 = vld [vmem:[%s8097_s1 + $0x9ac] ss:$16 sps:$4 sm:$0xff]  }
 0x18b   :  { %3737 = vmatpush1.bf16.msra.mxu0 %v5779_v51  ;;  %v5824_v46 = vld [vmem:[%s8097_s1 + $0xbc8] ss:$16 sps:$4 sm:$0xff]   ;;  %v5832_v17 = vld [vmem:[%s8097_s1 + $0xbac] ss:$16 sps:$4 sm:$0xff]  }
 0x18c   :  { %3778 = vmatpush1.bf16.msra.mxu1 %v5782_v60  ;;  %3738 = vmatprep.subr.bf16.mxu0 %v5787_v41  ;;  %v5827_v23 = vld [vmem:[%s8097_s1 + $0x9a8] ss:$16 sps:$4 sm:$0xff]   ;;  %v5835_v25 = vld [vmem:[%s8097_s1 + $0x98c] ss:$16 sps:$4 sm:$0xff]  }
 0x18d   :  { %3779 = vmatprep.subr.bf16.mxu1 %v5790_v43  ;;  %v5830_v24 = vld [vmem:[%s8097_s1 + $0xba8] ss:$16 sps:$4 sm:$0xff]   ;;  %v5838_v27 = vld [vmem:[%s8097_s1 + $0xb8c] ss:$16 sps:$4 sm:$0xff]  }
 0x18e   :  { %v5833_v28 = vld [vmem:[%s8097_s1 + $0x988] ss:$16 sps:$4 sm:$0xff]   ;;  %v5841_v30 = vld [vmem:[%s8097_s1 + $0x96c] ss:$16 sps:$4 sm:$0xff]  }
 0x18f   :  { %3739 = vmatpush1.bf16.msra.mxu0 %v5785_v52  ;;  %v5836_v29 = vld [vmem:[%s8097_s1 + $0xb88] ss:$16 sps:$4 sm:$0xff]   ;;  %v5844_v31 = vld [vmem:[%s8097_s1 + $0xb6c] ss:$16 sps:$4 sm:$0xff]  }
 0x190   :  { %3780 = vmatpush1.bf16.msra.mxu1 %v5788_v53  ;;  %3740 = vmatprep.subr.bf16.mxu0 %v5793_v55  ;;  %v5839_v33 = vld [vmem:[%s8097_s1 + $0x968] ss:$16 sps:$4 sm:$0xff]   ;;  %v5847_v36 = vld [vmem:[%s8097_s1 + $0x94c] ss:$16 sps:$4 sm:$0xff]  }
 0x191   :  { %3781 = vmatprep.subr.bf16.mxu1 %v5796_v56  ;;  %v5842_v34 = vld [vmem:[%s8097_s1 + $0xb68] ss:$16 sps:$4 sm:$0xff]   ;;  %v5850_v38 = vld [vmem:[%s8097_s1 + $0xb4c] ss:$16 sps:$4 sm:$0xff]  }
 0x192   :  { %v5845_v32 = vld [vmem:[%s8097_s1 + $0x948] ss:$16 sps:$4 sm:$0xff]   ;;  %v5853_v26 = vld [vmem:[%s8097_s1 + $0x92c] ss:$16 sps:$4 sm:$0xff]  }
 0x193   :  { %3741 = vmatpush1.bf16.msra.mxu0 %v5791_v57  ;;  %v5848_v40 = vld [vmem:[%s8097_s1 + $0xb48] ss:$16 sps:$4 sm:$0xff]   ;;  %v5856_v6 = vld [vmem:[%s8097_s1 + $0xb2c] ss:$16 sps:$4 sm:$0xff]  }
 0x194   :  { %3782 = vmatpush1.bf16.msra.mxu1 %v5794_v58  ;;  %3742 = vmatprep.subr.bf16.mxu0 %v5799_v61  ;;  %v5851_v44 = vld [vmem:[%s8097_s1 + $0x928] ss:$16 sps:$4 sm:$0xff]   ;;  %v5859_v47 = vld [vmem:[%s8097_s1 + $0x90c] ss:$16 sps:$4 sm:$0xff]  }
 0x195   :  { %3783 = vmatprep.subr.bf16.mxu1 %v5802_v62  ;;  %v5854_v45 = vld [vmem:[%s8097_s1 + $0xb28] ss:$16 sps:$4 sm:$0xff]   ;;  %v5862_v51 = vld [vmem:[%s8097_s1 + $0xb0c] ss:$16 sps:$4 sm:$0xff]  }
 0x196   :  { %v5857_v60 = vld [vmem:[%s8097_s1 + $0x908] ss:$16 sps:$4 sm:$0xff]   ;;  %v5865_v20 = vld [vmem:[%s8097_s1 + $0xcec] ss:$16 sps:$4 sm:$0xff]  }
 0x197   :  { %3743 = vmatpush1.bf16.msra.mxu0 %v5797_v63  ;;  %v5860_v0 = vld [vmem:[%s8097_s1 + $0xb08] ss:$16 sps:$4 sm:$0xff]   ;;  %v5868_v41 = vld [vmem:[%s8097_s1 + $0xeec] ss:$16 sps:$4 sm:$0xff]  }
 0x198   :  { %3784 = vmatpush1.bf16.msra.mxu1 %v5800_v1  ;;  %3744 = vmatprep.subr.bf16.mxu0 %v5805_v2  ;;  %v5863_v43 = vld [vmem:[%s8097_s1 + $0xce8] ss:$16 sps:$4 sm:$0xff]   ;;  %v5871_v53 = vld [vmem:[%s8097_s1 + $0xccc] ss:$16 sps:$4 sm:$0xff]  }
 0x199   :  { %3785 = vmatprep.subr.bf16.mxu1 %v5808_v3  ;;  %v5866_v52 = vld [vmem:[%s8097_s1 + $0xee8] ss:$16 sps:$4 sm:$0xff]   ;;  %v5874_v55 = vld [vmem:[%s8097_s1 + $0xecc] ss:$16 sps:$4 sm:$0xff]  }
 0x19a   :  { %v5869_v61 = vld [vmem:[%s8097_s1 + $0xcc8] ss:$16 sps:$4 sm:$0xff]  }
 0x19b   :  { %3745 = vmatpush1.bf16.msra.mxu0 %v5803_v4  ;;  %v5872_v62 = vld [vmem:[%s8097_s1 + $0xec8] ss:$16 sps:$4 sm:$0xff]  }
 0x19c   :  { %3786 = vmatpush1.bf16.msra.mxu1 %v5806_v5  ;;  %3746 = vmatprep.subr.bf16.mxu0 %v5811_v7  ;;  %v5875_v4 = vld [vmem:[%s8097_s1 + $0xca8] ss:$16 sps:$4 sm:$0xff]  }
 0x19d   :  { %3787 = vmatprep.subr.bf16.mxu1 %v5814_v8  ;;  %v5878_v5 = vld [vmem:[%s8097_s1 + $0xea8] ss:$16 sps:$4 sm:$0xff]  }
 0x19f   :  { %3747 = vmatpush1.bf16.msra.mxu0 %v5809_v9  ;;  %v5881_v9 = vld [vmem:[%s8097_s1 + $0xc88] ss:$16 sps:$4 sm:$0xff]  }
 0x1a0   :  { %3788 = vmatpush1.bf16.msra.mxu1 %v5812_v11  ;;  %3748 = vmatprep.subr.bf16.mxu0 %v5817_v14  ;;  %v5884_v11 = vld [vmem:[%s8097_s1 + $0xe88] ss:$16 sps:$4 sm:$0xff]   ;;  %v5889_v14 = vld [vmem:[%s8097_s1 + $0xc6c] ss:$16 sps:$4 sm:$0xff]  }
 0x1a1   :  { %3789 = vmatprep.subr.bf16.mxu1 %v5820_v13  ;;  %v5892_v13 = vld [vmem:[%s8097_s1 + $0xe6c] ss:$16 sps:$4 sm:$0xff]  }
 0x1a3   :  { %3749 = vmatpush2.bf16.msra.mxu0 %v5815_v18  ;;  %v5887_v18 = vld [vmem:[%s8097_s1 + $0xc68] ss:$16 sps:$4 sm:$0xff]  }
 0x1a4   :  { %3790 = vmatpush2.bf16.msra.mxu1 %v5818_v37  ;;  %3750 = vmatprep.subr.bf16.mxu0 %v5823_v16  ;;  %v5890_v37 = vld [vmem:[%s8097_s1 + $0xe68] ss:$16 sps:$4 sm:$0xff]   ;;  %v5895_v16 = vld [vmem:[%s8097_s1 + $0xc4c] ss:$16 sps:$4 sm:$0xff]  }
 0x1a5   :  { %3791 = vmatprep.subr.bf16.mxu1 %v5826_v19  ;;  %v5898_v19 = vld [vmem:[%s8097_s1 + $0xe4c] ss:$16 sps:$4 sm:$0xff]  }
 0x1a7   :  { %3751 = vmatpush2.bf16.msra.mxu0 %v5821_v21  ;;  %v5893_v21 = vld [vmem:[%s8097_s1 + $0xc48] ss:$16 sps:$4 sm:$0xff]  }
 0x1a8   :  { %3792 = vmatpush2.bf16.msra.mxu1 %v5824_v46  ;;  %3752 = vmatprep.subr.bf16.mxu0 %v5829_v22  ;;  %v5896_v46 = vld [vmem:[%s8097_s1 + $0xe48] ss:$16 sps:$4 sm:$0xff]   ;;  %v5901_v22 = vld [vmem:[%s8097_s1 + $0xc2c] ss:$16 sps:$4 sm:$0xff]  }
 0x1a9   :  { %3793 = vmatprep.subr.bf16.mxu1 %v5832_v17  ;;  %v5904_v17 = vld [vmem:[%s8097_s1 + $0xe2c] ss:$16 sps:$4 sm:$0xff]  }
 0x1ab   :  { %3753 = vmatpush2.bf16.msra.mxu0 %v5827_v23  ;;  %v5899_v23 = vld [vmem:[%s8097_s1 + $0xc28] ss:$16 sps:$4 sm:$0xff]  }
 0x1ac   :  { %3794 = vmatpush2.bf16.msra.mxu1 %v5830_v24  ;;  %3754 = vmatprep.subr.bf16.mxu0 %v5835_v25  ;;  %v5902_v24 = vld [vmem:[%s8097_s1 + $0xe28] ss:$16 sps:$4 sm:$0xff]   ;;  %v5907_v25 = vld [vmem:[%s8097_s1 + $0xc0c] ss:$16 sps:$4 sm:$0xff]  }
 0x1ad   :  { %3795 = vmatprep.subr.bf16.mxu1 %v5838_v27  ;;  %v5910_v27 = vld [vmem:[%s8097_s1 + $0xe0c] ss:$16 sps:$4 sm:$0xff]  }
 0x1af   :  { %3755 = vmatpush2.bf16.msra.mxu0 %v5833_v28  ;;  %v5905_v28 = vld [vmem:[%s8097_s1 + $0xc08] ss:$16 sps:$4 sm:$0xff]  }
 0x1b0   :  { %3796 = vmatpush2.bf16.msra.mxu1 %v5836_v29  ;;  %3756 = vmatprep.subr.bf16.mxu0 %v5841_v30  ;;  %v5908_v29 = vld [vmem:[%s8097_s1 + $0xe08] ss:$16 sps:$4 sm:$0xff]   ;;  %v5913_v30 = vld [vmem:[%s8097_s1 + $0xdec] ss:$16 sps:$4 sm:$0xff]  }
 0x1b1   :  { %3797 = vmatprep.subr.bf16.mxu1 %v5844_v31  ;;  %v5916_v31 = vld [vmem:[%s8097_s1 + $0xfec] ss:$16 sps:$4 sm:$0xff]  }
 0x1b3   :  { %3757 = vmatpush2.bf16.msra.mxu0 %v5839_v33  ;;  %v5911_v33 = vld [vmem:[%s8097_s1 + $0xde8] ss:$16 sps:$4 sm:$0xff]  }
 0x1b4   :  { %3798 = vmatpush2.bf16.msra.mxu1 %v5842_v34  ;;  %3758 = vmatprep.subr.bf16.mxu0 %v5847_v36  ;;  %v5914_v34 = vld [vmem:[%s8097_s1 + $0xfe8] ss:$16 sps:$4 sm:$0xff]   ;;  %v5919_v36 = vld [vmem:[%s8097_s1 + $0xdcc] ss:$16 sps:$4 sm:$0xff]  }
 0x1b5   :  { %3799 = vmatprep.subr.bf16.mxu1 %v5850_v38  ;;  %v5922_v38 = vld [vmem:[%s8097_s1 + $0xfcc] ss:$16 sps:$4 sm:$0xff]  }
 0x1b7   :  { %3759 = vmatpush2.bf16.msra.mxu0 %v5845_v32  ;;  %v5917_v32 = vld [vmem:[%s8097_s1 + $0xdc8] ss:$16 sps:$4 sm:$0xff]  }
 0x1b8   :  { %3800 = vmatpush2.bf16.msra.mxu1 %v5848_v40  ;;  %3760 = vmatprep.subr.bf16.mxu0 %v5853_v26  ;;  %v5920_v40 = vld [vmem:[%s8097_s1 + $0xfc8] ss:$16 sps:$4 sm:$0xff]   ;;  %v5925_v26 = vld [vmem:[%s8097_s1 + $0xdac] ss:$16 sps:$4 sm:$0xff]  }
 0x1b9   :  { %3801 = vmatprep.subr.bf16.mxu1 %v5856_v6  ;;  %v5928_v6 = vld [vmem:[%s8097_s1 + $0xfac] ss:$16 sps:$4 sm:$0xff]  }
 0x1bb   :  { %3761 = vmatpush2.bf16.msra.mxu0 %v5851_v44  ;;  %v5923_v44 = vld [vmem:[%s8097_s1 + $0xda8] ss:$16 sps:$4 sm:$0xff]  }
 0x1bc   :  { %3802 = vmatpush2.bf16.msra.mxu1 %v5854_v45  ;;  %3762 = vmatprep.subr.bf16.mxu0 %v5859_v47  ;;  %v5926_v45 = vld [vmem:[%s8097_s1 + $0xfa8] ss:$16 sps:$4 sm:$0xff]   ;;  %v5931_v47 = vld [vmem:[%s8097_s1 + $0xd8c] ss:$16 sps:$4 sm:$0xff]  }
 0x1bd   :  { %3803 = vmatprep.subr.bf16.mxu1 %v5862_v51  ;;  %v5934_v51 = vld [vmem:[%s8097_s1 + $0xf8c] ss:$16 sps:$4 sm:$0xff]  }
 0x1bf   :  { %3763 = vmatpush2.bf16.msra.mxu0 %v5857_v60  ;;  %v5929_v60 = vld [vmem:[%s8097_s1 + $0xd88] ss:$16 sps:$4 sm:$0xff]  }
 0x1c0   :  { %3804 = vmatpush2.bf16.msra.mxu1 %v5860_v0  ;;  %3814 = vmatprep.subr.bf16.mxu0 %v5865_v20  ;;  %v5932_v0 = vld [vmem:[%s8097_s1 + $0xf88] ss:$16 sps:$4 sm:$0xff]   ;;  %v5937_v20 = vld [vmem:[%s8097_s1 + $0xd6c] ss:$16 sps:$4 sm:$0xff]  }
 0x1c1   :  { %3855 = vmatprep.subr.bf16.mxu1 %v5868_v41  ;;  %v5940_v41 = vld [vmem:[%s8097_s1 + $0xf6c] ss:$16 sps:$4 sm:$0xff]  }
 0x1c2   :  { %v3520_v56 = vpop.f32.mrf.mxu0  ;;  %3765 = vmatmul.mubr.bf16.vlgmr.msra.gmra.mxu0 %v6789_v50  ;;  %v5877_v50 = vld [vmem:[%s8097_s1 + $0xcac] ss:$16 sps:$4 sm:$0xff]  }
 0x1c3   :  { %v3561_v57 = vpop.f32.mrf.mxu1  ;;  %3806 = vmatmul.mubr.bf16.vlgmr.msra.gmra.mxu1 %v6805_v35  ;;  %v3521_v58 = vadd.f32 %v3520_v56, %v7453_v15  ;;  %3815 = vmatpush1.bf16.msra.mxu0 %v5863_v43  ;;  %v5880_v35 = vld [vmem:[%s8097_s1 + $0xeac] ss:$16 sps:$4 sm:$0xff]   ;;  %v5935_v43 = vld [vmem:[%s8097_s1 + $0xd68] ss:$16 sps:$4 sm:$0xff]  }
 0x1c4   :  { %3856 = vmatpush1.bf16.msra.mxu1 %v5866_v52  ;;  %v7649_v63 = vpop.f32.mrf.mxu0  ;;  %3816 = vmatprep.subr.bf16.mxu0 %v5871_v53  ;;  %v5938_v52 = vld [vmem:[%s8097_s1 + $0xf68] ss:$16 sps:$4 sm:$0xff]   ;;  %v5943_v53 = vld [vmem:[%s8097_s1 + $0xd4c] ss:$16 sps:$4 sm:$0xff]  }
 0x1c5   :  { %v7651_v1 = vpop.f32.mrf.mxu1  ;;  %3857 = vmatprep.subr.bf16.mxu1 %v5874_v55  ;;  %v7659_v15 = vadd.f32 %v3561_v57, %v3521_v58  ;;  %3846 = vmatprep.mubr.bf16.mxu0 %v6801_v54  ;;  %v5883_v54 = vld [vmem:[%s8097_s1 + $0xc8c] ss:$16 sps:$4 sm:$0xff]   ;;  %v5941_v56 = vld [vmem:[%s8097_s1 + $0xd48] ss:$16 sps:$4 sm:$0xff]  }
 0x1c6   :  { %3887 = vmatprep.mubr.bf16.mxu1 %v6821_v59  ;;  %v3524_v2 = vpop.f32.mrf.mxu0  ;;  %v5886_v59 = vld [vmem:[%s8097_s1 + $0xe8c] ss:$16 sps:$4 sm:$0xff]   ;;  %v5944_v57 = vld [vmem:[%s8097_s1 + $0xf48] ss:$16 sps:$4 sm:$0xff]  }
 0x1c7   :  { %v3565_v3 = vpop.f32.mrf.mxu1  ;;  %3817 = vmatpush1.bf16.msra.mxu0 %v5869_v61  ;;  %v5946_v55 = vld [vmem:[%s8097_s1 + $0xf4c] ss:$16 sps:$4 sm:$0xff]  }
 0x1c8   :  { %3858 = vmatpush1.bf16.msra.mxu1 %v5872_v62  ;;  %v3525_v7 = vpop.f32.mrf.mxu0  ;;  %3818 = vmatprep.subr.bf16.mxu0 %v5877_v50  ;;  %v5949_v58 = vld [vmem:[%s8097_s1 + $0xd2c] ss:$16 sps:$4 sm:$0xff]   ;;  %v5947_v62 = vld [vmem:[%s8097_s1 + $0xd28] ss:$16 sps:$4 sm:$0xff]   ;;  %v3523_v3 = vadd.f32 %v7649_v63, %v7458_v48  ;;  %v558_v63 = vsub.s32 3, %v6253_v42 }
 0x1c9   :  { %v3566_v8 = vpop.f32.mrf.mxu1  ;;  %3859 = vmatprep.subr.bf16.mxu1 %v5880_v35  ;;  %v5952_v61 = vld [vmem:[%s8097_s1 + $0xf2c] ss:$16 sps:$4 sm:$0xff]   ;;  %v5950_v50 = vld [vmem:[%s8097_s1 + $0xf28] ss:$16 sps:$4 sm:$0xff]   ;;  %v554_v7 = vsub.s32 2, %v6253_v42 }
 0x1ca   :  { %v5955_v35 = vld [vmem:[%s8097_s1 + $0xd0c] ss:$16 sps:$4 sm:$0xff]   ;;  %v3564_v48 = vadd.f32 %v7651_v1, %v3523_v3  ;;  %v5989_v3 = vld [vmem:[%s8099_s3 + $0xd0] ss:$8 sps:$4 sm:$0xff]   ;;  %v5148_v42 = vld [vmem:[%s8102_s6] ss:$0 sm:$0xff] }
 0x1cb   :  { %3819 = vmatpush1.bf16.msra.mxu0 %v5875_v4  ;;  %v5958_v2 = vld [vmem:[%s8097_s1 + $0xf0c] ss:$16 sps:$4 sm:$0xff]   ;;  %v5953_v4 = vld [vmem:[%s8097_s1 + $0xd08] ss:$16 sps:$4 sm:$0xff]  }
 0x1cc   :  { %3860 = vmatpush1.bf16.msra.mxu1 %v5878_v5  ;;  %3820 = vmatprep.subr.bf16.mxu0 %v5883_v54  ;;  %v5956_v5 = vld [vmem:[%s8097_s1 + $0xf08] ss:$16 sps:$4 sm:$0xff]   ;;  %v5961_v8 = vld [vmem:[%s8099_s3 + $0x74] ss:$8 sps:$4 sm:$0xff]   ;;  %v6071_v54 = vld [vmem:[%s8098_s2] sm:$0xf] }
 0x1cd   :  { %3861 = vmatprep.subr.bf16.mxu1 %v5886_v59  ;;  %v555_v59 = vrot.slane %v6071_v54, %v554_v7  ;;  %v559_v1 = vrot.slane %v6071_v54, %v558_v63  ;;  %v6036_v7 = vld [vmem:[%s8099_s3 + $0x1e4] ss:$8 sps:$4 sm:$0xff]   ;;  %v5997_v63 = vld [vmem:[%s8099_s3 + $0xb4] ss:$8 sps:$4 sm:$0xff]   ;;  %s6072_s2 = scalar_lea.vmem %s4565_s16, 32 }
 0x1ce   :  { %v6039_v54 = vld [vmem:[%s8099_s3 + $0x1d4] ss:$8 sps:$4 sm:$0xff]   ;;  %p6073_p0 = scmp.ne.s32.totalorder %s4565_s16, %s6072_s2  ;;  %p6078_p2 = scmp.lt.s32.totalorder %s6072_s2, %s6072_s2 }
 0x1cf   :  { %3821 = vmatpush1.bf16.msra.mxu0 %v5881_v9  ;;  %v5959_v9 = vld [vmem:[%s8099_s3 + $0x70] ss:$8 sps:$4 sm:$0xff]  }
 0x1d0   :  { %3862 = vmatpush1.bf16.msra.mxu1 %v5884_v11  ;;  %3822 = vmatprep.subr.bf16.mxu0 %v5889_v14  ;;  %v5964_v11 = vld [vmem:[%s8099_s3 + $0x64] ss:$8 sps:$4 sm:$0xff]   ;;  %v3897_v14 = vpack.c.bf16 %v3564_v48, %v3564_v48  ;;  %v6034_v48 = vld [vmem:[%s8099_s3 + $0x1e0] ss:$8 sps:$4 sm:$0xff]   ;;  %p6079_p3 = por %p6078_p2, %p6077_p1 }
 0x1d1   :  { %3863 = vmatprep.subr.bf16.mxu1 %v5892_v13 }
 0x1d2   :  { %p6080_p4 = pnand %p6079_p3, %p6073_p0 }
 0x1d3   :  { %3823 = vmatpush1.bf16.msra.mxu0 %v5887_v18 }
 0x1d4   :  { %3864 = vmatpush1.bf16.msra.mxu1 %v5890_v37  ;;  %3824 = vmatprep.subr.bf16.mxu0 %v5895_v16  ;;  %v5962_v16 = vld [vmem:[%s8099_s3 + $0x60] ss:$8 sps:$4 sm:$0xff]  }
 0x1d5   :  { %3865 = vmatprep.subr.bf16.mxu1 %v5898_v19 }
 0x1d7   :  { %3825 = vmatpush1.bf16.msra.mxu0 %v5893_v21 }
 0x1d8   :  { %3866 = vmatpush1.bf16.msra.mxu1 %v5896_v46  ;;  %3826 = vmatprep.subr.bf16.mxu0 %v5901_v22  ;;  %v5967_v46 = vld [vmem:[%s8099_s3 + $0x54] ss:$8 sps:$4 sm:$0xff]  }
 0x1d9   :  { %3867 = vmatprep.subr.bf16.mxu1 %v5904_v17 }
 0x1db   :  { %3827 = vmatpush1.bf16.msra.mxu0 %v5899_v23 }
 0x1dc   :  { %3868 = vmatpush1.bf16.msra.mxu1 %v5902_v24  ;;  %3828 = vmatprep.subr.bf16.mxu0 %v5907_v25  ;;  %v5965_v24 = vld [vmem:[%s8099_s3 + $0x50] ss:$8 sps:$4 sm:$0xff]  }
 0x1dd   :  { %3869 = vmatprep.subr.bf16.mxu1 %v5910_v27 }
 0x1df   :  { %3829 = vmatpush1.bf16.msra.mxu0 %v5905_v28  ;;  %v5970_v28 = vld [vmem:[%s8099_s3 + $0x44] ss:$8 sps:$4 sm:$0xff]  }
 0x1e0   :  { %3870 = vmatpush1.bf16.msra.mxu1 %v5908_v29  ;;  %3830 = vmatprep.subr.bf16.mxu0 %v5913_v30  ;;  %v6007_v29 = vld [vmem:[%s8099_s3 + $0x170] ss:$8 sps:$4 sm:$0xff]   ;;  %v6009_v30 = vld [vmem:[%s8099_s3 + $0x174] ss:$8 sps:$4 sm:$0xff]  }
 0x1e1   :  { %3871 = vmatprep.subr.bf16.mxu1 %v5916_v31  ;;  %v6012_v31 = vld [vmem:[%s8099_s3 + $0x164] ss:$8 sps:$4 sm:$0xff]  }
 0x1e3   :  { %3831 = vmatpush2.bf16.msra.mxu0 %v5911_v33  ;;  %v5968_v33 = vld [vmem:[%s8099_s3 + $0x40] ss:$8 sps:$4 sm:$0xff]  }
 0x1e4   :  { %3872 = vmatpush2.bf16.msra.mxu1 %v5914_v34  ;;  %3832 = vmatprep.subr.bf16.mxu0 %v5919_v36  ;;  %v6010_v34 = vld [vmem:[%s8099_s3 + $0x160] ss:$8 sps:$4 sm:$0xff]   ;;  %v5973_v36 = vld [vmem:[%s8099_s3 + $0x34] ss:$8 sps:$4 sm:$0xff]  }
 0x1e5   :  { %3873 = vmatprep.subr.bf16.mxu1 %v5922_v38  ;;  %v6015_v38 = vld [vmem:[%s8099_s3 + $0x154] ss:$8 sps:$4 sm:$0xff]  }
 0x1e7   :  { %3833 = vmatpush2.bf16.msra.mxu0 %v5917_v32  ;;  %v5971_v32 = vld [vmem:[%s8099_s3 + $0x30] ss:$8 sps:$4 sm:$0xff]  }
 0x1e8   :  { %3874 = vmatpush2.bf16.msra.mxu1 %v5920_v40  ;;  %3834 = vmatprep.subr.bf16.mxu0 %v5925_v26  ;;  %v6013_v40 = vld [vmem:[%s8099_s3 + $0x150] ss:$8 sps:$4 sm:$0xff]   ;;  %v5976_v26 = vld [vmem:[%s8099_s3 + $0x24] ss:$8 sps:$4 sm:$0xff]  }
 0x1e9   :  { %3875 = vmatprep.subr.bf16.mxu1 %v5928_v6  ;;  %v6018_v6 = vld [vmem:[%s8099_s3 + $0x144] ss:$8 sps:$4 sm:$0xff]  }
 0x1eb   :  { %3835 = vmatpush2.bf16.msra.mxu0 %v5923_v44  ;;  %v5974_v44 = vld [vmem:[%s8099_s3 + $0x20] ss:$8 sps:$4 sm:$0xff]  }
 0x1ec   :  { %3876 = vmatpush2.bf16.msra.mxu1 %v5926_v45  ;;  %3836 = vmatprep.subr.bf16.mxu0 %v5931_v47  ;;  %v6016_v45 = vld [vmem:[%s8099_s3 + $0x140] ss:$8 sps:$4 sm:$0xff]   ;;  %v5979_v47 = vld [vmem:[%s8099_s3 + $0x14] ss:$8 sps:$4 sm:$0xff]  }
 0x1ed   :  { %3877 = vmatprep.subr.bf16.mxu1 %v5934_v51  ;;  %v6021_v51 = vld [vmem:[%s8099_s3 + $0x134] ss:$8 sps:$4 sm:$0xff]  }
 0x1ef   :  { %3837 = vmatpush2.bf16.msra.mxu0 %v5929_v60  ;;  %v5977_v60 = vld [vmem:[%s8099_s3 + $0x10] ss:$8 sps:$4 sm:$0xff]  }
 0x1f0   :  { %3878 = vmatpush2.bf16.msra.mxu1 %v5932_v0  ;;  %3838 = vmatprep.subr.bf16.mxu0 %v5937_v20  ;;  %v6019_v0 = vld [vmem:[%s8099_s3 + $0x130] ss:$8 sps:$4 sm:$0xff]   ;;  %v5982_v20 = vld [vmem:[%s8099_s3 + $0x4] ss:$8 sps:$4 sm:$0xff]  }
 0x1f1   :  { %3879 = vmatprep.subr.bf16.mxu1 %v5940_v41  ;;  %v6024_v41 = vld [vmem:[%s8099_s3 + $0x124] ss:$8 sps:$4 sm:$0xff]  }
 0x1f3   :  { %3839 = vmatpush2.bf16.msra.mxu0 %v5935_v43  ;;  %v5980_v43 = vld [vmem:[%s8099_s3] ss:$8 sps:$4 sm:$0xff]  }
 0x1f4   :  { %3880 = vmatpush2.bf16.msra.mxu1 %v5938_v52  ;;  %3840 = vmatprep.subr.bf16.mxu0 %v5943_v53  ;;  %v6022_v52 = vld [vmem:[%s8099_s3 + $0x120] ss:$8 sps:$4 sm:$0xff]   ;;  %v5985_v53 = vld [vmem:[%s8099_s3 + $0xf4] ss:$8 sps:$4 sm:$0xff]  }
 0x1f5   :  { %3881 = vmatprep.subr.bf16.mxu1 %v5946_v55  ;;  %v6027_v55 = vld [vmem:[%s8099_s3 + $0x114] ss:$8 sps:$4 sm:$0xff]  }
 0x1f7   :  { %3841 = vmatpush2.bf16.msra.mxu0 %v5941_v56  ;;  %v5983_v56 = vld [vmem:[%s8099_s3 + $0xf0] ss:$8 sps:$4 sm:$0xff]  }
 0x1f8   :  { %3882 = vmatpush2.bf16.msra.mxu1 %v5944_v57  ;;  %3842 = vmatprep.subr.bf16.mxu0 %v5949_v58  ;;  %v6025_v57 = vld [vmem:[%s8099_s3 + $0x110] ss:$8 sps:$4 sm:$0xff]   ;;  %v5988_v58 = vld [vmem:[%s8099_s3 + $0xe4] ss:$8 sps:$4 sm:$0xff]  }
 0x1f9   :  { %3883 = vmatprep.subr.bf16.mxu1 %v5952_v61  ;;  %v6030_v61 = vld [vmem:[%s8099_s3 + $0x104] ss:$8 sps:$4 sm:$0xff]  }
 0x1fb   :  { %3843 = vmatpush2.bf16.msra.mxu0 %v5947_v62  ;;  %v5986_v62 = vld [vmem:[%s8099_s3 + $0xe0] ss:$8 sps:$4 sm:$0xff]  }
 0x1fc   :  { %3884 = vmatpush2.bf16.msra.mxu1 %v5950_v50  ;;  %3844 = vmatprep.subr.bf16.mxu0 %v5955_v35  ;;  %v6028_v50 = vld [vmem:[%s8099_s3 + $0x100] ss:$8 sps:$4 sm:$0xff]   ;;  %v5991_v35 = vld [vmem:[%s8099_s3 + $0xd4] ss:$8 sps:$4 sm:$0xff]  }
 0x1fd   :  { %3885 = vmatprep.subr.bf16.mxu1 %v5958_v2  ;;  %v6033_v2 = vld [vmem:[%s8099_s3 + $0x1f4] ss:$8 sps:$4 sm:$0xff]  }
 0x1ff   :  { %3845 = vmatpush2.bf16.msra.mxu0 %v5953_v4  ;;  %v6031_v4 = vld [vmem:[%s8099_s3 + $0x1f0] ss:$8 sps:$4 sm:$0xff]  }
 0x200   :  { %3886 = vmatpush2.bf16.msra.mxu1 %v5956_v5  ;;  %4296 = vmatprep.subr.bf16.mxu0 %v5961_v8  ;;  %v5994_v5 = vld [vmem:[%s8099_s3 + $0xc4] ss:$8 sps:$4 sm:$0xff]   ;;  %v5992_v8 = vld [vmem:[%s8099_s3 + $0xc0] ss:$8 sps:$4 sm:$0xff]  }
 0x201   :  { %4337 = vmatprep.subr.bf16.mxu1 %v6009_v30 }
 0x202   :  { %v3602_v13 = vpop.f32.mrf.mxu0  ;;  %3847 = vmatmul.mubr.bf16.vlgmr.msra.gmra.mxu0 %v7003_v10 }
 0x203   :  { %v3643_v18 = vpop.f32.mrf.mxu1  ;;  %3888 = vmatmul.mubr.bf16.vlgmr.msra.gmra.mxu1 %v7018_v39  ;;  %v3603_v37 = vadd.f32 %v3602_v13, %v555_v59  ;;  %4297 = vmatpush1.bf16.msra.mxu0 %v5959_v9  ;;  %v5995_v59 = vld [vmem:[%s8099_s3 + $0xb0] ss:$8 sps:$4 sm:$0xff]   ;;  %v6040_v13 = vld [vmem:[%s8099_s3 + $0x1c0] ss:$8 sps:$4 sm:$0xff]  }
 0x204   :  { %4328 = vmatprep.mubr.bf16.mxu0 %v3897_v14  ;;  %v3604_v19 = vpop.f32.mrf.mxu0  ;;  %4298 = vmatprep.subr.bf16.mxu0 %v5964_v11  ;;  %v6037_v9 = vld [vmem:[%s8099_s3 + $0x1d0] ss:$8 sps:$4 sm:$0xff]   ;;  %v6000_v11 = vld [vmem:[%s8099_s3 + $0xa4] ss:$8 sps:$4 sm:$0xff]  }
 0x205   :  { %v3645_v21 = vpop.f32.mrf.mxu1  ;;  %v7850_v22 = vadd.f32 %v3643_v18, %v3603_v37  ;;  %v3605_v17 = vadd.f32 %v3604_v19, %v559_v1  ;;  %4338 = vmatpush1.bf16.msra.mxu1 %v6007_v29  ;;  %v6042_v14 = vld [vmem:[%s8099_s3 + $0x1c4] ss:$8 sps:$4 sm:$0xff]   ;;  %v5998_v1 = vld [vmem:[%s8099_s3 + $0xa0] ss:$8 sps:$4 sm:$0xff]   ;;  %v6003_v18 = vld [vmem:[%s8099_s3 + $0x94] ss:$8 sps:$4 sm:$0xff]  }
 0x206   :  { %v3606_v10 = vpop.f32.mrf.mxu0  ;;  %4339 = vmatprep.subr.bf16.mxu1 %v6012_v31  ;;  %v6045_v37 = vld [vmem:[%s8099_s3 + $0x1b4] ss:$8 sps:$4 sm:$0xff]   ;;  %v6043_v19 = vld [vmem:[%s8099_s3 + $0x1b0] ss:$8 sps:$4 sm:$0xff]  }
 0x207   :  { %v3647_v23 = vpop.f32.mrf.mxu1  ;;  %v7852_v39 = vadd.f32 %v3645_v21, %v3605_v17  ;;  %4299 = vmatpush1.bf16.msra.mxu0 %v5962_v16  ;;  %v6001_v16 = vld [vmem:[%s8099_s3 + $0x90] ss:$8 sps:$4 sm:$0xff]   ;;  %v6006_v21 = vld [vmem:[%s8099_s3 + $0x84] ss:$8 sps:$4 sm:$0xff]   ;;  %v6004_v17 = vld [vmem:[%s8099_s3 + $0x80] ss:$8 sps:$4 sm:$0xff]  }
 0x208   :  { %v3607_v25 = vpop.f32.mrf.mxu0  ;;  %4300 = vmatprep.subr.bf16.mxu0 %v5967_v46  ;;  %v6048_v46 = vld [vmem:[%s8099_s3 + $0x1a4] ss:$8 sps:$4 sm:$0xff]   ;;  %v6046_v10 = vld [vmem:[%s8099_s3 + $0x1a0] ss:$8 sps:$4 sm:$0xff]   ;;  %v3896_v23 = vpack.c.bf16 %v7659_v15, %v7659_v15  ;;  %v6049_v29 = vld [vmem:[%s8099_s3 + $0x190] ss:$8 sps:$4 sm:$0xff]  }
 0x209   :  { %v3648_v27 = vpop.f32.mrf.mxu1  ;;  %4340 = vmatpush1.bf16.msra.mxu1 %v6010_v34 }
 0x20a   :  { %4341 = vmatprep.subr.bf16.mxu1 %v6015_v38  ;;  %v6051_v27 = vld [vmem:[%s8099_s3 + $0x194] ss:$8 sps:$4 sm:$0xff]   ;;  %v6054_v38 = vld [vmem:[%s8099_s3 + $0x184] ss:$8 sps:$4 sm:$0xff]  }
 0x20b   :  { %4301 = vmatpush1.bf16.msra.mxu0 %v5965_v24 }
 0x20c   :  { %4302 = vmatprep.subr.bf16.mxu0 %v5970_v28 }
 0x20d   :  { %4342 = vmatpush1.bf16.msra.mxu1 %v6013_v40 }
 0x20e   :  { %4343 = vmatprep.subr.bf16.mxu1 %v6018_v6 }
 0x20f   :  { %4303 = vmatpush1.bf16.msra.mxu0 %v5968_v33 }
 0x210   :  { %4304 = vmatprep.subr.bf16.mxu0 %v5973_v36 }
 0x211   :  { %4344 = vmatpush1.bf16.msra.mxu1 %v6016_v45 }
 0x212   :  { %4345 = vmatprep.subr.bf16.mxu1 %v6021_v51 }
 0x213   :  { %4305 = vmatpush1.bf16.msra.mxu0 %v5971_v32 }
 0x214   :  { %4306 = vmatprep.subr.bf16.mxu0 %v5976_v26 }
 0x215   :  { %4346 = vmatpush1.bf16.msra.mxu1 %v6019_v0 }
 0x216   :  { %4347 = vmatprep.subr.bf16.mxu1 %v6024_v41 }
 0x217   :  { %4307 = vmatpush1.bf16.msra.mxu0 %v5974_v44 }
 0x218   :  { %4308 = vmatprep.subr.bf16.mxu0 %v5979_v47 }
 0x219   :  { %4348 = vmatpush1.bf16.msra.mxu1 %v6022_v52  ;;  %v6056_v52 = vld [vmem:[%s8101_s5 + $0x38] sm:$0xff]  }
 0x21a   :  { %4349 = vmatprep.subr.bf16.mxu1 %v6027_v55  ;;  %v6058_v55 = vld [vmem:[%s8101_s5 + $0x30] sm:$0xff]  }
 0x21b   :  { %4309 = vmatpush1.bf16.msra.mxu0 %v5977_v60 }
 0x21c   :  { %4310 = vmatprep.subr.bf16.mxu0 %v5982_v20 }
 0x21d   :  { %4350 = vmatpush1.bf16.msra.mxu1 %v6025_v57  ;;  %v6060_v57 = vld [vmem:[%s8101_s5 + $0x28] sm:$0xff]  }
 0x21e   :  { %4351 = vmatprep.subr.bf16.mxu1 %v6030_v61  ;;  %v6062_v61 = vld [vmem:[%s8101_s5 + $0x20] sm:$0xff]  }
 0x21f   :  { %4311 = vmatpush1.bf16.msra.mxu0 %v5980_v43  ;;  %v6055_v43 = vld [vmem:[%s8101_s5 + $0x78] sm:$0xff]  }
 0x220   :  { %4312 = vmatprep.subr.bf16.mxu0 %v5985_v53  ;;  %v6057_v53 = vld [vmem:[%s8101_s5 + $0x70] sm:$0xff]  }
 0x221   :  { %4352 = vmatpush1.bf16.msra.mxu1 %v6028_v50  ;;  %v6064_v50 = vld [vmem:[%s8101_s5 + $0x18] sm:$0xff]  }
 0x222   :  { %4353 = vmatprep.subr.bf16.mxu1 %v6033_v2  ;;  %v6066_v2 = vld [vmem:[%s8101_s5 + $0x10] sm:$0xff]  }
 0x223   :  { %4313 = vmatpush2.bf16.msra.mxu0 %v5983_v56  ;;  %v6059_v56 = vld [vmem:[%s8101_s5 + $0x68] sm:$0xff]  }
 0x224   :  { %4314 = vmatprep.subr.bf16.mxu0 %v5988_v58  ;;  %v6061_v58 = vld [vmem:[%s8101_s5 + $0x60] sm:$0xff]  }
 0x225   :  { %4354 = vmatpush2.bf16.msra.mxu1 %v6031_v4 }
 0x226   :  { %4355 = vmatprep.subr.bf16.mxu1 %v6036_v7 }
 0x227   :  { %4315 = vmatpush2.bf16.msra.mxu0 %v5986_v62  ;;  %v6063_v62 = vld [vmem:[%s8101_s5 + $0x58] sm:$0xff]  }
 0x228   :  { %4316 = vmatprep.subr.bf16.mxu0 %v5991_v35  ;;  %v6065_v35 = vld [vmem:[%s8101_s5 + $0x50] sm:$0xff]  }
 0x229   :  { %4356 = vmatpush2.bf16.msra.mxu1 %v6034_v48 }
 0x22a   :  { %4357 = vmatprep.subr.bf16.mxu1 %v6039_v54 }
 0x22b   :  { %4317 = vmatpush2.bf16.msra.mxu0 %v5989_v3 }
 0x22c   :  { %4318 = vmatprep.subr.bf16.mxu0 %v5994_v5 }
 0x22d   :  { %4358 = vmatpush2.bf16.msra.mxu1 %v6037_v9 }
 0x22e   :  { %4359 = vmatprep.subr.bf16.mxu1 %v6042_v14 }
 0x22f   :  { %4319 = vmatpush2.bf16.msra.mxu0 %v5992_v8 }
 0x230   :  { %4320 = vmatprep.subr.bf16.mxu0 %v5997_v63 }
 0x231   :  { %4360 = vmatpush2.bf16.msra.mxu1 %v6040_v13 }
 0x232   :  { %4361 = vmatprep.subr.bf16.mxu1 %v6045_v37 }
 0x233   :  { %4321 = vmatpush2.bf16.msra.mxu0 %v5995_v59 }
 0x234   :  { %4322 = vmatprep.subr.bf16.mxu0 %v6000_v11 }
 0x235   :  { %4362 = vmatpush2.bf16.msra.mxu1 %v6043_v19 }
 0x236   :  { %4363 = vmatprep.subr.bf16.mxu1 %v6048_v46 }
 0x237   :  { %4323 = vmatpush2.bf16.msra.mxu0 %v5998_v1 }
 0x238   :  { %4324 = vmatprep.subr.bf16.mxu0 %v6003_v18 }
 0x239   :  { %4364 = vmatpush2.bf16.msra.mxu1 %v6046_v10  ;;  %v6068_v10 = vld [vmem:[%s8101_s5 + $0x8] sm:$0xff]  }
 0x23a   :  { %4365 = vmatprep.subr.bf16.mxu1 %v6051_v27 }
 0x23b   :  { %4325 = vmatpush2.bf16.msra.mxu0 %v6001_v16 }
 0x23c   :  { %4326 = vmatprep.subr.bf16.mxu0 %v6006_v21 }
 0x23d   :  { %4366 = vmatpush2.bf16.msra.mxu1 %v6049_v29 }
 0x23e   :  { %4367 = vmatprep.subr.bf16.mxu1 %v6054_v38 }
 0x23f   :  { %4327 = vmatpush2.bf16.msra.mxu0 %v6004_v17  ;;  %v6067_v17 = vld [vmem:[%s8101_s5 + $0x48] sm:$0xff]  }
 0x240   :  { %5165 = vmatprep.subr.bf16.mxu0 %v6055_v43 }
 0x242   :  { %v3684_v24 = vpop.f32.mrf.mxu0  ;;  %4329 = vmatmul.mubr.bf16.vlgmr.msra.gmra.mxu0 %v3896_v23  ;;  %v6069_v23 = vld [vmem:[%s8101_s5 + $0x40] sm:$0xff]  }
 0x243   :  { %v3725_v25 = vpop.f32.mrf.mxu1  ;;  %v3685_v28 = vadd.f32 %v3684_v24, %v7850_v22  ;;  %v6052_v22 = vld [vmem:[%s8099_s3 + $0x180] ss:$8 sps:$4 sm:$0xff]   ;;  %5166 = vmatpush3.bf16.msra.mxu0 %v6056_v52 }
 0x244   :  { %v3686_v30 = vpop.f32.mrf.mxu0  ;;  %4368 = vmatpush2.bf16.msra.mxu1 %v6052_v22  ;;  %5167 = vmatprep.subr.bf16.mxu0 %v6057_v53  ;;  %v6070_v24 = vld [vmem:[%s8101_s5] sm:$0xff]  }
 0x245   :  { %v3727_v31 = vpop.f32.mrf.mxu1  ;;  %v3726_v33 = vadd.f32 %v3725_v25, %v3685_v28  ;;  %v3687_v34 = vadd.f32 %v3686_v30, %v7852_v39  ;;  %v3964_v25 = vld [vmem:[%s8100_s4] sm:$0x3] }
 0x246   :  { %v3688_v15 = vpop.f32.mrf.mxu0  ;;  %v3969_v27 = vrot.slane %v3964_v25, %v546_v12  ;;  %v3973_v28 = vrot.slane %v3964_v25, %v550_v49 }
 0x247   :  { %v3729_v36 = vpop.f32.mrf.mxu1  ;;  %v3728_v32 = vadd.f32 %v3727_v31, %v3687_v34  ;;  %5168 = vmatpush3.bf16.msra.mxu0 %v6058_v55 }
 0x248   :  { %v3689_v40 = vpop.f32.mrf.mxu0  ;;  %5169 = vmatprep.subr.bf16.mxu0 %v6059_v56 }
 0x249   :  { %v3730_v26 = vpop.f32.mrf.mxu1 }
 0x24b   :  { %5170 = vmatpush3.bf16.msra.mxu0 %v6060_v57 }
 0x24c   :  { %5171 = vmatprep.subr.bf16.mxu0 %v6061_v58 }
 0x24f   :  { %5172 = vmatpush3.bf16.msra.mxu0 %v6062_v61 }
 0x250   :  { %5173 = vmatprep.subr.bf16.mxu0 %v6063_v62 }
 0x253   :  { %5174 = vmatpush3.bf16.msra.mxu0 %v6064_v50 }
 0x254   :  { %5175 = vmatprep.subr.bf16.mxu0 %v6065_v35 }
 0x257   :  { %5176 = vmatpush3.bf16.msra.mxu0 %v6066_v2 }
 0x258   :  { %5177 = vmatprep.subr.bf16.mxu0 %v6067_v17 }
 0x25b   :  { %5178 = vmatpush3.bf16.msra.mxu0 %v6068_v10 }
 0x25c   :  { %5179 = vmatprep.subr.bf16.mxu0 %v6069_v23 }
 0x25f   :  { %5180 = vmatpush3.bf16.msra.mxu0 %v6070_v24 }
 0x282   :  { %v3766_v6 = vpop.f32.mrf.mxu0 }
 0x283   :  { %v3807_v44 = vpop.f32.mrf.mxu1  ;;  %v3767_v45 = vadd.f32 %v3766_v6, %v3726_v33 }
 0x284   :  { %v3768_v39 = vpop.f32.mrf.mxu0 }
 0x285   :  { %v3809_v47 = vpop.f32.mrf.mxu1  ;;  %v3808_v51 = vadd.f32 %v3807_v44, %v3767_v45  ;;  %v3769_v3 = vadd.f32 %v3768_v39, %v3728_v32 }
 0x286   :  { %v3770_v60 = vpop.f32.mrf.mxu0 }
 0x287   :  { %v3811_v0 = vpop.f32.mrf.mxu1  ;;  %v3810_v7 = vadd.f32 %v3809_v47, %v3769_v3 }
 0x288   :  { %v3771_v20 = vpop.f32.mrf.mxu0 }
 0x289   :  { %v3812_v41 = vpop.f32.mrf.mxu1 }
 0x2c2   :  { %v3848_v4 = vpop.f32.mrf.mxu0 }
 0x2c3   :  { %v3889_v5 = vpop.f32.mrf.mxu1  ;;  %v3849_v8 = vadd.f32 %v3848_v4, %v3808_v51 }
 0x2c4   :  { %v3850_v48 = vpop.f32.mrf.mxu0 }
 0x2c5   :  { %v3891_v63 = vpop.f32.mrf.mxu1  ;;  %v3851_v54 = vadd.f32 %v3850_v48, %v3810_v7  ;;  %v3890_v59 = vadd.f32 %v3889_v5, %v3849_v8 }
 0x2c6   :  { %v3852_v9 = vpop.f32.mrf.mxu0 }
 0x2c7   :  { %v3893_v11 = vpop.f32.mrf.mxu1  ;;  %v3892_v14 = vadd.f32 %v3891_v63, %v3851_v54  ;;  %v3898_v37 = vpack.c.bf16 %v3890_v59, %v3890_v59 }
 0x2c8   :  { %v3853_v1 = vpop.f32.mrf.mxu0 }
 0x2c9   :  { %v3894_v13 = vpop.f32.mrf.mxu1  ;;  %v3899_v18 = vpack.c.bf16 %v3892_v14, %v3892_v14 }
 0x2cb   :  { %4369 = vmatprep.mubr.bf16.mxu1 %v3899_v18 }
 0x2cc   :  { %4370 = vmatmul.mubr.bf16.vlgmr.msra.gmra.mxu1 %v3898_v37 }
 0x302   :  { %v4330_v16 = vpop.f32.mrf.mxu0 }
 0x303   :  { %v4331_v29 = vadd.f32 %v4330_v16, %v3969_v27 }
 0x304   :  { %v4332_v19 = vpop.f32.mrf.mxu0 }
 0x305   :  { %v4333_v31 = vadd.f32 %v4332_v19, %v3973_v28 }
 0x306   :  { %v4334_v21 = vpop.f32.mrf.mxu0 }
 0x308   :  { %v4335_v46 = vpop.f32.mrf.mxu0 }
 0x38c   :  { %v4371_v30 = vpop.f32.mrf.mxu1 }
 0x38d   :  { %v4372_v33 = vadd.f32 %v4371_v30, %v4331_v29 }
 0x38e   :  { %v4373_v34 = vpop.f32.mrf.mxu1 }
 0x38f   :  { %v4374_v15 = vadd.f32 %v4373_v34, %v4333_v31  ;;  %v4378_v36 = vmax.f32 %v4372_v33, 0.0 }
 0x390   :  { %v4375_v38 = vpop.f32.mrf.mxu1 }
 0x391   :  { %v4379_v32 = vmax.f32 %v4374_v15, 0.0  ;;  %v4380_v26 = vpack.c.bf16 %v4378_v36, %v4378_v36 }
 0x392   :  { %v4376_v22 = vpop.f32.mrf.mxu1 }
 0x393   :  { %v4381_v40 = vpack.c.bf16 %v4379_v32, %v4379_v32 }
 0x395   :  { %4549 = vmatprep.mubr.bf16.mxu0 %v4381_v40 }
 0x396   :  { %4550 = vmatmul.mubr.bf16.vlgmr.msra.gmra.mxu0 %v4380_v26 }
 0x456   :  { %v5181_v6 = vpop.f32.mrf.mxu0 }
 0x458   :  { %v5182_v44 = vpop.f32.mrf.mxu0 }
 0x459   :  { %v5183_v12 = vadd.f32 %v5182_v44, %v5181_v6 }
 0x45a   :  { %v5184_v49 = vpop.f32.mrf.mxu0 }
 0x45b   :  { %v4552_v45 = vadd.f32 %v5183_v12, %v5148_v42 }
 0x45c   :  { %v5185_v39 = vpop.f32.mrf.mxu0 }
 0x45d   :  { %4557 = vst [vmem:[#allocation2] sm:$0x3] %v4552_v45 }
 0x45e   :  { %6083 = shalt.err (!%p6080_p4)
}
 0x45f   :  { %4567 = dma.vmem_to_hbm [thread:$0]  %s4565_s16, 32, %s8103_s7, [#allocation3]  }
 0x460   :  { %6092 = dma.done.wait [#allocation3], 32  }
 0x461   :  { %6093 = vsyncadd [#allocation3], 4294967264 }
 0x462   :  { %4571 = vsyncpa [#allocation3], 1 }

</bundles_post_ra>
